<compile_context>
chip_gen: v6e
topology: v6e:2x2x1
jax: 0.10.0
libtpu: 0.0.40
codegen_flags: <defaults>
</compile_context>

<pallas_src>
import functools
from math import floor, sqrt

import jax
import jax.numpy as jnp
import numpy as np
from jax.experimental import pallas as pl
from jax.experimental.pallas import tpu as pltpu

_SQRT1_2 = np.float32(0.7071067811865476)


def _gelu_exact(x):
    # exact (erf based) GELU, matching torch.nn.functional.gelu default
    return 0.5 * x * (1.0 + jax.lax.erf(x * _SQRT1_2))


# ----------------------------------------------------------------------------
# Pallas kernels
# ----------------------------------------------------------------------------
def _channel_contract(x, w, use_mxu):
    """(Co,Ci) x (Ci,ts) -> (Co,ts); VPU broadcast-FMA path for tiny channels."""
    if use_mxu:
        return jnp.dot(w, x, preferred_element_type=jnp.float32)
    acc = None
    for i in range(x.shape[0]):                 # Ci is small & static -> unrolled
        t = w[:, i:i + 1] * x[i:i + 1, :]       # (Co,1)*(1,ts) -> (Co,ts)
        acc = t if acc is None else acc + t
    return acc


def _pw_kernel(x_ref, w_ref, b_ref, o_ref, *, apply_gelu, use_mxu):
    """out = maybe_gelu(W @ x + b).   x:(Ci,ts), W:(Co,Ci), b:(Co,1)."""
    acc = _channel_contract(x_ref[...], w_ref[...], use_mxu)
    acc = acc + b_ref[...]
    if apply_gelu:
        acc = _gelu_exact(acc)
    o_ref[...] = acc.astype(o_ref.dtype)


def _pw_skip_kernel(x_ref, w_ref, b_ref, s_ref, o_ref, *, apply_gelu, use_mxu):
    """out = maybe_gelu(W @ x + b + skip)  (1x1 conv fused with spectral skip)."""
    acc = _channel_contract(x_ref[...], w_ref[...], use_mxu)
    acc = acc + b_ref[...] + s_ref[...]
    if apply_gelu:
        acc = _gelu_exact(acc)
    o_ref[...] = acc.astype(o_ref.dtype)


def _specmix_kernel(xr_ref, xi_ref, wr_ref, wi_ref, or_ref, oi_ref):
    """Per-Fourier-mode complex channel mix with the mode axis on LANES.

    xr/xi: (B, Ci, tm),  wr/wi: (Ci, Co, tm),  outputs: (B, Co, tm)
    out[b,o,m] = sum_i x[b,i,m] * w[i,o,m]   (complex multiply, lane-dense)
    """
    xr = xr_ref[...]
    xi = xi_ref[...]
    wr = wr_ref[...]
    wi = wi_ref[...]
    acc_r = None
    acc_i = None
    for i in range(xr.shape[1]):                # Ci broadcast-FMAs on the VPU
        xri = xr[:, i:i + 1, :]                 # (B, 1, tm)
        xii = xi[:, i:i + 1, :]
        wri = wr[i][None, :, :]                 # (1, Co, tm)
        wii = wi[i][None, :, :]
        tr = xri * wri - xii * wii
        ti = xri * wii + xii * wri
        acc_r = tr if acc_r is None else acc_r + tr
        acc_i = ti if acc_i is None else acc_i + ti
    or_ref[...] = acc_r.astype(or_ref.dtype)
    oi_ref[...] = acc_i.astype(oi_ref.dtype)


# ----------------------------------------------------------------------------
# Pallas wrappers
# ----------------------------------------------------------------------------
_VMEM_BUDGET = 8 * 1024 * 1024   # stay well under v5e's 16 MiB default scoped VMEM
_MAX_TS = 1024                   # 1024 lanes already ~86% of HBM roofline


def _spatial_tile(S, B, bytes_per_lane):
    """Largest lane-aligned spatial tile within the VMEM budget, >= 2 grid steps."""
    if S % 128 != 0:
        return S   # TODO(synk): odd spatial extent -> single (lane-masked) block
    ts = 128
    cand = _MAX_TS
    while cand >= 128:
        if S % cand == 0 and cand * bytes_per_lane <= _VMEM_BUDGET:
            ts = cand
            break
        cand -= 128
    # v7x has 2 TensorCores: keep at least 2 grid steps whenever possible.
    while B * (S // ts) < 2 and ts >= 256 and S % (ts // 2) == 0:
        ts //= 2
    return ts


def pointwise_conv(x, w, b, skip=None, apply_gelu=False):
    """1x1 conv on NCHW data: out[b,:,h,w] = W @ x[b,:,h,w] + bias [+skip][gelu].

    x:    (B, Ci, H, W)  float32
    w:    (Co, Ci)       (PyTorch Conv2d weight (Co, Ci, 1, 1) squeezed)
    b:    (Co,)
    skip: (B, Co, H, W)  or None
    """
    B, Ci, H, W = x.shape
    Co = w.shape[0]
    S = H * W
    x3 = x.reshape(B, Ci, S)
    b2 = b.reshape(Co, 1)

    n_streams = Ci + Co + (Co if skip is not None else 0)
    bytes_per_lane = 2 * 4 * n_streams          # double-buffered f32 streams
    ts = _spatial_tile(S, B, bytes_per_lane)
    gs = pl.cdiv(S, ts)

    use_mxu = Ci >= 32                          # tiny channels -> pure VPU FMAs
    need = ts * bytes_per_lane + 2 * 4 * (Co * Ci + Co)
    vmem_limit = int(min(max(8 * need, 16 << 20), 32 << 20))

    in_specs = [
        pl.BlockSpec((None, Ci, ts), lambda bb, ss: (bb, 0, ss)),   # x tile
        pl.BlockSpec((Co, Ci), lambda bb, ss: (0, 0)),              # weight
        pl.BlockSpec((Co, 1), lambda bb, ss: (0, 0)),               # bias
    ]
    args = [x3, w, b2]
    if skip is not None:
        in_specs.append(pl.BlockSpec((None, Co, ts), lambda bb, ss: (bb, 0, ss)))
        args.append(skip.reshape(B, Co, S))
        kernel = functools.partial(_pw_skip_kernel, apply_gelu=apply_gelu,
                                   use_mxu=use_mxu)
    else:
        kernel = functools.partial(_pw_kernel, apply_gelu=apply_gelu,
                                   use_mxu=use_mxu)

    out = pl.pallas_call(
        kernel,
        out_shape=jax.ShapeDtypeStruct((B, Co, S), jnp.float32),
        grid=(B, gs),
        in_specs=in_specs,
        out_specs=pl.BlockSpec((None, Co, ts), lambda bb, ss: (bb, 0, ss)),
        compiler_params=pltpu.CompilerParams(
            dimension_semantics=("parallel", "parallel"),
            vmem_limit_bytes=vmem_limit),
    )(*args)
    return out.reshape(B, Co, H, W)


def _mode_tile(Mp):
    """Mode-axis lane tile: prefer >= 2 grid steps (v7x), 128-aligned."""
    for cand in (512, 256, 128):
        if Mp % cand == 0 and Mp // cand >= 2:
            return cand
    return Mp


def spectral_mix(xr, xi, wr, wi):
    """Fused (w1+w2) complex channel mix for all modes, mode axis lane-dense.

    xr/xi: (B, Ci, Mp) f32,  wr/wi: (Ci, Co, Mp) f32  ->  real, imag (B, Co, Mp).
    """
    B, Ci, Mp = xr.shape
    Co = wr.shape[1]
    tm = _mode_tile(Mp)
    grid = (Mp // tm,)

    x_spec = pl.BlockSpec((B, Ci, tm), lambda m: (0, 0, m))
    w_spec = pl.BlockSpec((Ci, Co, tm), lambda m: (0, 0, m))
    o_spec = pl.BlockSpec((B, Co, tm), lambda m: (0, 0, m))

    o_r, o_i = pl.pallas_call(
        _specmix_kernel,
        out_shape=(jax.ShapeDtypeStruct((B, Co, Mp), jnp.float32),
                   jax.ShapeDtypeStruct((B, Co, Mp), jnp.float32)),
        grid=grid,
        in_specs=[x_spec, x_spec, w_spec, w_spec],
        out_specs=(o_spec, o_spec),
        compiler_params=pltpu.CompilerParams(
            dimension_semantics=("parallel",)),
    )(xr, xi, wr, wi)
    return o_r, o_i


# ----------------------------------------------------------------------------
# Model pieces (glue in plain JAX; hot paths in Pallas)
# ----------------------------------------------------------------------------
def spectral_conv2d(x, p, modes1, modes2):
    """SpectralConv2d_fast.forward.  x: (B, Ci, H, W) f32 -> (B, Co, H, W) f32."""
    B, Ci, H, W = x.shape
    wr, wi = p["wr"], p["wi"]                   # (Ci, Co, Mp), packed at init
    Co = wr.shape[1]
    Mp = wr.shape[2]
    M = 2 * modes1 * modes2
    Wf = W // 2 + 1

    # TODO(synk): FFT has no Pallas primitive; rfft2/irfft2 stay in plain JAX.
    x_ft = jnp.fft.rfft2(x, axes=(-2, -1))      # (B, Ci, H, Wf) complex64

    lo = x_ft[:, :, :modes1, :modes2]
    hi = x_ft[:, :, H - modes1:, :modes2]
    xm = jnp.concatenate([lo, hi], axis=2).reshape(B, Ci, M)   # modes already on lanes
    xr = jnp.real(xm)
    xi = jnp.imag(xm)
    if Mp > M:
        pad = [(0, 0), (0, 0), (0, Mp - M)]
        xr = jnp.pad(xr, pad)
        xi = jnp.pad(xi, pad)

    o_r, o_i = spectral_mix(xr, xi, wr, wi)                    # (B, Co, Mp) each
    out_c = jax.lax.complex(o_r[:, :, :M], o_i[:, :, :M])
    out_c = out_c.reshape(B, Co, 2 * modes1, modes2)
    blk_lo = out_c[:, :, :modes1, :]
    blk_hi = out_c[:, :, modes1:, :]

    if H >= 2 * modes1:
        # assemble out_ft without a full-size zero fill + scatter
        mid = jnp.zeros((B, Co, H - 2 * modes1, modes2), dtype=jnp.complex64)
        rows = jnp.concatenate([blk_lo, mid, blk_hi], axis=2)  # (B, Co, H, modes2)
        out_ft = jnp.pad(rows, [(0, 0), (0, 0), (0, 0), (0, Wf - modes2)])
    else:
        # overlapping mode blocks: keep PyTorch's overwrite ordering
        out_ft = jnp.zeros((B, Co, H, Wf), dtype=jnp.complex64)
        out_ft = out_ft.at[:, :, :modes1, :modes2].set(blk_lo)
        out_ft = out_ft.at[:, :, H - modes1:, :modes2].set(blk_hi)

    return jnp.fft.irfft2(out_ft, s=(H, W), axes=(-2, -1))


def fno2d_forward(x, p, modes):
    """FNO2d.forward: 4 x (spectral conv + 1x1 conv, add, GELU except last)."""
    for layer in range(4):
        sp = spectral_conv2d(x, p["convs"][layer], modes, modes)
        wp = p["ws"][layer]
        x = pointwise_conv(x, wp["w"], wp["b"], skip=sp, apply_gelu=(layer < 3))
    return x


def fnounet_forward(x, params, *, nf):
    m_small = floor(nf / 2) + 1
    m_big = floor(2 * nf / 2) + 1

    # conv0 = Conv2d(in, nf, 1) -> FNO2d(nf)
    x = pointwise_conv(x, params["conv0_pre"]["w"], params["conv0_pre"]["b"])
    x = fno2d_forward(x, params["conv0_fno"], m_small)

    x1 = fno2d_forward(x, params["conv1"], m_small)
    x2 = fno2d_forward(x1, params["conv2"], m_small)
    x3 = fno2d_forward(x2, params["conv3"], m_small)

    x4 = fno2d_forward(jnp.concatenate([x2, x3], axis=1), params["conv4_fno"], m_big)
    x4 = pointwise_conv(x4, params["conv4_post"]["w"], params["conv4_post"]["b"])

    x5 = fno2d_forward(jnp.concatenate([x1, x4], axis=1), params["conv5_fno"], m_big)
    x5 = pointwise_conv(x5, params["conv5_post"]["w"], params["conv5_post"]["b"])

    xout = fno2d_forward(jnp.concatenate([x, x5], axis=1), params["convout_fno"], m_big)
    xout = pointwise_conv(xout, params["convout_post"]["w"], params["convout_post"]["b"])

    return xout                                          # already NCHW


# ----------------------------------------------------------------------------
# Deterministic parameter initialization (shapes follow the PyTorch __init__);
# spectral weights for w1/w2 are fused + lane-padded ONCE here.
# ----------------------------------------------------------------------------
def _pack_spectral_weights(w1r, w1i, w2r, w2i):
    """(Ci,Co,m1,m2) x4 -> wr, wi of shape (Ci, Co, Mp) with [w1 | w2] on lanes."""
    Ci, Co, m1, m2 = w1r.shape
    M = 2 * m1 * m2
    Mp = ((M + 127) // 128) * 128

    def pack(a_lo, a_hi):
        a = jnp.concatenate([a_lo.reshape(Ci, Co, m1 * m2),
                             a_hi.reshape(Ci, Co, m1 * m2)], axis=-1)   # (Ci,Co,M)
        return jnp.pad(a, [(0, 0), (0, 0), (0, Mp - M)])

    return dict(wr=pack(w1r, w2r), wi=pack(w1i, w2i))


def init_spectral(key, c_in, c_out, m1, m2):
    scale = 1.0 / (c_in * c_out)
    k = jax.random.split(key, 4)
    shp = (c_in, c_out, m1, m2)
    w1r = scale * jax.random.uniform(k[0], shp, jnp.float32)
    w1i = scale * jax.random.uniform(k[1], shp, jnp.float32)
    w2r = scale * jax.random.uniform(k[2], shp, jnp.float32)
    w2i = scale * jax.random.uniform(k[3], shp, jnp.float32)
    return _pack_spectral_weights(w1r, w1i, w2r, w2i)


def init_conv1x1(key, c_in, c_out):
    kw, kb = jax.random.split(key)
    bound = 1.0 / sqrt(c_in)
    # stored as (Cout, Cin), i.e. PyTorch's (Cout, Cin, 1, 1) squeezed
    w = jax.random.uniform(kw, (c_out, c_in), jnp.float32, -bound, bound)
    b = jax.random.uniform(kb, (c_out,), jnp.float32, -bound, bound)
    return dict(w=w, b=b)


def init_fno2d(key, width, modes):
    keys = jax.random.split(key, 8)
    convs = [init_spectral(keys[i], width, width, modes, modes) for i in range(4)]
    ws = [init_conv1x1(keys[4 + i], width, width) for i in range(4)]
    return dict(convs=convs, ws=ws)


def init_fnounet(key, in_channels, nf):
    k = jax.random.split(key, 11)
    m_small = floor(nf / 2) + 1
    m_big = floor(2 * nf / 2) + 1
    return dict(
        conv0_pre=init_conv1x1(k[0], in_channels, nf),
        conv0_fno=init_fno2d(k[1], nf, m_small),
        conv1=init_fno2d(k[2], nf, m_small),
        conv2=init_fno2d(k[3], nf, m_small),
        conv3=init_fno2d(k[4], nf, m_small),
        conv4_fno=init_fno2d(k[5], 2 * nf, m_big),
        conv4_post=init_conv1x1(k[6], 2 * nf, nf),
        conv5_fno=init_fno2d(k[7], 2 * nf, m_big),
        conv5_post=init_conv1x1(k[8], 2 * nf, nf),
        convout_fno=init_fno2d(k[9], 2 * nf, m_big),
        convout_post=init_conv1x1(k[10], 2 * nf, in_channels),
    )


# ----------------------------------------------------------------------------
if __name__ == "__main__":
    key = jax.random.PRNGKey(0)
    kx, kp = jax.random.split(key)

    in_channels, nf = 4, 4
    B, H, W = 2, 16, 16

    x = jax.random.normal(kx, (B, in_channels, H, W), dtype=jnp.float32)
    params = init_fnounet(kp, in_channels, nf)

    fwd = jax.jit(functools.partial(fnounet_forward, nf=nf))
    out = fwd(x, params)
    out = jax.block_until_ready(out)

    assert out.shape == (B, in_channels, H, W), out.shape
    assert out.dtype == jnp.float32
    assert bool(jnp.all(jnp.isfinite(out)))
    print("KERNEL_OK")
</pallas_src>

<mosaic_0001>
module attributes {stable_mosaic.version = 11 : i64} {
  func.func @_pw_kernel(%arg0: i32, %arg1: i32, %arg2: memref<1x4x256xf32, #tpu.memory_space<vmem>>, %arg3: memref<4x4xf32, #tpu.memory_space<vmem>>, %arg4: memref<4x1xf32, #tpu.memory_space<vmem>>, %arg5: memref<1x4x256xf32, #tpu.memory_space<vmem>>) attributes {dimension_semantics = [#tpu.dimension_semantics<parallel>, #tpu.dimension_semantics<parallel>], iteration_bounds = array<i64: 2, 1>, scalar_prefetch = 0 : i64, scratch_operands = 0 : i64, tpu.core_type = #tpu.core_type<tc>, window_params = [{transform_indices = @transform_0, window_bounds = array<i64: 1, 4, 256>}, {pipeline_mode = #tpu.pipeline_mode<synchronous>, transform_indices = @transform_1, window_bounds = array<i64: 4, 4>}, {pipeline_mode = #tpu.pipeline_mode<synchronous>, transform_indices = @transform_2, window_bounds = array<i64: 4, 1>}, {transform_indices = @transform_3, window_bounds = array<i64: 1, 4, 256>}]} {
    %c0 = arith.constant 0 : index
    %c0_0 = arith.constant 0 : index
    %c0_1 = arith.constant 0 : index
    %0 = vector.load %arg2[%c0, %c0_0, %c0_1] : memref<1x4x256xf32, #tpu.memory_space<vmem>>, vector<1x4x256xf32>
    %1 = vector.shape_cast %0 : vector<1x4x256xf32> to vector<4x256xf32>
    %c0_2 = arith.constant 0 : index
    %c0_3 = arith.constant 0 : index
    %2 = vector.load %arg3[%c0_2, %c0_3] : memref<4x4xf32, #tpu.memory_space<vmem>>, vector<4x4xf32>
    %3 = vector.extract_strided_slice %2 {offsets = [0, 0], sizes = [4, 1], strides = [1, 1]} : vector<4x4xf32> to vector<4x1xf32>
    %4 = vector.extract_strided_slice %1 {offsets = [0, 0], sizes = [1, 256], strides = [1, 1]} : vector<4x256xf32> to vector<1x256xf32>
    %5 = vector.broadcast %3 : vector<4x1xf32> to vector<4x256xf32>
    %6 = vector.broadcast %4 : vector<1x256xf32> to vector<4x256xf32>
    %7 = arith.mulf %5, %6 : vector<4x256xf32>
    %8 = vector.extract_strided_slice %2 {offsets = [0, 1], sizes = [4, 1], strides = [1, 1]} : vector<4x4xf32> to vector<4x1xf32>
    %9 = vector.extract_strided_slice %1 {offsets = [1, 0], sizes = [1, 256], strides = [1, 1]} : vector<4x256xf32> to vector<1x256xf32>
    %10 = vector.broadcast %8 : vector<4x1xf32> to vector<4x256xf32>
    %11 = vector.broadcast %9 : vector<1x256xf32> to vector<4x256xf32>
    %12 = arith.mulf %10, %11 : vector<4x256xf32>
    %13 = arith.addf %7, %12 : vector<4x256xf32>
    %14 = vector.extract_strided_slice %2 {offsets = [0, 2], sizes = [4, 1], strides = [1, 1]} : vector<4x4xf32> to vector<4x1xf32>
    %15 = vector.extract_strided_slice %1 {offsets = [2, 0], sizes = [1, 256], strides = [1, 1]} : vector<4x256xf32> to vector<1x256xf32>
    %16 = vector.broadcast %14 : vector<4x1xf32> to vector<4x256xf32>
    %17 = vector.broadcast %15 : vector<1x256xf32> to vector<4x256xf32>
    %18 = arith.mulf %16, %17 : vector<4x256xf32>
    %19 = arith.addf %13, %18 : vector<4x256xf32>
    %20 = vector.extract_strided_slice %2 {offsets = [0, 3], sizes = [4, 1], strides = [1, 1]} : vector<4x4xf32> to vector<4x1xf32>
    %21 = vector.extract_strided_slice %1 {offsets = [3, 0], sizes = [1, 256], strides = [1, 1]} : vector<4x256xf32> to vector<1x256xf32>
    %22 = vector.broadcast %20 : vector<4x1xf32> to vector<4x256xf32>
    %23 = vector.broadcast %21 : vector<1x256xf32> to vector<4x256xf32>
    %24 = arith.mulf %22, %23 : vector<4x256xf32>
    %25 = arith.addf %19, %24 : vector<4x256xf32>
    %c0_4 = arith.constant 0 : index
    %c0_5 = arith.constant 0 : index
    %26 = vector.load %arg4[%c0_4, %c0_5] : memref<4x1xf32, #tpu.memory_space<vmem>>, vector<4x1xf32>
    %27 = vector.broadcast %26 : vector<4x1xf32> to vector<4x256xf32>
    %28 = arith.addf %25, %27 : vector<4x256xf32>
    %c0_6 = arith.constant 0 : index
    %c0_7 = arith.constant 0 : index
    %c0_8 = arith.constant 0 : index
    %29 = vector.load %arg5[%c0_6, %c0_7, %c0_8] : memref<1x4x256xf32, #tpu.memory_space<vmem>>, vector<1x4x256xf32>
    %30 = vector.shape_cast %29 : vector<1x4x256xf32> to vector<4x256xf32>
    %31 = vector.shape_cast %28 : vector<4x256xf32> to vector<1x4x256xf32>
    tpu.vector_store %arg5[%c0_6, %c0_7, %c0_8], %31 {strides = array<i32>} : memref<1x4x256xf32, #tpu.memory_space<vmem>>, vector<1x4x256xf32>,
    return
  }
  func.func @transform_0(%arg0: i32, %arg1: i32) -> (i32, i32, i32) {
    %c0_i32 = arith.constant 0 : i32
    %c0_i32_0 = arith.constant 0 : i32
    return %arg0, %c0_i32, %arg1 : i32, i32, i32
  }
  func.func @transform_1(%arg0: i32, %arg1: i32) -> (i32, i32) {
    %c0_i32 = arith.constant 0 : i32
    %c0_i32_0 = arith.constant 0 : i32
    %c0_i32_1 = arith.constant 0 : i32
    return %c0_i32, %c0_i32_0 : i32, i32
  }
  func.func @transform_2(%arg0: i32, %arg1: i32) -> (i32, i32) {
    %c0_i32 = arith.constant 0 : i32
    %c0_i32_0 = arith.constant 0 : i32
    %c0_i32_1 = arith.constant 0 : i32
    return %c0_i32, %c0_i32_0 : i32, i32
  }
  func.func @transform_3(%arg0: i32, %arg1: i32) -> (i32, i32, i32) {
    %c0_i32 = arith.constant 0 : i32
    %c0_i32_0 = arith.constant 0 : i32
    return %arg0, %c0_i32, %arg1 : i32, i32, i32
  }
}

module attributes {stable_mosaic.version = 11 : i64} {
  func.func @_specmix_kernel(%arg0: i32, %arg1: memref<2x4x128xf32, #tpu.memory_space<vmem>>, %arg2: memref<2x4x128xf32, #tpu.memory_space<vmem>>, %arg3: memref<4x4x128xf32, #tpu.memory_space<vmem>>, %arg4: memref<4x4x128xf32, #tpu.memory_space<vmem>>, %arg5: memref<2x4x128xf32, #tpu.memory_space<vmem>>, %arg6: memref<2x4x128xf32, #tpu.memory_space<vmem>>) attributes {dimension_semantics = [#tpu.dimension_semantics<parallel>], iteration_bounds = array<i64: 1>, scalar_prefetch = 0 : i64, scratch_operands = 0 : i64, tpu.core_type = #tpu.core_type<tc>, window_params = [{transform_indices = @transform_0, window_bounds = array<i64: 2, 4, 128>}, {transform_indices = @transform_1, window_bounds = array<i64: 2, 4, 128>}, {transform_indices = @transform_2, window_bounds = array<i64: 4, 4, 128>}, {transform_indices = @transform_3, window_bounds = array<i64: 4, 4, 128>}, {transform_indices = @transform_4, window_bounds = array<i64: 2, 4, 128>}, {transform_indices = @transform_5, window_bounds = array<i64: 2, 4, 128>}]} {
    %c0 = arith.constant 0 : index
    %c0_0 = arith.constant 0 : index
    %c0_1 = arith.constant 0 : index
    %0 = vector.load %arg1[%c0, %c0_0, %c0_1] : memref<2x4x128xf32, #tpu.memory_space<vmem>>, vector<2x4x128xf32>
    %c0_2 = arith.constant 0 : index
    %c0_3 = arith.constant 0 : index
    %c0_4 = arith.constant 0 : index
    %1 = vector.load %arg2[%c0_2, %c0_3, %c0_4] : memref<2x4x128xf32, #tpu.memory_space<vmem>>, vector<2x4x128xf32>
    %c0_5 = arith.constant 0 : index
    %c0_6 = arith.constant 0 : index
    %c0_7 = arith.constant 0 : index
    %2 = vector.load %arg3[%c0_5, %c0_6, %c0_7] : memref<4x4x128xf32, #tpu.memory_space<vmem>>, vector<4x4x128xf32>
    %c0_8 = arith.constant 0 : index
    %c0_9 = arith.constant 0 : index
    %c0_10 = arith.constant 0 : index
    %3 = vector.load %arg4[%c0_8, %c0_9, %c0_10] : memref<4x4x128xf32, #tpu.memory_space<vmem>>, vector<4x4x128xf32>
    %4 = vector.extract_strided_slice %0 {offsets = [0, 0, 0], sizes = [2, 1, 128], strides = [1, 1, 1]} : vector<2x4x128xf32> to vector<2x1x128xf32>
    %5 = vector.extract_strided_slice %1 {offsets = [0, 0, 0], sizes = [2, 1, 128], strides = [1, 1, 1]} : vector<2x4x128xf32> to vector<2x1x128xf32>
    %6 = vector.extract_strided_slice %2 {offsets = [0, 0, 0], sizes = [1, 4, 128], strides = [1, 1, 1]} : vector<4x4x128xf32> to vector<1x4x128xf32>
    %7 = vector.shape_cast %6 : vector<1x4x128xf32> to vector<4x128xf32>
    %8 = vector.shape_cast %7 : vector<4x128xf32> to vector<1x4x128xf32>
    %9 = vector.extract_strided_slice %3 {offsets = [0, 0, 0], sizes = [1, 4, 128], strides = [1, 1, 1]} : vector<4x4x128xf32> to vector<1x4x128xf32>
    %10 = vector.shape_cast %9 : vector<1x4x128xf32> to vector<4x128xf32>
    %11 = vector.shape_cast %10 : vector<4x128xf32> to vector<1x4x128xf32>
    %12 = vector.broadcast %4 : vector<2x1x128xf32> to vector<2x4x128xf32>
    %13 = vector.broadcast %8 : vector<1x4x128xf32> to vector<2x4x128xf32>
    %14 = arith.mulf %12, %13 : vector<2x4x128xf32>
    %15 = vector.broadcast %5 : vector<2x1x128xf32> to vector<2x4x128xf32>
    %16 = vector.broadcast %11 : vector<1x4x128xf32> to vector<2x4x128xf32>
    %17 = arith.mulf %15, %16 : vector<2x4x128xf32>
    %18 = arith.subf %14, %17 : vector<2x4x128xf32>
    %19 = vector.broadcast %4 : vector<2x1x128xf32> to vector<2x4x128xf32>
    %20 = vector.broadcast %11 : vector<1x4x128xf32> to vector<2x4x128xf32>
    %21 = arith.mulf %19, %20 : vector<2x4x128xf32>
    %22 = vector.broadcast %5 : vector<2x1x128xf32> to vector<2x4x128xf32>
    %23 = vector.broadcast %8 : vector<1x4x128xf32> to vector<2x4x128xf32>
    %24 = arith.mulf %22, %23 : vector<2x4x128xf32>
    %25 = arith.addf %21, %24 : vector<2x4x128xf32>
    %26 = vector.extract_strided_slice %0 {offsets = [0, 1, 0], sizes = [2, 1, 128], strides = [1, 1, 1]} : vector<2x4x128xf32> to vector<2x1x128xf32>
    %27 = vector.extract_strided_slice %1 {offsets = [0, 1, 0], sizes = [2, 1, 128], strides = [1, 1, 1]} : vector<2x4x128xf32> to vector<2x1x128xf32>
    %28 = vector.extract_strided_slice %2 {offsets = [1, 0, 0], sizes = [1, 4, 128], strides = [1, 1, 1]} : vector<4x4x128xf32> to vector<1x4x128xf32>
    %29 = vector.shape_cast %28 : vector<1x4x128xf32> to vector<4x128xf32>
    %30 = vector.shape_cast %29 : vector<4x128xf32> to vector<1x4x128xf32>
    %31 = vector.extract_strided_slice %3 {offsets = [1, 0, 0], sizes = [1, 4, 128], strides = [1, 1, 1]} : vector<4x4x128xf32> to vector<1x4x128xf32>
    %32 = vector.shape_cast %31 : vector<1x4x128xf32> to vector<4x128xf32>
    %33 = vector.shape_cast %32 : vector<4x128xf32> to vector<1x4x128xf32>
    %34 = vector.broadcast %26 : vector<2x1x128xf32> to vector<2x4x128xf32>
    %35 = vector.broadcast %30 : vector<1x4x128xf32> to vector<2x4x128xf32>
    %36 = arith.mulf %34, %35 : vector<2x4x128xf32>
    %37 = vector.broadcast %27 : vector<2x1x128xf32> to vector<2x4x128xf32>
    %38 = vector.broadcast %33 : vector<1x4x128xf32> to vector<2x4x128xf32>
    %39 = arith.mulf %37, %38 : vector<2x4x128xf32>
    %40 = arith.subf %36, %39 : vector<2x4x128xf32>
    %41 = vector.broadcast %26 : vector<2x1x128xf32> to vector<2x4x128xf32>
    %42 = vector.broadcast %33 : vector<1x4x128xf32> to vector<2x4x128xf32>
    %43 = arith.mulf %41, %42 : vector<2x4x128xf32>
    %44 = vector.broadcast %27 : vector<2x1x128xf32> to vector<2x4x128xf32>
    %45 = vector.broadcast %30 : vector<1x4x128xf32> to vector<2x4x128xf32>
    %46 = arith.mulf %44, %45 : vector<2x4x128xf32>
    %47 = arith.addf %43, %46 : vector<2x4x128xf32>
    %48 = arith.addf %18, %40 : vector<2x4x128xf32>
    %49 = arith.addf %25, %47 : vector<2x4x128xf32>
    %50 = vector.extract_strided_slice %0 {offsets = [0, 2, 0], sizes = [2, 1, 128], strides = [1, 1, 1]} : vector<2x4x128xf32> to vector<2x1x128xf32>
    %51 = vector.extract_strided_slice %1 {offsets = [0, 2, 0], sizes = [2, 1, 128], strides = [1, 1, 1]} : vector<2x4x128xf32> to vector<2x1x128xf32>
    %52 = vector.extract_strided_slice %2 {offsets = [2, 0, 0], sizes = [1, 4, 128], strides = [1, 1, 1]} : vector<4x4x128xf32> to vector<1x4x128xf32>
    %53 = vector.shape_cast %52 : vector<1x4x128xf32> to vector<4x128xf32>
    %54 = vector.shape_cast %53 : vector<4x128xf32> to vector<1x4x128xf32>
    %55 = vector.extract_strided_slice %3 {offsets = [2, 0, 0], sizes = [1, 4, 128], strides = [1, 1, 1]} : vector<4x4x128xf32> to vector<1x4x128xf32>
    %56 = vector.shape_cast %55 : vector<1x4x128xf32> to vector<4x128xf32>
    %57 = vector.shape_cast %56 : vector<4x128xf32> to vector<1x4x128xf32>
    %58 = vector.broadcast %50 : vector<2x1x128xf32> to vector<2x4x128xf32>
    %59 = vector.broadcast %54 : vector<1x4x128xf32> to vector<2x4x128xf32>
    %60 = arith.mulf %58, %59 : vector<2x4x128xf32>
    %61 = vector.broadcast %51 : vector<2x1x128xf32> to vector<2x4x128xf32>
    %62 = vector.broadcast %57 : vector<1x4x128xf32> to vector<2x4x128xf32>
    %63 = arith.mulf %61, %62 : vector<2x4x128xf32>
    %64 = arith.subf %60, %63 : vector<2x4x128xf32>
    %65 = vector.broadcast %50 : vector<2x1x128xf32> to vector<2x4x128xf32>
    %66 = vector.broadcast %57 : vector<1x4x128xf32> to vector<2x4x128xf32>
    %67 = arith.mulf %65, %66 : vector<2x4x128xf32>
    %68 = vector.broadcast %51 : vector<2x1x128xf32> to vector<2x4x128xf32>
    %69 = vector.broadcast %54 : vector<1x4x128xf32> to vector<2x4x128xf32>
    %70 = arith.mulf %68, %69 : vector<2x4x128xf32>
    %71 = arith.addf %67, %70 : vector<2x4x128xf32>
    %72 = arith.addf %48, %64 : vector<2x4x128xf32>
    %73 = arith.addf %49, %71 : vector<2x4x128xf32>
    %74 = vector.extract_strided_slice %0 {offsets = [0, 3, 0], sizes = [2, 1, 128], strides = [1, 1, 1]} : vector<2x4x128xf32> to vector<2x1x128xf32>
    %75 = vector.extract_strided_slice %1 {offsets = [0, 3, 0], sizes = [2, 1, 128], strides = [1, 1, 1]} : vector<2x4x128xf32> to vector<2x1x128xf32>
    %76 = vector.extract_strided_slice %2 {offsets = [3, 0, 0], sizes = [1, 4, 128], strides = [1, 1, 1]} : vector<4x4x128xf32> to vector<1x4x128xf32>
    %77 = vector.shape_cast %76 : vector<1x4x128xf32> to vector<4x128xf32>
    %78 = vector.shape_cast %77 : vector<4x128xf32> to vector<1x4x128xf32>
    %79 = vector.extract_strided_slice %3 {offsets = [3, 0, 0], sizes = [1, 4, 128], strides = [1, 1, 1]} : vector<4x4x128xf32> to vector<1x4x128xf32>
    %80 = vector.shape_cast %79 : vector<1x4x128xf32> to vector<4x128xf32>
    %81 = vector.shape_cast %80 : vector<4x128xf32> to vector<1x4x128xf32>
    %82 = vector.broadcast %74 : vector<2x1x128xf32> to vector<2x4x128xf32>
    %83 = vector.broadcast %78 : vector<1x4x128xf32> to vector<2x4x128xf32>
    %84 = arith.mulf %82, %83 : vector<2x4x128xf32>
    %85 = vector.broadcast %75 : vector<2x1x128xf32> to vector<2x4x128xf32>
    %86 = vector.broadcast %81 : vector<1x4x128xf32> to vector<2x4x128xf32>
    %87 = arith.mulf %85, %86 : vector<2x4x128xf32>
    %88 = arith.subf %84, %87 : vector<2x4x128xf32>
    %89 = vector.broadcast %74 : vector<2x1x128xf32> to vector<2x4x128xf32>
    %90 = vector.broadcast %81 : vector<1x4x128xf32> to vector<2x4x128xf32>
    %91 = arith.mulf %89, %90 : vector<2x4x128xf32>
    %92 = vector.broadcast %75 : vector<2x1x128xf32> to vector<2x4x128xf32>
    %93 = vector.broadcast %78 : vector<1x4x128xf32> to vector<2x4x128xf32>
    %94 = arith.mulf %92, %93 : vector<2x4x128xf32>
    %95 = arith.addf %91, %94 : vector<2x4x128xf32>
    %96 = arith.addf %72, %88 : vector<2x4x128xf32>
    %97 = arith.addf %73, %95 : vector<2x4x128xf32>
    %c0_11 = arith.constant 0 : index
    %c0_12 = arith.constant 0 : index
    %c0_13 = arith.constant 0 : index
    %98 = vector.load %arg5[%c0_11, %c0_12, %c0_13] : memref<2x4x128xf32, #tpu.memory_space<vmem>>, vector<2x4x128xf32>
    tpu.vector_store %arg5[%c0_11, %c0_12, %c0_13], %96 {strides = array<i32>} : memref<2x4x128xf32, #tpu.memory_space<vmem>>, vector<2x4x128xf32>,
    %c0_14 = arith.constant 0 : index
    %c0_15 = arith.constant 0 : index
    %c0_16 = arith.constant 0 : index
    %99 = vector.load %arg6[%c0_14, %c0_15, %c0_16] : memref<2x4x128xf32, #tpu.memory_space<vmem>>, vector<2x4x128xf32>
    tpu.vector_store %arg6[%c0_14, %c0_15, %c0_16], %97 {strides = array<i32>} : memref<2x4x128xf32, #tpu.memory_space<vmem>>, vector<2x4x128xf32>,
    return
  }
  func.func @transform_0(%arg0: i32) -> (i32, i32, i32) {
    %c0_i32 = arith.constant 0 : i32
    %c0_i32_0 = arith.constant 0 : i32
    %c0_i32_1 = arith.constant 0 : i32
    return %c0_i32, %c0_i32_0, %arg0 : i32, i32, i32
  }
  func.func @transform_1(%arg0: i32) -> (i32, i32, i32) {
    %c0_i32 = arith.constant 0 : i32
    %c0_i32_0 = arith.constant 0 : i32
    %c0_i32_1 = arith.constant 0 : i32
    return %c0_i32, %c0_i32_0, %arg0 : i32, i32, i32
  }
  func.func @transform_2(%arg0: i32) -> (i32, i32, i32) {
    %c0_i32 = arith.constant 0 : i32
    %c0_i32_0 = arith.constant 0 : i32
    %c0_i32_1 = arith.constant 0 : i32
    return %c0_i32, %c0_i32_0, %arg0 : i32, i32, i32
  }
  func.func @transform_3(%arg0: i32) -> (i32, i32, i32) {
    %c0_i32 = arith.constant 0 : i32
    %c0_i32_0 = arith.constant 0 : i32
    %c0_i32_1 = arith.constant 0 : i32
    return %c0_i32, %c0_i32_0, %arg0 : i32, i32, i32
  }
  func.func @transform_4(%arg0: i32) -> (i32, i32, i32) {
    %c0_i32 = arith.constant 0 : i32
    %c0_i32_0 = arith.constant 0 : i32
    %c0_i32_1 = arith.constant 0 : i32
    return %c0_i32, %c0_i32_0, %arg0 : i32, i32, i32
  }
  func.func @transform_5(%arg0: i32) -> (i32, i32, i32) {
    %c0_i32 = arith.constant 0 : i32
    %c0_i32_0 = arith.constant 0 : i32
    %c0_i32_1 = arith.constant 0 : i32
    return %c0_i32, %c0_i32_0, %arg0 : i32, i32, i32
  }
}

module attributes {stable_mosaic.version = 11 : i64} {
  func.func @_pw_skip_kernel(%arg0: i32, %arg1: i32, %arg2: memref<1x4x256xf32, #tpu.memory_space<vmem>>, %arg3: memref<4x4xf32, #tpu.memory_space<vmem>>, %arg4: memref<4x1xf32, #tpu.memory_space<vmem>>, %arg5: memref<1x4x256xf32, #tpu.memory_space<vmem>>, %arg6: memref<1x4x256xf32, #tpu.memory_space<vmem>>) attributes {dimension_semantics = [#tpu.dimension_semantics<parallel>, #tpu.dimension_semantics<parallel>], iteration_bounds = array<i64: 2, 1>, scalar_prefetch = 0 : i64, scratch_operands = 0 : i64, tpu.core_type = #tpu.core_type<tc>, window_params = [{transform_indices = @transform_0, window_bounds = array<i64: 1, 4, 256>}, {pipeline_mode = #tpu.pipeline_mode<synchronous>, transform_indices = @transform_1, window_bounds = array<i64: 4, 4>}, {pipeline_mode = #tpu.pipeline_mode<synchronous>, transform_indices = @transform_2, window_bounds = array<i64: 4, 1>}, {transform_indices = @transform_3, window_bounds = array<i64: 1, 4, 256>}, {transform_indices = @transform_4, window_bounds = array<i64: 1, 4, 256>}]} {
    %c0 = arith.constant 0 : index
    %c0_0 = arith.constant 0 : index
    %c0_1 = arith.constant 0 : index
    %0 = vector.load %arg2[%c0, %c0_0, %c0_1] : memref<1x4x256xf32, #tpu.memory_space<vmem>>, vector<1x4x256xf32>
    %1 = vector.shape_cast %0 : vector<1x4x256xf32> to vector<4x256xf32>
    %c0_2 = arith.constant 0 : index
    %c0_3 = arith.constant 0 : index
    %2 = vector.load %arg3[%c0_2, %c0_3] : memref<4x4xf32, #tpu.memory_space<vmem>>, vector<4x4xf32>
    %3 = vector.extract_strided_slice %2 {offsets = [0, 0], sizes = [4, 1], strides = [1, 1]} : vector<4x4xf32> to vector<4x1xf32>
    %4 = vector.extract_strided_slice %1 {offsets = [0, 0], sizes = [1, 256], strides = [1, 1]} : vector<4x256xf32> to vector<1x256xf32>
    %5 = vector.broadcast %3 : vector<4x1xf32> to vector<4x256xf32>
    %6 = vector.broadcast %4 : vector<1x256xf32> to vector<4x256xf32>
    %7 = arith.mulf %5, %6 : vector<4x256xf32>
    %8 = vector.extract_strided_slice %2 {offsets = [0, 1], sizes = [4, 1], strides = [1, 1]} : vector<4x4xf32> to vector<4x1xf32>
    %9 = vector.extract_strided_slice %1 {offsets = [1, 0], sizes = [1, 256], strides = [1, 1]} : vector<4x256xf32> to vector<1x256xf32>
    %10 = vector.broadcast %8 : vector<4x1xf32> to vector<4x256xf32>
    %11 = vector.broadcast %9 : vector<1x256xf32> to vector<4x256xf32>
    %12 = arith.mulf %10, %11 : vector<4x256xf32>
    %13 = arith.addf %7, %12 : vector<4x256xf32>
    %14 = vector.extract_strided_slice %2 {offsets = [0, 2], sizes = [4, 1], strides = [1, 1]} : vector<4x4xf32> to vector<4x1xf32>
    %15 = vector.extract_strided_slice %1 {offsets = [2, 0], sizes = [1, 256], strides = [1, 1]} : vector<4x256xf32> to vector<1x256xf32>
    %16 = vector.broadcast %14 : vector<4x1xf32> to vector<4x256xf32>
    %17 = vector.broadcast %15 : vector<1x256xf32> to vector<4x256xf32>
    %18 = arith.mulf %16, %17 : vector<4x256xf32>
    %19 = arith.addf %13, %18 : vector<4x256xf32>
    %20 = vector.extract_strided_slice %2 {offsets = [0, 3], sizes = [4, 1], strides = [1, 1]} : vector<4x4xf32> to vector<4x1xf32>
    %21 = vector.extract_strided_slice %1 {offsets = [3, 0], sizes = [1, 256], strides = [1, 1]} : vector<4x256xf32> to vector<1x256xf32>
    %22 = vector.broadcast %20 : vector<4x1xf32> to vector<4x256xf32>
    %23 = vector.broadcast %21 : vector<1x256xf32> to vector<4x256xf32>
    %24 = arith.mulf %22, %23 : vector<4x256xf32>
    %25 = arith.addf %19, %24 : vector<4x256xf32>
    %c0_4 = arith.constant 0 : index
    %c0_5 = arith.constant 0 : index
    %26 = vector.load %arg4[%c0_4, %c0_5] : memref<4x1xf32, #tpu.memory_space<vmem>>, vector<4x1xf32>
    %27 = vector.broadcast %26 : vector<4x1xf32> to vector<4x256xf32>
    %28 = arith.addf %25, %27 : vector<4x256xf32>
    %c0_6 = arith.constant 0 : index
    %c0_7 = arith.constant 0 : index
    %c0_8 = arith.constant 0 : index
    %29 = vector.load %arg5[%c0_6, %c0_7, %c0_8] : memref<1x4x256xf32, #tpu.memory_space<vmem>>, vector<1x4x256xf32>
    %30 = vector.shape_cast %29 : vector<1x4x256xf32> to vector<4x256xf32>
    %31 = arith.addf %28, %30 : vector<4x256xf32>
    %cst = arith.constant 5.000000e-01 : f32
    %32 = vector.broadcast %cst : f32 to vector<4x256xf32>
    %33 = arith.mulf %32, %31 : vector<4x256xf32>
    %cst_9 = arith.constant 0.707106769 : f32
    %34 = vector.broadcast %cst_9 : f32 to vector<4x256xf32>
    %35 = arith.mulf %31, %34 : vector<4x256xf32>
    %36 = math.erf %35 : vector<4x256xf32>
    %cst_10 = arith.constant 1.000000e+00 : f32
    %37 = vector.broadcast %cst_10 : f32 to vector<4x256xf32>
    %38 = arith.addf %37, %36 : vector<4x256xf32>
    %39 = arith.mulf %33, %38 : vector<4x256xf32>
    %c0_11 = arith.constant 0 : index
    %c0_12 = arith.constant 0 : index
    %c0_13 = arith.constant 0 : index
    %40 = vector.load %arg6[%c0_11, %c0_12, %c0_13] : memref<1x4x256xf32, #tpu.memory_space<vmem>>, vector<1x4x256xf32>
    %41 = vector.shape_cast %40 : vector<1x4x256xf32> to vector<4x256xf32>
    %42 = vector.shape_cast %39 : vector<4x256xf32> to vector<1x4x256xf32>
    tpu.vector_store %arg6[%c0_11, %c0_12, %c0_13], %42 {strides = array<i32>} : memref<1x4x256xf32, #tpu.memory_space<vmem>>, vector<1x4x256xf32>,
    return
  }
  func.func @transform_0(%arg0: i32, %arg1: i32) -> (i32, i32, i32) {
    %c0_i32 = arith.constant 0 : i32
    %c0_i32_0 = arith.constant 0 : i32
    return %arg0, %c0_i32, %arg1 : i32, i32, i32
  }
  func.func @transform_1(%arg0: i32, %arg1: i32) -> (i32, i32) {
    %c0_i32 = arith.constant 0 : i32
    %c0_i32_0 = arith.constant 0 : i32
    %c0_i32_1 = arith.constant 0 : i32
    return %c0_i32, %c0_i32_0 : i32, i32
  }
  func.func @transform_2(%arg0: i32, %arg1: i32) -> (i32, i32) {
    %c0_i32 = arith.constant 0 : i32
    %c0_i32_0 = arith.constant 0 : i32
    %c0_i32_1 = arith.constant 0 : i32
    return %c0_i32, %c0_i32_0 : i32, i32
  }
  func.func @transform_3(%arg0: i32, %arg1: i32) -> (i32, i32, i32) {
    %c0_i32 = arith.constant 0 : i32
    %c0_i32_0 = arith.constant 0 : i32
    return %arg0, %c0_i32, %arg1 : i32, i32, i32
  }
  func.func @transform_4(%arg0: i32, %arg1: i32) -> (i32, i32, i32) {
    %c0_i32 = arith.constant 0 : i32
    %c0_i32_0 = arith.constant 0 : i32
    return %arg0, %c0_i32, %arg1 : i32, i32, i32
  }
}

module attributes {stable_mosaic.version = 11 : i64} {
  func.func @_pw_skip_kernel(%arg0: i32, %arg1: i32, %arg2: memref<1x4x256xf32, #tpu.memory_space<vmem>>, %arg3: memref<4x4xf32, #tpu.memory_space<vmem>>, %arg4: memref<4x1xf32, #tpu.memory_space<vmem>>, %arg5: memref<1x4x256xf32, #tpu.memory_space<vmem>>, %arg6: memref<1x4x256xf32, #tpu.memory_space<vmem>>) attributes {dimension_semantics = [#tpu.dimension_semantics<parallel>, #tpu.dimension_semantics<parallel>], iteration_bounds = array<i64: 2, 1>, scalar_prefetch = 0 : i64, scratch_operands = 0 : i64, tpu.core_type = #tpu.core_type<tc>, window_params = [{transform_indices = @transform_0, window_bounds = array<i64: 1, 4, 256>}, {pipeline_mode = #tpu.pipeline_mode<synchronous>, transform_indices = @transform_1, window_bounds = array<i64: 4, 4>}, {pipeline_mode = #tpu.pipeline_mode<synchronous>, transform_indices = @transform_2, window_bounds = array<i64: 4, 1>}, {transform_indices = @transform_3, window_bounds = array<i64: 1, 4, 256>}, {transform_indices = @transform_4, window_bounds = array<i64: 1, 4, 256>}]} {
    %c0 = arith.constant 0 : index
    %c0_0 = arith.constant 0 : index
    %c0_1 = arith.constant 0 : index
    %0 = vector.load %arg2[%c0, %c0_0, %c0_1] : memref<1x4x256xf32, #tpu.memory_space<vmem>>, vector<1x4x256xf32>
    %1 = vector.shape_cast %0 : vector<1x4x256xf32> to vector<4x256xf32>
    %c0_2 = arith.constant 0 : index
    %c0_3 = arith.constant 0 : index
    %2 = vector.load %arg3[%c0_2, %c0_3] : memref<4x4xf32, #tpu.memory_space<vmem>>, vector<4x4xf32>
    %3 = vector.extract_strided_slice %2 {offsets = [0, 0], sizes = [4, 1], strides = [1, 1]} : vector<4x4xf32> to vector<4x1xf32>
    %4 = vector.extract_strided_slice %1 {offsets = [0, 0], sizes = [1, 256], strides = [1, 1]} : vector<4x256xf32> to vector<1x256xf32>
    %5 = vector.broadcast %3 : vector<4x1xf32> to vector<4x256xf32>
    %6 = vector.broadcast %4 : vector<1x256xf32> to vector<4x256xf32>
    %7 = arith.mulf %5, %6 : vector<4x256xf32>
    %8 = vector.extract_strided_slice %2 {offsets = [0, 1], sizes = [4, 1], strides = [1, 1]} : vector<4x4xf32> to vector<4x1xf32>
    %9 = vector.extract_strided_slice %1 {offsets = [1, 0], sizes = [1, 256], strides = [1, 1]} : vector<4x256xf32> to vector<1x256xf32>
    %10 = vector.broadcast %8 : vector<4x1xf32> to vector<4x256xf32>
    %11 = vector.broadcast %9 : vector<1x256xf32> to vector<4x256xf32>
    %12 = arith.mulf %10, %11 : vector<4x256xf32>
    %13 = arith.addf %7, %12 : vector<4x256xf32>
    %14 = vector.extract_strided_slice %2 {offsets = [0, 2], sizes = [4, 1], strides = [1, 1]} : vector<4x4xf32> to vector<4x1xf32>
    %15 = vector.extract_strided_slice %1 {offsets = [2, 0], sizes = [1, 256], strides = [1, 1]} : vector<4x256xf32> to vector<1x256xf32>
    %16 = vector.broadcast %14 : vector<4x1xf32> to vector<4x256xf32>
    %17 = vector.broadcast %15 : vector<1x256xf32> to vector<4x256xf32>
    %18 = arith.mulf %16, %17 : vector<4x256xf32>
    %19 = arith.addf %13, %18 : vector<4x256xf32>
    %20 = vector.extract_strided_slice %2 {offsets = [0, 3], sizes = [4, 1], strides = [1, 1]} : vector<4x4xf32> to vector<4x1xf32>
    %21 = vector.extract_strided_slice %1 {offsets = [3, 0], sizes = [1, 256], strides = [1, 1]} : vector<4x256xf32> to vector<1x256xf32>
    %22 = vector.broadcast %20 : vector<4x1xf32> to vector<4x256xf32>
    %23 = vector.broadcast %21 : vector<1x256xf32> to vector<4x256xf32>
    %24 = arith.mulf %22, %23 : vector<4x256xf32>
    %25 = arith.addf %19, %24 : vector<4x256xf32>
    %c0_4 = arith.constant 0 : index
    %c0_5 = arith.constant 0 : index
    %26 = vector.load %arg4[%c0_4, %c0_5] : memref<4x1xf32, #tpu.memory_space<vmem>>, vector<4x1xf32>
    %27 = vector.broadcast %26 : vector<4x1xf32> to vector<4x256xf32>
    %28 = arith.addf %25, %27 : vector<4x256xf32>
    %c0_6 = arith.constant 0 : index
    %c0_7 = arith.constant 0 : index
    %c0_8 = arith.constant 0 : index
    %29 = vector.load %arg5[%c0_6, %c0_7, %c0_8] : memref<1x4x256xf32, #tpu.memory_space<vmem>>, vector<1x4x256xf32>
    %30 = vector.shape_cast %29 : vector<1x4x256xf32> to vector<4x256xf32>
    %31 = arith.addf %28, %30 : vector<4x256xf32>
    %c0_9 = arith.constant 0 : index
    %c0_10 = arith.constant 0 : index
    %c0_11 = arith.constant 0 : index
    %32 = vector.load %arg6[%c0_9, %c0_10, %c0_11] : memref<1x4x256xf32, #tpu.memory_space<vmem>>, vector<1x4x256xf32>
    %33 = vector.shape_cast %32 : vector<1x4x256xf32> to vector<4x256xf32>
    %34 = vector.shape_cast %31 : vector<4x256xf32> to vector<1x4x256xf32>
    tpu.vector_store %arg6[%c0_9, %c0_10, %c0_11], %34 {strides = array<i32>} : memref<1x4x256xf32, #tpu.memory_space<vmem>>, vector<1x4x256xf32>,
    return
  }
  func.func @transform_0(%arg0: i32, %arg1: i32) -> (i32, i32, i32) {
    %c0_i32 = arith.constant 0 : i32
    %c0_i32_0 = arith.constant 0 : i32
    return %arg0, %c0_i32, %arg1 : i32, i32, i32
  }
  func.func @transform_1(%arg0: i32, %arg1: i32) -> (i32, i32) {
    %c0_i32 = arith.constant 0 : i32
    %c0_i32_0 = arith.constant 0 : i32
    %c0_i32_1 = arith.constant 0 : i32
    return %c0_i32, %c0_i32_0 : i32, i32
  }
  func.func @transform_2(%arg0: i32, %arg1: i32) -> (i32, i32) {
    %c0_i32 = arith.constant 0 : i32
    %c0_i32_0 = arith.constant 0 : i32
    %c0_i32_1 = arith.constant 0 : i32
    return %c0_i32, %c0_i32_0 : i32, i32
  }
  func.func @transform_3(%arg0: i32, %arg1: i32) -> (i32, i32, i32) {
    %c0_i32 = arith.constant 0 : i32
    %c0_i32_0 = arith.constant 0 : i32
    return %arg0, %c0_i32, %arg1 : i32, i32, i32
  }
  func.func @transform_4(%arg0: i32, %arg1: i32) -> (i32, i32, i32) {
    %c0_i32 = arith.constant 0 : i32
    %c0_i32_0 = arith.constant 0 : i32
    return %arg0, %c0_i32, %arg1 : i32, i32, i32
  }
}

module attributes {stable_mosaic.version = 11 : i64} {
  func.func @_specmix_kernel(%arg0: i32, %arg1: memref<2x8x128xf32, #tpu.memory_space<vmem>>, %arg2: memref<2x8x128xf32, #tpu.memory_space<vmem>>, %arg3: memref<8x8x128xf32, #tpu.memory_space<vmem>>, %arg4: memref<8x8x128xf32, #tpu.memory_space<vmem>>, %arg5: memref<2x8x128xf32, #tpu.memory_space<vmem>>, %arg6: memref<2x8x128xf32, #tpu.memory_space<vmem>>) attributes {dimension_semantics = [#tpu.dimension_semantics<parallel>], iteration_bounds = array<i64: 1>, scalar_prefetch = 0 : i64, scratch_operands = 0 : i64, tpu.core_type = #tpu.core_type<tc>, window_params = [{transform_indices = @transform_0, window_bounds = array<i64: 2, 8, 128>}, {transform_indices = @transform_1, window_bounds = array<i64: 2, 8, 128>}, {transform_indices = @transform_2, window_bounds = array<i64: 8, 8, 128>}, {transform_indices = @transform_3, window_bounds = array<i64: 8, 8, 128>}, {transform_indices = @transform_4, window_bounds = array<i64: 2, 8, 128>}, {transform_indices = @transform_5, window_bounds = array<i64: 2, 8, 128>}]} {
    %c0 = arith.constant 0 : index
    %c0_0 = arith.constant 0 : index
    %c0_1 = arith.constant 0 : index
    %0 = vector.load %arg1[%c0, %c0_0, %c0_1] : memref<2x8x128xf32, #tpu.memory_space<vmem>>, vector<2x8x128xf32>
    %c0_2 = arith.constant 0 : index
    %c0_3 = arith.constant 0 : index
    %c0_4 = arith.constant 0 : index
    %1 = vector.load %arg2[%c0_2, %c0_3, %c0_4] : memref<2x8x128xf32, #tpu.memory_space<vmem>>, vector<2x8x128xf32>
    %c0_5 = arith.constant 0 : index
    %c0_6 = arith.constant 0 : index
    %c0_7 = arith.constant 0 : index
    %2 = vector.load %arg3[%c0_5, %c0_6, %c0_7] : memref<8x8x128xf32, #tpu.memory_space<vmem>>, vector<8x8x128xf32>
    %c0_8 = arith.constant 0 : index
    %c0_9 = arith.constant 0 : index
    %c0_10 = arith.constant 0 : index
    %3 = vector.load %arg4[%c0_8, %c0_9, %c0_10] : memref<8x8x128xf32, #tpu.memory_space<vmem>>, vector<8x8x128xf32>
    %4 = vector.extract_strided_slice %0 {offsets = [0, 0, 0], sizes = [2, 1, 128], strides = [1, 1, 1]} : vector<2x8x128xf32> to vector<2x1x128xf32>
    %5 = vector.extract_strided_slice %1 {offsets = [0, 0, 0], sizes = [2, 1, 128], strides = [1, 1, 1]} : vector<2x8x128xf32> to vector<2x1x128xf32>
    %6 = vector.extract_strided_slice %2 {offsets = [0, 0, 0], sizes = [1, 8, 128], strides = [1, 1, 1]} : vector<8x8x128xf32> to vector<1x8x128xf32>
    %7 = vector.shape_cast %6 : vector<1x8x128xf32> to vector<8x128xf32>
    %8 = vector.shape_cast %7 : vector<8x128xf32> to vector<1x8x128xf32>
    %9 = vector.extract_strided_slice %3 {offsets = [0, 0, 0], sizes = [1, 8, 128], strides = [1, 1, 1]} : vector<8x8x128xf32> to vector<1x8x128xf32>
    %10 = vector.shape_cast %9 : vector<1x8x128xf32> to vector<8x128xf32>
    %11 = vector.shape_cast %10 : vector<8x128xf32> to vector<1x8x128xf32>
    %12 = vector.broadcast %4 : vector<2x1x128xf32> to vector<2x8x128xf32>
    %13 = vector.broadcast %8 : vector<1x8x128xf32> to vector<2x8x128xf32>
    %14 = arith.mulf %12, %13 : vector<2x8x128xf32>
    %15 = vector.broadcast %5 : vector<2x1x128xf32> to vector<2x8x128xf32>
    %16 = vector.broadcast %11 : vector<1x8x128xf32> to vector<2x8x128xf32>
    %17 = arith.mulf %15, %16 : vector<2x8x128xf32>
    %18 = arith.subf %14, %17 : vector<2x8x128xf32>
    %19 = vector.broadcast %4 : vector<2x1x128xf32> to vector<2x8x128xf32>
    %20 = vector.broadcast %11 : vector<1x8x128xf32> to vector<2x8x128xf32>
    %21 = arith.mulf %19, %20 : vector<2x8x128xf32>
    %22 = vector.broadcast %5 : vector<2x1x128xf32> to vector<2x8x128xf32>
    %23 = vector.broadcast %8 : vector<1x8x128xf32> to vector<2x8x128xf32>
    %24 = arith.mulf %22, %23 : vector<2x8x128xf32>
    %25 = arith.addf %21, %24 : vector<2x8x128xf32>
    %26 = vector.extract_strided_slice %0 {offsets = [0, 1, 0], sizes = [2, 1, 128], strides = [1, 1, 1]} : vector<2x8x128xf32> to vector<2x1x128xf32>
    %27 = vector.extract_strided_slice %1 {offsets = [0, 1, 0], sizes = [2, 1, 128], strides = [1, 1, 1]} : vector<2x8x128xf32> to vector<2x1x128xf32>
    %28 = vector.extract_strided_slice %2 {offsets = [1, 0, 0], sizes = [1, 8, 128], strides = [1, 1, 1]} : vector<8x8x128xf32> to vector<1x8x128xf32>
    %29 = vector.shape_cast %28 : vector<1x8x128xf32> to vector<8x128xf32>
    %30 = vector.shape_cast %29 : vector<8x128xf32> to vector<1x8x128xf32>
    %31 = vector.extract_strided_slice %3 {offsets = [1, 0, 0], sizes = [1, 8, 128], strides = [1, 1, 1]} : vector<8x8x128xf32> to vector<1x8x128xf32>
    %32 = vector.shape_cast %31 : vector<1x8x128xf32> to vector<8x128xf32>
    %33 = vector.shape_cast %32 : vector<8x128xf32> to vector<1x8x128xf32>
    %34 = vector.broadcast %26 : vector<2x1x128xf32> to vector<2x8x128xf32>
    %35 = vector.broadcast %30 : vector<1x8x128xf32> to vector<2x8x128xf32>
    %36 = arith.mulf %34, %35 : vector<2x8x128xf32>
    %37 = vector.broadcast %27 : vector<2x1x128xf32> to vector<2x8x128xf32>
    %38 = vector.broadcast %33 : vector<1x8x128xf32> to vector<2x8x128xf32>
    %39 = arith.mulf %37, %38 : vector<2x8x128xf32>
    %40 = arith.subf %36, %39 : vector<2x8x128xf32>
    %41 = vector.broadcast %26 : vector<2x1x128xf32> to vector<2x8x128xf32>
    %42 = vector.broadcast %33 : vector<1x8x128xf32> to vector<2x8x128xf32>
    %43 = arith.mulf %41, %42 : vector<2x8x128xf32>
    %44 = vector.broadcast %27 : vector<2x1x128xf32> to vector<2x8x128xf32>
    %45 = vector.broadcast %30 : vector<1x8x128xf32> to vector<2x8x128xf32>
    %46 = arith.mulf %44, %45 : vector<2x8x128xf32>
    %47 = arith.addf %43, %46 : vector<2x8x128xf32>
    %48 = arith.addf %18, %40 : vector<2x8x128xf32>
    %49 = arith.addf %25, %47 : vector<2x8x128xf32>
    %50 = vector.extract_strided_slice %0 {offsets = [0, 2, 0], sizes = [2, 1, 128], strides = [1, 1, 1]} : vector<2x8x128xf32> to vector<2x1x128xf32>
    %51 = vector.extract_strided_slice %1 {offsets = [0, 2, 0], sizes = [2, 1, 128], strides = [1, 1, 1]} : vector<2x8x128xf32> to vector<2x1x128xf32>
    %52 = vector.extract_strided_slice %2 {offsets = [2, 0, 0], sizes = [1, 8, 128], strides = [1, 1, 1]} : vector<8x8x128xf32> to vector<1x8x128xf32>
    %53 = vector.shape_cast %52 : vector<1x8x128xf32> to vector<8x128xf32>
    %54 = vector.shape_cast %53 : vector<8x128xf32> to vector<1x8x128xf32>
    %55 = vector.extract_strided_slice %3 {offsets = [2, 0, 0], sizes = [1, 8, 128], strides = [1, 1, 1]} : vector<8x8x128xf32> to vector<1x8x128xf32>
    %56 = vector.shape_cast %55 : vector<1x8x128xf32> to vector<8x128xf32>
    %57 = vector.shape_cast %56 : vector<8x128xf32> to vector<1x8x128xf32>
    %58 = vector.broadcast %50 : vector<2x1x128xf32> to vector<2x8x128xf32>
    %59 = vector.broadcast %54 : vector<1x8x128xf32> to vector<2x8x128xf32>
    %60 = arith.mulf %58, %59 : vector<2x8x128xf32>
    %61 = vector.broadcast %51 : vector<2x1x128xf32> to vector<2x8x128xf32>
    %62 = vector.broadcast %57 : vector<1x8x128xf32> to vector<2x8x128xf32>
    %63 = arith.mulf %61, %62 : vector<2x8x128xf32>
    %64 = arith.subf %60, %63 : vector<2x8x128xf32>
    %65 = vector.broadcast %50 : vector<2x1x128xf32> to vector<2x8x128xf32>
    %66 = vector.broadcast %57 : vector<1x8x128xf32> to vector<2x8x128xf32>
    %67 = arith.mulf %65, %66 : vector<2x8x128xf32>
    %68 = vector.broadcast %51 : vector<2x1x128xf32> to vector<2x8x128xf32>
    %69 = vector.broadcast %54 : vector<1x8x128xf32> to vector<2x8x128xf32>
    %70 = arith.mulf %68, %69 : vector<2x8x128xf32>
    %71 = arith.addf %67, %70 : vector<2x8x128xf32>
    %72 = arith.addf %48, %64 : vector<2x8x128xf32>
    %73 = arith.addf %49, %71 : vector<2x8x128xf32>
    %74 = vector.extract_strided_slice %0 {offsets = [0, 3, 0], sizes = [2, 1, 128], strides = [1, 1, 1]} : vector<2x8x128xf32> to vector<2x1x128xf32>
    %75 = vector.extract_strided_slice %1 {offsets = [0, 3, 0], sizes = [2, 1, 128], strides = [1, 1, 1]} : vector<2x8x128xf32> to vector<2x1x128xf32>
    %76 = vector.extract_strided_slice %2 {offsets = [3, 0, 0], sizes = [1, 8, 128], strides = [1, 1, 1]} : vector<8x8x128xf32> to vector<1x8x128xf32>
    %77 = vector.shape_cast %76 : vector<1x8x128xf32> to vector<8x128xf32>
    %78 = vector.shape_cast %77 : vector<8x128xf32> to vector<1x8x128xf32>
    %79 = vector.extract_strided_slice %3 {offsets = [3, 0, 0], sizes = [1, 8, 128], strides = [1, 1, 1]} : vector<8x8x128xf32> to vector<1x8x128xf32>
    %80 = vector.shape_cast %79 : vector<1x8x128xf32> to vector<8x128xf32>
    %81 = vector.shape_cast %80 : vector<8x128xf32> to vector<1x8x128xf32>
    %82 = vector.broadcast %74 : vector<2x1x128xf32> to vector<2x8x128xf32>
    %83 = vector.broadcast %78 : vector<1x8x128xf32> to vector<2x8x128xf32>
    %84 = arith.mulf %82, %83 : vector<2x8x128xf32>
    %85 = vector.broadcast %75 : vector<2x1x128xf32> to vector<2x8x128xf32>
    %86 = vector.broadcast %81 : vector<1x8x128xf32> to vector<2x8x128xf32>
    %87 = arith.mulf %85, %86 : vector<2x8x128xf32>
    %88 = arith.subf %84, %87 : vector<2x8x128xf32>
    %89 = vector.broadcast %74 : vector<2x1x128xf32> to vector<2x8x128xf32>
    %90 = vector.broadcast %81 : vector<1x8x128xf32> to vector<2x8x128xf32>
    %91 = arith.mulf %89, %90 : vector<2x8x128xf32>
    %92 = vector.broadcast %75 : vector<2x1x128xf32> to vector<2x8x128xf32>
    %93 = vector.broadcast %78 : vector<1x8x128xf32> to vector<2x8x128xf32>
    %94 = arith.mulf %92, %93 : vector<2x8x128xf32>
    %95 = arith.addf %91, %94 : vector<2x8x128xf32>
    %96 = arith.addf %72, %88 : vector<2x8x128xf32>
    %97 = arith.addf %73, %95 : vector<2x8x128xf32>
    %98 = vector.extract_strided_slice %0 {offsets = [0, 4, 0], sizes = [2, 1, 128], strides = [1, 1, 1]} : vector<2x8x128xf32> to vector<2x1x128xf32>
    %99 = vector.extract_strided_slice %1 {offsets = [0, 4, 0], sizes = [2, 1, 128], strides = [1, 1, 1]} : vector<2x8x128xf32> to vector<2x1x128xf32>
    %100 = vector.extract_strided_slice %2 {offsets = [4, 0, 0], sizes = [1, 8, 128], strides = [1, 1, 1]} : vector<8x8x128xf32> to vector<1x8x128xf32>
    %101 = vector.shape_cast %100 : vector<1x8x128xf32> to vector<8x128xf32>
    %102 = vector.shape_cast %101 : vector<8x128xf32> to vector<1x8x128xf32>
    %103 = vector.extract_strided_slice %3 {offsets = [4, 0, 0], sizes = [1, 8, 128], strides = [1, 1, 1]} : vector<8x8x128xf32> to vector<1x8x128xf32>
    %104 = vector.shape_cast %103 : vector<1x8x128xf32> to vector<8x128xf32>
    %105 = vector.shape_cast %104 : vector<8x128xf32> to vector<1x8x128xf32>
    %106 = vector.broadcast %98 : vector<2x1x128xf32> to vector<2x8x128xf32>
    %107 = vector.broadcast %102 : vector<1x8x128xf32> to vector<2x8x128xf32>
    %108 = arith.mulf %106, %107 : vector<2x8x128xf32>
    %109 = vector.broadcast %99 : vector<2x1x128xf32> to vector<2x8x128xf32>
    %110 = vector.broadcast %105 : vector<1x8x128xf32> to vector<2x8x128xf32>
    %111 = arith.mulf %109, %110 : vector<2x8x128xf32>
    %112 = arith.subf %108, %111 : vector<2x8x128xf32>
    %113 = vector.broadcast %98 : vector<2x1x128xf32> to vector<2x8x128xf32>
    %114 = vector.broadcast %105 : vector<1x8x128xf32> to vector<2x8x128xf32>
    %115 = arith.mulf %113, %114 : vector<2x8x128xf32>
    %116 = vector.broadcast %99 : vector<2x1x128xf32> to vector<2x8x128xf32>
    %117 = vector.broadcast %102 : vector<1x8x128xf32> to vector<2x8x128xf32>
    %118 = arith.mulf %116, %117 : vector<2x8x128xf32>
    %119 = arith.addf %115, %118 : vector<2x8x128xf32>
    %120 = arith.addf %96, %112 : vector<2x8x128xf32>
    %121 = arith.addf %97, %119 : vector<2x8x128xf32>
    %122 = vector.extract_strided_slice %0 {offsets = [0, 5, 0], sizes = [2, 1, 128], strides = [1, 1, 1]} : vector<2x8x128xf32> to vector<2x1x128xf32>
    %123 = vector.extract_strided_slice %1 {offsets = [0, 5, 0], sizes = [2, 1, 128], strides = [1, 1, 1]} : vector<2x8x128xf32> to vector<2x1x128xf32>
    %124 = vector.extract_strided_slice %2 {offsets = [5, 0, 0], sizes = [1, 8, 128], strides = [1, 1, 1]} : vector<8x8x128xf32> to vector<1x8x128xf32>
    %125 = vector.shape_cast %124 : vector<1x8x128xf32> to vector<8x128xf32>
    %126 = vector.shape_cast %125 : vector<8x128xf32> to vector<1x8x128xf32>
    %127 = vector.extract_strided_slice %3 {offsets = [5, 0, 0], sizes = [1, 8, 128], strides = [1, 1, 1]} : vector<8x8x128xf32> to vector<1x8x128xf32>
    %128 = vector.shape_cast %127 : vector<1x8x128xf32> to vector<8x128xf32>
    %129 = vector.shape_cast %128 : vector<8x128xf32> to vector<1x8x128xf32>
    %130 = vector.broadcast %122 : vector<2x1x128xf32> to vector<2x8x128xf32>
    %131 = vector.broadcast %126 : vector<1x8x128xf32> to vector<2x8x128xf32>
    %132 = arith.mulf %130, %131 : vector<2x8x128xf32>
    %133 = vector.broadcast %123 : vector<2x1x128xf32> to vector<2x8x128xf32>
    %134 = vector.broadcast %129 : vector<1x8x128xf32> to vector<2x8x128xf32>
    %135 = arith.mulf %133, %134 : vector<2x8x128xf32>
    %136 = arith.subf %132, %135 : vector<2x8x128xf32>
    %137 = vector.broadcast %122 : vector<2x1x128xf32> to vector<2x8x128xf32>
    %138 = vector.broadcast %129 : vector<1x8x128xf32> to vector<2x8x128xf32>
    %139 = arith.mulf %137, %138 : vector<2x8x128xf32>
    %140 = vector.broadcast %123 : vector<2x1x128xf32> to vector<2x8x128xf32>
    %141 = vector.broadcast %126 : vector<1x8x128xf32> to vector<2x8x128xf32>
    %142 = arith.mulf %140, %141 : vector<2x8x128xf32>
    %143 = arith.addf %139, %142 : vector<2x8x128xf32>
    %144 = arith.addf %120, %136 : vector<2x8x128xf32>
    %145 = arith.addf %121, %143 : vector<2x8x128xf32>
    %146 = vector.extract_strided_slice %0 {offsets = [0, 6, 0], sizes = [2, 1, 128], strides = [1, 1, 1]} : vector<2x8x128xf32> to vector<2x1x128xf32>
    %147 = vector.extract_strided_slice %1 {offsets = [0, 6, 0], sizes = [2, 1, 128], strides = [1, 1, 1]} : vector<2x8x128xf32> to vector<2x1x128xf32>
    %148 = vector.extract_strided_slice %2 {offsets = [6, 0, 0], sizes = [1, 8, 128], strides = [1, 1, 1]} : vector<8x8x128xf32> to vector<1x8x128xf32>
    %149 = vector.shape_cast %148 : vector<1x8x128xf32> to vector<8x128xf32>
    %150 = vector.shape_cast %149 : vector<8x128xf32> to vector<1x8x128xf32>
    %151 = vector.extract_strided_slice %3 {offsets = [6, 0, 0], sizes = [1, 8, 128], strides = [1, 1, 1]} : vector<8x8x128xf32> to vector<1x8x128xf32>
    %152 = vector.shape_cast %151 : vector<1x8x128xf32> to vector<8x128xf32>
    %153 = vector.shape_cast %152 : vector<8x128xf32> to vector<1x8x128xf32>
    %154 = vector.broadcast %146 : vector<2x1x128xf32> to vector<2x8x128xf32>
    %155 = vector.broadcast %150 : vector<1x8x128xf32> to vector<2x8x128xf32>
    %156 = arith.mulf %154, %155 : vector<2x8x128xf32>
    %157 = vector.broadcast %147 : vector<2x1x128xf32> to vector<2x8x128xf32>
    %158 = vector.broadcast %153 : vector<1x8x128xf32> to vector<2x8x128xf32>
    %159 = arith.mulf %157, %158 : vector<2x8x128xf32>
    %160 = arith.subf %156, %159 : vector<2x8x128xf32>
    %161 = vector.broadcast %146 : vector<2x1x128xf32> to vector<2x8x128xf32>
    %162 = vector.broadcast %153 : vector<1x8x128xf32> to vector<2x8x128xf32>
    %163 = arith.mulf %161, %162 : vector<2x8x128xf32>
    %164 = vector.broadcast %147 : vector<2x1x128xf32> to vector<2x8x128xf32>
    %165 = vector.broadcast %150 : vector<1x8x128xf32> to vector<2x8x128xf32>
    %166 = arith.mulf %164, %165 : vector<2x8x128xf32>
    %167 = arith.addf %163, %166 : vector<2x8x128xf32>
    %168 = arith.addf %144, %160 : vector<2x8x128xf32>
    %169 = arith.addf %145, %167 : vector<2x8x128xf32>
    %170 = vector.extract_strided_slice %0 {offsets = [0, 7, 0], sizes = [2, 1, 128], strides = [1, 1, 1]} : vector<2x8x128xf32> to vector<2x1x128xf32>
    %171 = vector.extract_strided_slice %1 {offsets = [0, 7, 0], sizes = [2, 1, 128], strides = [1, 1, 1]} : vector<2x8x128xf32> to vector<2x1x128xf32>
    %172 = vector.extract_strided_slice %2 {offsets = [7, 0, 0], sizes = [1, 8, 128], strides = [1, 1, 1]} : vector<8x8x128xf32> to vector<1x8x128xf32>
    %173 = vector.shape_cast %172 : vector<1x8x128xf32> to vector<8x128xf32>
    %174 = vector.shape_cast %173 : vector<8x128xf32> to vector<1x8x128xf32>
    %175 = vector.extract_strided_slice %3 {offsets = [7, 0, 0], sizes = [1, 8, 128], strides = [1, 1, 1]} : vector<8x8x128xf32> to vector<1x8x128xf32>
    %176 = vector.shape_cast %175 : vector<1x8x128xf32> to vector<8x128xf32>
    %177 = vector.shape_cast %176 : vector<8x128xf32> to vector<1x8x128xf32>
    %178 = vector.broadcast %170 : vector<2x1x128xf32> to vector<2x8x128xf32>
    %179 = vector.broadcast %174 : vector<1x8x128xf32> to vector<2x8x128xf32>
    %180 = arith.mulf %178, %179 : vector<2x8x128xf32>
    %181 = vector.broadcast %171 : vector<2x1x128xf32> to vector<2x8x128xf32>
    %182 = vector.broadcast %177 : vector<1x8x128xf32> to vector<2x8x128xf32>
    %183 = arith.mulf %181, %182 : vector<2x8x128xf32>
    %184 = arith.subf %180, %183 : vector<2x8x128xf32>
    %185 = vector.broadcast %170 : vector<2x1x128xf32> to vector<2x8x128xf32>
    %186 = vector.broadcast %177 : vector<1x8x128xf32> to vector<2x8x128xf32>
    %187 = arith.mulf %185, %186 : vector<2x8x128xf32>
    %188 = vector.broadcast %171 : vector<2x1x128xf32> to vector<2x8x128xf32>
    %189 = vector.broadcast %174 : vector<1x8x128xf32> to vector<2x8x128xf32>
    %190 = arith.mulf %188, %189 : vector<2x8x128xf32>
    %191 = arith.addf %187, %190 : vector<2x8x128xf32>
    %192 = arith.addf %168, %184 : vector<2x8x128xf32>
    %193 = arith.addf %169, %191 : vector<2x8x128xf32>
    %c0_11 = arith.constant 0 : index
    %c0_12 = arith.constant 0 : index
    %c0_13 = arith.constant 0 : index
    %194 = vector.load %arg5[%c0_11, %c0_12, %c0_13] : memref<2x8x128xf32, #tpu.memory_space<vmem>>, vector<2x8x128xf32>
    tpu.vector_store %arg5[%c0_11, %c0_12, %c0_13], %192 {strides = array<i32>} : memref<2x8x128xf32, #tpu.memory_space<vmem>>, vector<2x8x128xf32>,
    %c0_14 = arith.constant 0 : index
    %c0_15 = arith.constant 0 : index
    %c0_16 = arith.constant 0 : index
    %195 = vector.load %arg6[%c0_14, %c0_15, %c0_16] : memref<2x8x128xf32, #tpu.memory_space<vmem>>, vector<2x8x128xf32>
    tpu.vector_store %arg6[%c0_14, %c0_15, %c0_16], %193 {strides = array<i32>} : memref<2x8x128xf32, #tpu.memory_space<vmem>>, vector<2x8x128xf32>,
    return
  }
  func.func @transform_0(%arg0: i32) -> (i32, i32, i32) {
    %c0_i32 = arith.constant 0 : i32
    %c0_i32_0 = arith.constant 0 : i32
    %c0_i32_1 = arith.constant 0 : i32
    return %c0_i32, %c0_i32_0, %arg0 : i32, i32, i32
  }
  func.func @transform_1(%arg0: i32) -> (i32, i32, i32) {
    %c0_i32 = arith.constant 0 : i32
    %c0_i32_0 = arith.constant 0 : i32
    %c0_i32_1 = arith.constant 0 : i32
    return %c0_i32, %c0_i32_0, %arg0 : i32, i32, i32
  }
  func.func @transform_2(%arg0: i32) -> (i32, i32, i32) {
    %c0_i32 = arith.constant 0 : i32
    %c0_i32_0 = arith.constant 0 : i32
    %c0_i32_1 = arith.constant 0 : i32
    return %c0_i32, %c0_i32_0, %arg0 : i32, i32, i32
  }
  func.func @transform_3(%arg0: i32) -> (i32, i32, i32) {
    %c0_i32 = arith.constant 0 : i32
    %c0_i32_0 = arith.constant 0 : i32
    %c0_i32_1 = arith.constant 0 : i32
    return %c0_i32, %c0_i32_0, %arg0 : i32, i32, i32
  }
  func.func @transform_4(%arg0: i32) -> (i32, i32, i32) {
    %c0_i32 = arith.constant 0 : i32
    %c0_i32_0 = arith.constant 0 : i32
    %c0_i32_1 = arith.constant 0 : i32
    return %c0_i32, %c0_i32_0, %arg0 : i32, i32, i32
  }
  func.func @transform_5(%arg0: i32) -> (i32, i32, i32) {
    %c0_i32 = arith.constant 0 : i32
    %c0_i32_0 = arith.constant 0 : i32
    %c0_i32_1 = arith.constant 0 : i32
    return %c0_i32, %c0_i32_0, %arg0 : i32, i32, i32
  }
}

module attributes {stable_mosaic.version = 11 : i64} {
  func.func @_pw_skip_kernel(%arg0: i32, %arg1: i32, %arg2: memref<1x8x256xf32, #tpu.memory_space<vmem>>, %arg3: memref<8x8xf32, #tpu.memory_space<vmem>>, %arg4: memref<8x1xf32, #tpu.memory_space<vmem>>, %arg5: memref<1x8x256xf32, #tpu.memory_space<vmem>>, %arg6: memref<1x8x256xf32, #tpu.memory_space<vmem>>) attributes {dimension_semantics = [#tpu.dimension_semantics<parallel>, #tpu.dimension_semantics<parallel>], iteration_bounds = array<i64: 2, 1>, scalar_prefetch = 0 : i64, scratch_operands = 0 : i64, tpu.core_type = #tpu.core_type<tc>, window_params = [{transform_indices = @transform_0, window_bounds = array<i64: 1, 8, 256>}, {pipeline_mode = #tpu.pipeline_mode<synchronous>, transform_indices = @transform_1, window_bounds = array<i64: 8, 8>}, {pipeline_mode = #tpu.pipeline_mode<synchronous>, transform_indices = @transform_2, window_bounds = array<i64: 8, 1>}, {transform_indices = @transform_3, window_bounds = array<i64: 1, 8, 256>}, {transform_indices = @transform_4, window_bounds = array<i64: 1, 8, 256>}]} {
    %c0 = arith.constant 0 : index
    %c0_0 = arith.constant 0 : index
    %c0_1 = arith.constant 0 : index
    %0 = vector.load %arg2[%c0, %c0_0, %c0_1] : memref<1x8x256xf32, #tpu.memory_space<vmem>>, vector<1x8x256xf32>
    %1 = vector.shape_cast %0 : vector<1x8x256xf32> to vector<8x256xf32>
    %c0_2 = arith.constant 0 : index
    %c0_3 = arith.constant 0 : index
    %2 = vector.load %arg3[%c0_2, %c0_3] : memref<8x8xf32, #tpu.memory_space<vmem>>, vector<8x8xf32>
    %3 = vector.extract_strided_slice %2 {offsets = [0, 0], sizes = [8, 1], strides = [1, 1]} : vector<8x8xf32> to vector<8x1xf32>
    %4 = vector.extract_strided_slice %1 {offsets = [0, 0], sizes = [1, 256], strides = [1, 1]} : vector<8x256xf32> to vector<1x256xf32>
    %5 = vector.broadcast %3 : vector<8x1xf32> to vector<8x256xf32>
    %6 = vector.broadcast %4 : vector<1x256xf32> to vector<8x256xf32>
    %7 = arith.mulf %5, %6 : vector<8x256xf32>
    %8 = vector.extract_strided_slice %2 {offsets = [0, 1], sizes = [8, 1], strides = [1, 1]} : vector<8x8xf32> to vector<8x1xf32>
    %9 = vector.extract_strided_slice %1 {offsets = [1, 0], sizes = [1, 256], strides = [1, 1]} : vector<8x256xf32> to vector<1x256xf32>
    %10 = vector.broadcast %8 : vector<8x1xf32> to vector<8x256xf32>
    %11 = vector.broadcast %9 : vector<1x256xf32> to vector<8x256xf32>
    %12 = arith.mulf %10, %11 : vector<8x256xf32>
    %13 = arith.addf %7, %12 : vector<8x256xf32>
    %14 = vector.extract_strided_slice %2 {offsets = [0, 2], sizes = [8, 1], strides = [1, 1]} : vector<8x8xf32> to vector<8x1xf32>
    %15 = vector.extract_strided_slice %1 {offsets = [2, 0], sizes = [1, 256], strides = [1, 1]} : vector<8x256xf32> to vector<1x256xf32>
    %16 = vector.broadcast %14 : vector<8x1xf32> to vector<8x256xf32>
    %17 = vector.broadcast %15 : vector<1x256xf32> to vector<8x256xf32>
    %18 = arith.mulf %16, %17 : vector<8x256xf32>
    %19 = arith.addf %13, %18 : vector<8x256xf32>
    %20 = vector.extract_strided_slice %2 {offsets = [0, 3], sizes = [8, 1], strides = [1, 1]} : vector<8x8xf32> to vector<8x1xf32>
    %21 = vector.extract_strided_slice %1 {offsets = [3, 0], sizes = [1, 256], strides = [1, 1]} : vector<8x256xf32> to vector<1x256xf32>
    %22 = vector.broadcast %20 : vector<8x1xf32> to vector<8x256xf32>
    %23 = vector.broadcast %21 : vector<1x256xf32> to vector<8x256xf32>
    %24 = arith.mulf %22, %23 : vector<8x256xf32>
    %25 = arith.addf %19, %24 : vector<8x256xf32>
    %26 = vector.extract_strided_slice %2 {offsets = [0, 4], sizes = [8, 1], strides = [1, 1]} : vector<8x8xf32> to vector<8x1xf32>
    %27 = vector.extract_strided_slice %1 {offsets = [4, 0], sizes = [1, 256], strides = [1, 1]} : vector<8x256xf32> to vector<1x256xf32>
    %28 = vector.broadcast %26 : vector<8x1xf32> to vector<8x256xf32>
    %29 = vector.broadcast %27 : vector<1x256xf32> to vector<8x256xf32>
    %30 = arith.mulf %28, %29 : vector<8x256xf32>
    %31 = arith.addf %25, %30 : vector<8x256xf32>
    %32 = vector.extract_strided_slice %2 {offsets = [0, 5], sizes = [8, 1], strides = [1, 1]} : vector<8x8xf32> to vector<8x1xf32>
    %33 = vector.extract_strided_slice %1 {offsets = [5, 0], sizes = [1, 256], strides = [1, 1]} : vector<8x256xf32> to vector<1x256xf32>
    %34 = vector.broadcast %32 : vector<8x1xf32> to vector<8x256xf32>
    %35 = vector.broadcast %33 : vector<1x256xf32> to vector<8x256xf32>
    %36 = arith.mulf %34, %35 : vector<8x256xf32>
    %37 = arith.addf %31, %36 : vector<8x256xf32>
    %38 = vector.extract_strided_slice %2 {offsets = [0, 6], sizes = [8, 1], strides = [1, 1]} : vector<8x8xf32> to vector<8x1xf32>
    %39 = vector.extract_strided_slice %1 {offsets = [6, 0], sizes = [1, 256], strides = [1, 1]} : vector<8x256xf32> to vector<1x256xf32>
    %40 = vector.broadcast %38 : vector<8x1xf32> to vector<8x256xf32>
    %41 = vector.broadcast %39 : vector<1x256xf32> to vector<8x256xf32>
    %42 = arith.mulf %40, %41 : vector<8x256xf32>
    %43 = arith.addf %37, %42 : vector<8x256xf32>
    %44 = vector.extract_strided_slice %2 {offsets = [0, 7], sizes = [8, 1], strides = [1, 1]} : vector<8x8xf32> to vector<8x1xf32>
    %45 = vector.extract_strided_slice %1 {offsets = [7, 0], sizes = [1, 256], strides = [1, 1]} : vector<8x256xf32> to vector<1x256xf32>
    %46 = vector.broadcast %44 : vector<8x1xf32> to vector<8x256xf32>
    %47 = vector.broadcast %45 : vector<1x256xf32> to vector<8x256xf32>
    %48 = arith.mulf %46, %47 : vector<8x256xf32>
    %49 = arith.addf %43, %48 : vector<8x256xf32>
    %c0_4 = arith.constant 0 : index
    %c0_5 = arith.constant 0 : index
    %50 = vector.load %arg4[%c0_4, %c0_5] : memref<8x1xf32, #tpu.memory_space<vmem>>, vector<8x1xf32>
    %51 = vector.broadcast %50 : vector<8x1xf32> to vector<8x256xf32>
    %52 = arith.addf %49, %51 : vector<8x256xf32>
    %c0_6 = arith.constant 0 : index
    %c0_7 = arith.constant 0 : index
    %c0_8 = arith.constant 0 : index
    %53 = vector.load %arg5[%c0_6, %c0_7, %c0_8] : memref<1x8x256xf32, #tpu.memory_space<vmem>>, vector<1x8x256xf32>
    %54 = vector.shape_cast %53 : vector<1x8x256xf32> to vector<8x256xf32>
    %55 = arith.addf %52, %54 : vector<8x256xf32>
    %cst = arith.constant 5.000000e-01 : f32
    %56 = vector.broadcast %cst : f32 to vector<8x256xf32>
    %57 = arith.mulf %56, %55 : vector<8x256xf32>
    %cst_9 = arith.constant 0.707106769 : f32
    %58 = vector.broadcast %cst_9 : f32 to vector<8x256xf32>
    %59 = arith.mulf %55, %58 : vector<8x256xf32>
    %60 = math.erf %59 : vector<8x256xf32>
    %cst_10 = arith.constant 1.000000e+00 : f32
    %61 = vector.broadcast %cst_10 : f32 to vector<8x256xf32>
    %62 = arith.addf %61, %60 : vector<8x256xf32>
    %63 = arith.mulf %57, %62 : vector<8x256xf32>
    %c0_11 = arith.constant 0 : index
    %c0_12 = arith.constant 0 : index
    %c0_13 = arith.constant 0 : index
    %64 = vector.load %arg6[%c0_11, %c0_12, %c0_13] : memref<1x8x256xf32, #tpu.memory_space<vmem>>, vector<1x8x256xf32>
    %65 = vector.shape_cast %64 : vector<1x8x256xf32> to vector<8x256xf32>
    %66 = vector.shape_cast %63 : vector<8x256xf32> to vector<1x8x256xf32>
    tpu.vector_store %arg6[%c0_11, %c0_12, %c0_13], %66 {strides = array<i32>} : memref<1x8x256xf32, #tpu.memory_space<vmem>>, vector<1x8x256xf32>,
    return
  }
  func.func @transform_0(%arg0: i32, %arg1: i32) -> (i32, i32, i32) {
    %c0_i32 = arith.constant 0 : i32
    %c0_i32_0 = arith.constant 0 : i32
    return %arg0, %c0_i32, %arg1 : i32, i32, i32
  }
  func.func @transform_1(%arg0: i32, %arg1: i32) -> (i32, i32) {
    %c0_i32 = arith.constant 0 : i32
    %c0_i32_0 = arith.constant 0 : i32
    %c0_i32_1 = arith.constant 0 : i32
    return %c0_i32, %c0_i32_0 : i32, i32
  }
  func.func @transform_2(%arg0: i32, %arg1: i32) -> (i32, i32) {
    %c0_i32 = arith.constant 0 : i32
    %c0_i32_0 = arith.constant 0 : i32
    %c0_i32_1 = arith.constant 0 : i32
    return %c0_i32, %c0_i32_0 : i32, i32
  }
  func.func @transform_3(%arg0: i32, %arg1: i32) -> (i32, i32, i32) {
    %c0_i32 = arith.constant 0 : i32
    %c0_i32_0 = arith.constant 0 : i32
    return %arg0, %c0_i32, %arg1 : i32, i32, i32
  }
  func.func @transform_4(%arg0: i32, %arg1: i32) -> (i32, i32, i32) {
    %c0_i32 = arith.constant 0 : i32
    %c0_i32_0 = arith.constant 0 : i32
    return %arg0, %c0_i32, %arg1 : i32, i32, i32
  }
}

module attributes {stable_mosaic.version = 11 : i64} {
  func.func @_pw_skip_kernel(%arg0: i32, %arg1: i32, %arg2: memref<1x8x256xf32, #tpu.memory_space<vmem>>, %arg3: memref<8x8xf32, #tpu.memory_space<vmem>>, %arg4: memref<8x1xf32, #tpu.memory_space<vmem>>, %arg5: memref<1x8x256xf32, #tpu.memory_space<vmem>>, %arg6: memref<1x8x256xf32, #tpu.memory_space<vmem>>) attributes {dimension_semantics = [#tpu.dimension_semantics<parallel>, #tpu.dimension_semantics<parallel>], iteration_bounds = array<i64: 2, 1>, scalar_prefetch = 0 : i64, scratch_operands = 0 : i64, tpu.core_type = #tpu.core_type<tc>, window_params = [{transform_indices = @transform_0, window_bounds = array<i64: 1, 8, 256>}, {pipeline_mode = #tpu.pipeline_mode<synchronous>, transform_indices = @transform_1, window_bounds = array<i64: 8, 8>}, {pipeline_mode = #tpu.pipeline_mode<synchronous>, transform_indices = @transform_2, window_bounds = array<i64: 8, 1>}, {transform_indices = @transform_3, window_bounds = array<i64: 1, 8, 256>}, {transform_indices = @transform_4, window_bounds = array<i64: 1, 8, 256>}]} {
    %c0 = arith.constant 0 : index
    %c0_0 = arith.constant 0 : index
    %c0_1 = arith.constant 0 : index
    %0 = vector.load %arg2[%c0, %c0_0, %c0_1] : memref<1x8x256xf32, #tpu.memory_space<vmem>>, vector<1x8x256xf32>
    %1 = vector.shape_cast %0 : vector<1x8x256xf32> to vector<8x256xf32>
    %c0_2 = arith.constant 0 : index
    %c0_3 = arith.constant 0 : index
    %2 = vector.load %arg3[%c0_2, %c0_3] : memref<8x8xf32, #tpu.memory_space<vmem>>, vector<8x8xf32>
    %3 = vector.extract_strided_slice %2 {offsets = [0, 0], sizes = [8, 1], strides = [1, 1]} : vector<8x8xf32> to vector<8x1xf32>
    %4 = vector.extract_strided_slice %1 {offsets = [0, 0], sizes = [1, 256], strides = [1, 1]} : vector<8x256xf32> to vector<1x256xf32>
    %5 = vector.broadcast %3 : vector<8x1xf32> to vector<8x256xf32>
    %6 = vector.broadcast %4 : vector<1x256xf32> to vector<8x256xf32>
    %7 = arith.mulf %5, %6 : vector<8x256xf32>
    %8 = vector.extract_strided_slice %2 {offsets = [0, 1], sizes = [8, 1], strides = [1, 1]} : vector<8x8xf32> to vector<8x1xf32>
    %9 = vector.extract_strided_slice %1 {offsets = [1, 0], sizes = [1, 256], strides = [1, 1]} : vector<8x256xf32> to vector<1x256xf32>
    %10 = vector.broadcast %8 : vector<8x1xf32> to vector<8x256xf32>
    %11 = vector.broadcast %9 : vector<1x256xf32> to vector<8x256xf32>
    %12 = arith.mulf %10, %11 : vector<8x256xf32>
    %13 = arith.addf %7, %12 : vector<8x256xf32>
    %14 = vector.extract_strided_slice %2 {offsets = [0, 2], sizes = [8, 1], strides = [1, 1]} : vector<8x8xf32> to vector<8x1xf32>
    %15 = vector.extract_strided_slice %1 {offsets = [2, 0], sizes = [1, 256], strides = [1, 1]} : vector<8x256xf32> to vector<1x256xf32>
    %16 = vector.broadcast %14 : vector<8x1xf32> to vector<8x256xf32>
    %17 = vector.broadcast %15 : vector<1x256xf32> to vector<8x256xf32>
    %18 = arith.mulf %16, %17 : vector<8x256xf32>
    %19 = arith.addf %13, %18 : vector<8x256xf32>
    %20 = vector.extract_strided_slice %2 {offsets = [0, 3], sizes = [8, 1], strides = [1, 1]} : vector<8x8xf32> to vector<8x1xf32>
    %21 = vector.extract_strided_slice %1 {offsets = [3, 0], sizes = [1, 256], strides = [1, 1]} : vector<8x256xf32> to vector<1x256xf32>
    %22 = vector.broadcast %20 : vector<8x1xf32> to vector<8x256xf32>
    %23 = vector.broadcast %21 : vector<1x256xf32> to vector<8x256xf32>
    %24 = arith.mulf %22, %23 : vector<8x256xf32>
    %25 = arith.addf %19, %24 : vector<8x256xf32>
    %26 = vector.extract_strided_slice %2 {offsets = [0, 4], sizes = [8, 1], strides = [1, 1]} : vector<8x8xf32> to vector<8x1xf32>
    %27 = vector.extract_strided_slice %1 {offsets = [4, 0], sizes = [1, 256], strides = [1, 1]} : vector<8x256xf32> to vector<1x256xf32>
    %28 = vector.broadcast %26 : vector<8x1xf32> to vector<8x256xf32>
    %29 = vector.broadcast %27 : vector<1x256xf32> to vector<8x256xf32>
    %30 = arith.mulf %28, %29 : vector<8x256xf32>
    %31 = arith.addf %25, %30 : vector<8x256xf32>
    %32 = vector.extract_strided_slice %2 {offsets = [0, 5], sizes = [8, 1], strides = [1, 1]} : vector<8x8xf32> to vector<8x1xf32>
    %33 = vector.extract_strided_slice %1 {offsets = [5, 0], sizes = [1, 256], strides = [1, 1]} : vector<8x256xf32> to vector<1x256xf32>
    %34 = vector.broadcast %32 : vector<8x1xf32> to vector<8x256xf32>
    %35 = vector.broadcast %33 : vector<1x256xf32> to vector<8x256xf32>
    %36 = arith.mulf %34, %35 : vector<8x256xf32>
    %37 = arith.addf %31, %36 : vector<8x256xf32>
    %38 = vector.extract_strided_slice %2 {offsets = [0, 6], sizes = [8, 1], strides = [1, 1]} : vector<8x8xf32> to vector<8x1xf32>
    %39 = vector.extract_strided_slice %1 {offsets = [6, 0], sizes = [1, 256], strides = [1, 1]} : vector<8x256xf32> to vector<1x256xf32>
    %40 = vector.broadcast %38 : vector<8x1xf32> to vector<8x256xf32>
    %41 = vector.broadcast %39 : vector<1x256xf32> to vector<8x256xf32>
    %42 = arith.mulf %40, %41 : vector<8x256xf32>
    %43 = arith.addf %37, %42 : vector<8x256xf32>
    %44 = vector.extract_strided_slice %2 {offsets = [0, 7], sizes = [8, 1], strides = [1, 1]} : vector<8x8xf32> to vector<8x1xf32>
    %45 = vector.extract_strided_slice %1 {offsets = [7, 0], sizes = [1, 256], strides = [1, 1]} : vector<8x256xf32> to vector<1x256xf32>
    %46 = vector.broadcast %44 : vector<8x1xf32> to vector<8x256xf32>
    %47 = vector.broadcast %45 : vector<1x256xf32> to vector<8x256xf32>
    %48 = arith.mulf %46, %47 : vector<8x256xf32>
    %49 = arith.addf %43, %48 : vector<8x256xf32>
    %c0_4 = arith.constant 0 : index
    %c0_5 = arith.constant 0 : index
    %50 = vector.load %arg4[%c0_4, %c0_5] : memref<8x1xf32, #tpu.memory_space<vmem>>, vector<8x1xf32>
    %51 = vector.broadcast %50 : vector<8x1xf32> to vector<8x256xf32>
    %52 = arith.addf %49, %51 : vector<8x256xf32>
    %c0_6 = arith.constant 0 : index
    %c0_7 = arith.constant 0 : index
    %c0_8 = arith.constant 0 : index
    %53 = vector.load %arg5[%c0_6, %c0_7, %c0_8] : memref<1x8x256xf32, #tpu.memory_space<vmem>>, vector<1x8x256xf32>
    %54 = vector.shape_cast %53 : vector<1x8x256xf32> to vector<8x256xf32>
    %55 = arith.addf %52, %54 : vector<8x256xf32>
    %c0_9 = arith.constant 0 : index
    %c0_10 = arith.constant 0 : index
    %c0_11 = arith.constant 0 : index
    %56 = vector.load %arg6[%c0_9, %c0_10, %c0_11] : memref<1x8x256xf32, #tpu.memory_space<vmem>>, vector<1x8x256xf32>
    %57 = vector.shape_cast %56 : vector<1x8x256xf32> to vector<8x256xf32>
    %58 = vector.shape_cast %55 : vector<8x256xf32> to vector<1x8x256xf32>
    tpu.vector_store %arg6[%c0_9, %c0_10, %c0_11], %58 {strides = array<i32>} : memref<1x8x256xf32, #tpu.memory_space<vmem>>, vector<1x8x256xf32>,
    return
  }
  func.func @transform_0(%arg0: i32, %arg1: i32) -> (i32, i32, i32) {
    %c0_i32 = arith.constant 0 : i32
    %c0_i32_0 = arith.constant 0 : i32
    return %arg0, %c0_i32, %arg1 : i32, i32, i32
  }
  func.func @transform_1(%arg0: i32, %arg1: i32) -> (i32, i32) {
    %c0_i32 = arith.constant 0 : i32
    %c0_i32_0 = arith.constant 0 : i32
    %c0_i32_1 = arith.constant 0 : i32
    return %c0_i32, %c0_i32_0 : i32, i32
  }
  func.func @transform_2(%arg0: i32, %arg1: i32) -> (i32, i32) {
    %c0_i32 = arith.constant 0 : i32
    %c0_i32_0 = arith.constant 0 : i32
    %c0_i32_1 = arith.constant 0 : i32
    return %c0_i32, %c0_i32_0 : i32, i32
  }
  func.func @transform_3(%arg0: i32, %arg1: i32) -> (i32, i32, i32) {
    %c0_i32 = arith.constant 0 : i32
    %c0_i32_0 = arith.constant 0 : i32
    return %arg0, %c0_i32, %arg1 : i32, i32, i32
  }
  func.func @transform_4(%arg0: i32, %arg1: i32) -> (i32, i32, i32) {
    %c0_i32 = arith.constant 0 : i32
    %c0_i32_0 = arith.constant 0 : i32
    return %arg0, %c0_i32, %arg1 : i32, i32, i32
  }
}

module attributes {stable_mosaic.version = 11 : i64} {
  func.func @_pw_kernel(%arg0: i32, %arg1: i32, %arg2: memref<1x8x256xf32, #tpu.memory_space<vmem>>, %arg3: memref<4x8xf32, #tpu.memory_space<vmem>>, %arg4: memref<4x1xf32, #tpu.memory_space<vmem>>, %arg5: memref<1x4x256xf32, #tpu.memory_space<vmem>>) attributes {dimension_semantics = [#tpu.dimension_semantics<parallel>, #tpu.dimension_semantics<parallel>], iteration_bounds = array<i64: 2, 1>, scalar_prefetch = 0 : i64, scratch_operands = 0 : i64, tpu.core_type = #tpu.core_type<tc>, window_params = [{transform_indices = @transform_0, window_bounds = array<i64: 1, 8, 256>}, {pipeline_mode = #tpu.pipeline_mode<synchronous>, transform_indices = @transform_1, window_bounds = array<i64: 4, 8>}, {pipeline_mode = #tpu.pipeline_mode<synchronous>, transform_indices = @transform_2, window_bounds = array<i64: 4, 1>}, {transform_indices = @transform_3, window_bounds = array<i64: 1, 4, 256>}]} {
    %c0 = arith.constant 0 : index
    %c0_0 = arith.constant 0 : index
    %c0_1 = arith.constant 0 : index
    %0 = vector.load %arg2[%c0, %c0_0, %c0_1] : memref<1x8x256xf32, #tpu.memory_space<vmem>>, vector<1x8x256xf32>
    %1 = vector.shape_cast %0 : vector<1x8x256xf32> to vector<8x256xf32>
    %c0_2 = arith.constant 0 : index
    %c0_3 = arith.constant 0 : index
    %2 = vector.load %arg3[%c0_2, %c0_3] : memref<4x8xf32, #tpu.memory_space<vmem>>, vector<4x8xf32>
    %3 = vector.extract_strided_slice %2 {offsets = [0, 0], sizes = [4, 1], strides = [1, 1]} : vector<4x8xf32> to vector<4x1xf32>
    %4 = vector.extract_strided_slice %1 {offsets = [0, 0], sizes = [1, 256], strides = [1, 1]} : vector<8x256xf32> to vector<1x256xf32>
    %5 = vector.broadcast %3 : vector<4x1xf32> to vector<4x256xf32>
    %6 = vector.broadcast %4 : vector<1x256xf32> to vector<4x256xf32>
    %7 = arith.mulf %5, %6 : vector<4x256xf32>
    %8 = vector.extract_strided_slice %2 {offsets = [0, 1], sizes = [4, 1], strides = [1, 1]} : vector<4x8xf32> to vector<4x1xf32>
    %9 = vector.extract_strided_slice %1 {offsets = [1, 0], sizes = [1, 256], strides = [1, 1]} : vector<8x256xf32> to vector<1x256xf32>
    %10 = vector.broadcast %8 : vector<4x1xf32> to vector<4x256xf32>
    %11 = vector.broadcast %9 : vector<1x256xf32> to vector<4x256xf32>
    %12 = arith.mulf %10, %11 : vector<4x256xf32>
    %13 = arith.addf %7, %12 : vector<4x256xf32>
    %14 = vector.extract_strided_slice %2 {offsets = [0, 2], sizes = [4, 1], strides = [1, 1]} : vector<4x8xf32> to vector<4x1xf32>
    %15 = vector.extract_strided_slice %1 {offsets = [2, 0], sizes = [1, 256], strides = [1, 1]} : vector<8x256xf32> to vector<1x256xf32>
    %16 = vector.broadcast %14 : vector<4x1xf32> to vector<4x256xf32>
    %17 = vector.broadcast %15 : vector<1x256xf32> to vector<4x256xf32>
    %18 = arith.mulf %16, %17 : vector<4x256xf32>
    %19 = arith.addf %13, %18 : vector<4x256xf32>
    %20 = vector.extract_strided_slice %2 {offsets = [0, 3], sizes = [4, 1], strides = [1, 1]} : vector<4x8xf32> to vector<4x1xf32>
    %21 = vector.extract_strided_slice %1 {offsets = [3, 0], sizes = [1, 256], strides = [1, 1]} : vector<8x256xf32> to vector<1x256xf32>
    %22 = vector.broadcast %20 : vector<4x1xf32> to vector<4x256xf32>
    %23 = vector.broadcast %21 : vector<1x256xf32> to vector<4x256xf32>
    %24 = arith.mulf %22, %23 : vector<4x256xf32>
    %25 = arith.addf %19, %24 : vector<4x256xf32>
    %26 = vector.extract_strided_slice %2 {offsets = [0, 4], sizes = [4, 1], strides = [1, 1]} : vector<4x8xf32> to vector<4x1xf32>
    %27 = vector.extract_strided_slice %1 {offsets = [4, 0], sizes = [1, 256], strides = [1, 1]} : vector<8x256xf32> to vector<1x256xf32>
    %28 = vector.broadcast %26 : vector<4x1xf32> to vector<4x256xf32>
    %29 = vector.broadcast %27 : vector<1x256xf32> to vector<4x256xf32>
    %30 = arith.mulf %28, %29 : vector<4x256xf32>
    %31 = arith.addf %25, %30 : vector<4x256xf32>
    %32 = vector.extract_strided_slice %2 {offsets = [0, 5], sizes = [4, 1], strides = [1, 1]} : vector<4x8xf32> to vector<4x1xf32>
    %33 = vector.extract_strided_slice %1 {offsets = [5, 0], sizes = [1, 256], strides = [1, 1]} : vector<8x256xf32> to vector<1x256xf32>
    %34 = vector.broadcast %32 : vector<4x1xf32> to vector<4x256xf32>
    %35 = vector.broadcast %33 : vector<1x256xf32> to vector<4x256xf32>
    %36 = arith.mulf %34, %35 : vector<4x256xf32>
    %37 = arith.addf %31, %36 : vector<4x256xf32>
    %38 = vector.extract_strided_slice %2 {offsets = [0, 6], sizes = [4, 1], strides = [1, 1]} : vector<4x8xf32> to vector<4x1xf32>
    %39 = vector.extract_strided_slice %1 {offsets = [6, 0], sizes = [1, 256], strides = [1, 1]} : vector<8x256xf32> to vector<1x256xf32>
    %40 = vector.broadcast %38 : vector<4x1xf32> to vector<4x256xf32>
    %41 = vector.broadcast %39 : vector<1x256xf32> to vector<4x256xf32>
    %42 = arith.mulf %40, %41 : vector<4x256xf32>
    %43 = arith.addf %37, %42 : vector<4x256xf32>
    %44 = vector.extract_strided_slice %2 {offsets = [0, 7], sizes = [4, 1], strides = [1, 1]} : vector<4x8xf32> to vector<4x1xf32>
    %45 = vector.extract_strided_slice %1 {offsets = [7, 0], sizes = [1, 256], strides = [1, 1]} : vector<8x256xf32> to vector<1x256xf32>
    %46 = vector.broadcast %44 : vector<4x1xf32> to vector<4x256xf32>
    %47 = vector.broadcast %45 : vector<1x256xf32> to vector<4x256xf32>
    %48 = arith.mulf %46, %47 : vector<4x256xf32>
    %49 = arith.addf %43, %48 : vector<4x256xf32>
    %c0_4 = arith.constant 0 : index
    %c0_5 = arith.constant 0 : index
    %50 = vector.load %arg4[%c0_4, %c0_5] : memref<4x1xf32, #tpu.memory_space<vmem>>, vector<4x1xf32>
    %51 = vector.broadcast %50 : vector<4x1xf32> to vector<4x256xf32>
    %52 = arith.addf %49, %51 : vector<4x256xf32>
    %c0_6 = arith.constant 0 : index
    %c0_7 = arith.constant 0 : index
    %c0_8 = arith.constant 0 : index
    %53 = vector.load %arg5[%c0_6, %c0_7, %c0_8] : memref<1x4x256xf32, #tpu.memory_space<vmem>>, vector<1x4x256xf32>
    %54 = vector.shape_cast %53 : vector<1x4x256xf32> to vector<4x256xf32>
    %55 = vector.shape_cast %52 : vector<4x256xf32> to vector<1x4x256xf32>
    tpu.vector_store %arg5[%c0_6, %c0_7, %c0_8], %55 {strides = array<i32>} : memref<1x4x256xf32, #tpu.memory_space<vmem>>, vector<1x4x256xf32>,
    return
  }
  func.func @transform_0(%arg0: i32, %arg1: i32) -> (i32, i32, i32) {
    %c0_i32 = arith.constant 0 : i32
    %c0_i32_0 = arith.constant 0 : i32
    return %arg0, %c0_i32, %arg1 : i32, i32, i32
  }
  func.func @transform_1(%arg0: i32, %arg1: i32) -> (i32, i32) {
    %c0_i32 = arith.constant 0 : i32
    %c0_i32_0 = arith.constant 0 : i32
    %c0_i32_1 = arith.constant 0 : i32
    return %c0_i32, %c0_i32_0 : i32, i32
  }
  func.func @transform_2(%arg0: i32, %arg1: i32) -> (i32, i32) {
    %c0_i32 = arith.constant 0 : i32
    %c0_i32_0 = arith.constant 0 : i32
    %c0_i32_1 = arith.constant 0 : i32
    return %c0_i32, %c0_i32_0 : i32, i32
  }
  func.func @transform_3(%arg0: i32, %arg1: i32) -> (i32, i32, i32) {
    %c0_i32 = arith.constant 0 : i32
    %c0_i32_0 = arith.constant 0 : i32
    return %arg0, %c0_i32, %arg1 : i32, i32, i32
  }
}

</mosaic_0001>

<bundles_post_ra>
// kernel: fnounet_forward.60
= control target key start
LH: loop header
LB: loop body
LE: loop exit
PB: predicated region body
PF: predicated region fallthrough
CT: control target
= control target key end

     0   :  { %s511_s12 = smov 0   ;;  %s513_s13 = smov 0   ;;  %s557_s0 = inlined_call_operand.vmem [shape: f32[2,4,256], index: 0, kind: input, shape index: {}]   ;;  %s558_s1 = inlined_call_operand.vmem [shape: f32[4,4], index: 1, kind: input, shape index: {}]   ;;  %s559_s2 = inlined_call_operand.vmem [shape: f32[4,1], index: 2, kind: input, shape index: {}]   ;;  %s560_s3 = inlined_call_operand.vmem [shape: f32[2,4,256], index: 3, kind: output, shape index: {}]  }
   0x1   :  { %s515_s14 = smov 0  }
   0x2 LB: > { %s25_s15 = sadd.s32 1, %s481_s13  ;;  %p420_p0 = scmp.ge.s32.totalorder %s485_s14, 1  ;;  %s485_s14 = sphi %s515_s14, %s13_s14   ;;  %s481_s13 = sphi %s513_s13, %s562_s13   ;;  %s477_s12 = sphi %s511_s12, %s561_s12  }
   0x3   : > { %p27_p1 = scmp.ge.s32.totalorder %s25_s15, 2  ;;  %p158_p2 = scmp.lt.s32.totalorder %s485_s14, 3 }
   0x5   : > { %s564_s15 = smov (%p27_p1, %s25_s15), 0  ;;  %p159_p3 = pnand %p420_p0, %p158_p2 }
   0x6   : > { %p191_p4 = scmp.lt.s32.totalorder (!%p159_p3), %s477_s12, 1 }
   0x7   : > { %162 = sbr.rel (%p159_p3) target bundleno = 156 (0x9c), region = 32 }
   0xc   : > { %v211_v0 = vld [vmem:[%s558_s1] sm:$0xf]  ;;  %v487_v1 = vmov 0   ;;  %v488_v2 = vmov 2   ;;  %v489_v3 = vmov 1   ;;  %v490_v4 = vmov 3  }
   0xd   : > { %457 = vset.pattern.permute.xlu0 %v487_v1  ;;  %459 = vset.pattern.permute.xlu1 %v488_v2  ;;  %v316_v5 = vld [vmem:[%s559_s2] sm:$0xf]  ;;  %s566_s12 = smov (!%p191_p4, %s477_s12), 1  ;;  %v218_v6 = vlaneseq }
   0xe   : > { %214 = vperm.xlu0 %457, %v211_v0   ;;  %265 = vperm.xlu1 %459, %v211_v0   ;;  %s427_s20 = sshll.u32 %s566_s12, 3 }
   0xf   : > { %v219_v7 = vshrl.u32 %v218_v6, 7  ;;  %s198_s23 = scalar_lea.vmem %s557_s0, %s427_s20  ;;  %s208_s26 = scalar_lea.vmem %s560_s3, %s427_s20 }
  0x10   : > { %v210_v12 = vld [vmem:[%s198_s23] sm:$0xff] }
  0x11   : > { %v220_v8 = vsub.s32 0, %v219_v7  ;;  %v224_v9 = vsub.s32 4, %v219_v7  ;;  %v244_v10 = vsub.s32 1, %v219_v7  ;;  %v248_v11 = vsub.s32 5, %v219_v7 }
  0x12   : > { %458 = vset.pattern.permute.xlu0 %v489_v3  ;;  %460 = vset.pattern.permute.xlu1 %v490_v4  ;;  %v270_v13 = vsub.s32 2, %v219_v7  ;;  %v274_v14 = vsub.s32 6, %v219_v7  ;;  %v296_v15 = vsub.s32 3, %v219_v7  ;;  %v300_v16 = vsub.s32 7, %v219_v7 }
  0x13   : > { %239 = vperm.xlu0 %458, %v211_v0   ;;  %291 = vperm.xlu1 %460, %v211_v0   ;;  %v221_v17 = vrot.slane %v210_v12, %v220_v8  ;;  %v225_v18 = vrot.slane %v210_v12, %v224_v9  ;;  %v245_v19 = vrot.slane %v210_v12, %v244_v10 }
  0x14   : > { %v249_v20 = vrot.slane %v210_v12, %v248_v11  ;;  %v271_v21 = vrot.slane %v210_v12, %v270_v13  ;;  %v275_v22 = vrot.slane %v210_v12, %v274_v14  ;;  %v297_v25 = vrot.slane %v210_v12, %v296_v15 }
  0x15   : > { %v301_v26 = vrot.slane %v210_v12, %v300_v16  ;;  %v231_v27 = vrot.slane %v221_v17, %v220_v8  ;;  %v235_v28 = vrot.slane %v225_v18, %v220_v8  ;;  %v255_v29 = vrot.slane %v245_v19, %v244_v10 }
  0x16   : > { %v259_v30 = vrot.slane %v249_v20, %v244_v10  ;;  %v281_v31 = vrot.slane %v271_v21, %v270_v13  ;;  %v285_v32 = vrot.slane %v275_v22, %v270_v13  ;;  %v307_v33 = vrot.slane %v297_v25, %v296_v15 }
  0x17   : > { %461 = vset.pattern.permute.xlu1 %v487_v1  ;;  %462 = vset.pattern.permute.xlu0 %v487_v1  ;;  %v311_v34 = vrot.slane %v301_v26, %v296_v15 }
  0x18   : > { %319 = vperm.xlu1 %461, %v316_v5  }
  0x89   : > { %v215_v23 = vpop.permute.xlu0 %214  ;;  %v266_v24 = vpop.permute.xlu1 %265 }
  0x8a   : > { %v236_v37 = vmul.f32 %v231_v27, %v215_v23  ;;  %v237_v38 = vmul.f32 %v235_v28, %v215_v23  ;;  %v286_v41 = vmul.f32 %v281_v31, %v266_v24  ;;  %v287_v42 = vmul.f32 %v285_v32, %v266_v24 }
  0x8e   : > { %v240_v35 = vpop.permute.xlu0 %239  ;;  %v292_v36 = vpop.permute.xlu1 %291 }
  0x8f   : > { %v260_v39 = vmul.f32 %v255_v29, %v240_v35  ;;  %v261_v40 = vmul.f32 %v259_v30, %v240_v35  ;;  %v312_v45 = vmul.f32 %v307_v33, %v292_v36  ;;  %v313_v46 = vmul.f32 %v311_v34, %v292_v36 }
  0x91   : > { %v262_v43 = vadd.f32 %v260_v39, %v236_v37  ;;  %v263_v44 = vadd.f32 %v261_v40, %v237_v38 }
  0x93   : > { %v288_v47 = vadd.f32 %v286_v41, %v262_v43  ;;  %v289_v48 = vadd.f32 %v287_v42, %v263_v44  ;;  %v320_v49 = vpop.permute.xlu1 %319 }
  0x95   : > { %v314_v50 = vadd.f32 %v312_v45, %v288_v47  ;;  %v315_v51 = vadd.f32 %v313_v46, %v289_v48 }
  0x97   : > { %v322_v52 = vadd.f32 %v320_v49, %v314_v50  ;;  %v323_v53 = vadd.f32 %v320_v49, %v315_v51 }
  0x99   : > { %v326_v54 = vcombine.low %v322_v52, %v323_v53 }
  0x9b   : > { %328 = vst [vmem:[%s208_s26] sm:$0xff] %v326_v54 }
  0x9c PF: > { %s13_s14 = sadd.s32 1, %s485_s14   ;;  %s561_s12 = smov %s481_s13 }
  0x9d   : > { %p10_p5 = scmp.ge.s32.totalorder %s13_s14, 4   ;;  %s562_s13 = smov %s564_s15 }
  0x9f   :  { %12 = sbr.rel (!%p10_p5) target bundleno = 2 (0x2), region = 62 }

// kernel: reverse.57
= control target key start
LH: loop header
LB: loop body
LE: loop exit
PB: predicated region body
PF: predicated region fallthrough
CT: control target
= control target key end

     0   :  { %v72_v3 = vlaneseq  ;;  %v65_v9 = vld [vmem:[#allocation0 + $0x7] ss:$-1 sm:$0xff]  ;;  %v79_v12 = vld [vmem:[#allocation0 + $0x17] ss:$-1 sm:$0xff]  ;;  %s331_s0 = inlined_call_operand.vmem [shape: f32[2,4,16,7], index: 0, kind: input, shape index: {}]   ;;  %s332_s1 = inlined_call_operand.vmem [shape: f32[2,4,16,7], index: 1, kind: output, shape index: {}]  }
   0x1   :  { %v45_v0 = vld [vmem:[%s331_s0] sm:$0xff]  ;;  %v47_v1 = vld [vmem:[%s331_s0 + $0x8] sm:$0xff]  ;;  %v49_v2 = vld [vmem:[%s331_s0 + $0x10] sm:$0xff]  ;;  %v66_v10 = vrot.slane %v65_v9, 1  ;;  %v80_v14 = vrot.slane %v79_v12, 1 }
   0x2   :  { %46 = vst [vmem:[#allocation0 + $0x8] sm:$0xff] %v45_v0  ;;  %48 = vst [vmem:[#allocation0 + $0x18] sm:$0xff] %v47_v1  ;;  %v51_v4 = vld [vmem:[%s331_s0 + $0x18] sm:$0xff]  ;;  %v53_v5 = vld [vmem:[%s331_s0 + $0x20] sm:$0xff]  ;;  %v73_v11 = vshrl.u32 %v72_v3, 7 }
   0x3   :  { %50 = vst [vmem:[#allocation0 + $0x28] sm:$0xff] %v49_v2  ;;  %v55_v6 = vld [vmem:[%s331_s0 + $0x28] sm:$0xff]  ;;  %52 = vst [vmem:[#allocation0 + $0x38] sm:$0xff] %v51_v4  ;;  %v57_v7 = vld [vmem:[%s331_s0 + $0x30] sm:$0xff] }
   0x4   :  { %54 = vst [vmem:[#allocation0 + $0x48] sm:$0xff] %v53_v5  ;;  %56 = vst [vmem:[#allocation0 + $0x58] sm:$0xff] %v55_v6  ;;  %v59_v8 = vld [vmem:[%s331_s0 + $0x38] sm:$0xff]  ;;  %v93_v13 = vld [vmem:[#allocation0 + $0x27] ss:$-1 sm:$0xff]  ;;  %vm74_vm0 = vcmp.lt.s32.totalorder %v73_v11, 7 }
   0x5   :  { %58 = vst [vmem:[#allocation0 + $0x68] sm:$0xff] %v57_v7  ;;  %60 = vst [vmem:[#allocation0 + $0x78] sm:$0xff] %v59_v8  ;;  %v94_v15 = vrot.slane %v93_v13, 1  ;;  %v107_v16 = vld [vmem:[#allocation0 + $0x37] ss:$-1 sm:$0xff] }
   0x6   :  { %67 = vst [vmem:[#allocation1] sm:$0xff] %v66_v10  ;;  %v108_v17 = vrot.slane %v107_v16, 1  ;;  %v121_v18 = vld [vmem:[#allocation0 + $0x47] ss:$-1 sm:$0xff]  ;;  %v135_v19 = vld [vmem:[#allocation0 + $0x57] ss:$-1 sm:$0xff] }
   0x7   :  { %81 = vst [vmem:[#allocation1 + $0x8] sm:$0xff] %v80_v14  ;;  %95 = vst [vmem:[#allocation1 + $0x10] sm:$0xff] %v94_v15  ;;  %v122_v20 = vrot.slane %v121_v18, 1  ;;  %v136_v21 = vrot.slane %v135_v19, 1  ;;  %v149_v22 = vld [vmem:[#allocation0 + $0x67] ss:$-1 sm:$0xff] }
   0x8   :  { %v163_v23 = vld [vmem:[#allocation0 + $0x77] ss:$-1 sm:$0xff]  ;;  %109 = vst [vmem:[#allocation1 + $0x18] sm:$0xff] %v108_v17  ;;  %v150_v24 = vrot.slane %v149_v22, 1 }
   0x9   :  { %v164_v25 = vrot.slane %v163_v23, 1  ;;  %v70_v26 = vld [vmem:[#allocation0 + $0xf] ss:$-1 sm:$0xff]  ;;  %v84_v27 = vld [vmem:[#allocation0 + $0x1f] ss:$-1 sm:$0xff]  ;;  %123 = vst [vmem:[#allocation1 + $0x20] sm:$0xff] %v122_v20 }
   0xa   :  { %v98_v28 = vld [vmem:[#allocation0 + $0x2f] ss:$-1 sm:$0xff]  ;;  %137 = vst [vmem:[#allocation1 + $0x28] sm:$0xff] %v136_v21  ;;  %v71_v29 = vrot.slane %v70_v26, 1  ;;  %v85_v30 = vrot.slane %v84_v27, 1  ;;  %151 = vst [vmem:[#allocation1 + $0x30] sm:$0xff] %v150_v24 }
   0xb   :  { %v99_v31 = vrot.slane %v98_v28, 1  ;;  %v112_v32 = vld [vmem:[#allocation0 + $0x3f] ss:$-1 sm:$0xff]  ;;  %165 = vst [vmem:[#allocation1 + $0x38] sm:$0xff] %v164_v25  ;;  %v126_v34 = vld [vmem:[#allocation0 + $0x4f] ss:$-1 sm:$0xff] }
   0xc   :  { %v113_v33 = vrot.slane %v112_v32, 1  ;;  %v140_v35 = vld [vmem:[#allocation0 + $0x5f] ss:$-1 sm:$0xff]  ;;  %75 = vst.msk [vmem:[#allocation1] sm:$0xff] %vm74_vm0, %v71_v29  ;;  %89 = vst.msk [vmem:[#allocation1 + $0x8] sm:$0xff] %vm74_vm0, %v85_v30  ;;  %v127_v36 = vrot.slane %v126_v34, 1 }
   0xd   :  { %103 = vst.msk [vmem:[#allocation1 + $0x10] sm:$0xff] %vm74_vm0, %v99_v31  ;;  %v141_v37 = vrot.slane %v140_v35, 1  ;;  %v154_v38 = vld [vmem:[#allocation0 + $0x6f] ss:$-1 sm:$0xff]  ;;  %v168_v39 = vld [vmem:[#allocation0 + $0x7f] ss:$-1 sm:$0xff] }
   0xe   :  { %117 = vst.msk [vmem:[#allocation1 + $0x18] sm:$0xff] %vm74_vm0, %v113_v33  ;;  %v155_v40 = vrot.slane %v154_v38, 1  ;;  %v169_v41 = vrot.slane %v168_v39, 1  ;;  %131 = vst.msk [vmem:[#allocation1 + $0x20] sm:$0xff] %vm74_vm0, %v127_v36 }
   0xf   :  { %145 = vst.msk [vmem:[#allocation1 + $0x28] sm:$0xff] %vm74_vm0, %v141_v37 }
  0x10   :  { %159 = vst.msk [vmem:[#allocation1 + $0x30] sm:$0xff] %vm74_vm0, %v155_v40  ;;  %173 = vst.msk [vmem:[#allocation1 + $0x38] sm:$0xff] %vm74_vm0, %v169_v41 }
  0x13   :  { %v216_v42 = vld [vmem:[#allocation1] sm:$0xff]  ;;  %v218_v43 = vld [vmem:[#allocation1 + $0x8] sm:$0xff] }
  0x14   :  { %v220_v44 = vld [vmem:[#allocation1 + $0x10] sm:$0xff]  ;;  %217 = vst [vmem:[%s332_s1] sm:$0xff] %v216_v42  ;;  %219 = vst [vmem:[%s332_s1 + $0x8] sm:$0xff] %v218_v43 }
  0x15   :  { %221 = vst [vmem:[%s332_s1 + $0x10] sm:$0xff] %v220_v44  ;;  %v222_v45 = vld [vmem:[#allocation1 + $0x18] sm:$0xff]  ;;  %v224_v46 = vld [vmem:[#allocation1 + $0x20] sm:$0xff] }
  0x16   :  { %223 = vst [vmem:[%s332_s1 + $0x18] sm:$0xff] %v222_v45  ;;  %v226_v47 = vld [vmem:[#allocation1 + $0x28] sm:$0xff]  ;;  %225 = vst [vmem:[%s332_s1 + $0x20] sm:$0xff] %v224_v46 }
  0x17   :  { %227 = vst [vmem:[%s332_s1 + $0x28] sm:$0xff] %v226_v47  ;;  %v228_v48 = vld [vmem:[#allocation1 + $0x30] sm:$0xff]  ;;  %v230_v49 = vld [vmem:[#allocation1 + $0x38] sm:$0xff] }
  0x18   :  { %229 = vst [vmem:[%s332_s1 + $0x30] sm:$0xff] %v228_v48  ;;  %231 = vst [vmem:[%s332_s1 + $0x38] sm:$0xff] %v230_v49 }

// kernel: fnounet_forward.61
= control target key start
LH: loop header
LB: loop body
LE: loop exit
PB: predicated region body
PF: predicated region fallthrough
CT: control target
= control target key end

     0   :  { %v31_v0 = vlaneseq  ;;  %s293_s0 = inlined_call_operand.vmem [shape: f32[2,4,128], index: 0, kind: input, shape index: {}]   ;;  %s294_s1 = inlined_call_operand.vmem [shape: f32[2,4,128], index: 1, kind: input, shape index: {}]   ;;  %s295_s2 = inlined_call_operand.vmem [shape: f32[4,4,128], index: 2, kind: input, shape index: {}]   ;;  %s296_s3 = inlined_call_operand.vmem [shape: f32[4,4,128], index: 3, kind: input, shape index: {}]   ;;  %s297_s4 = inlined_call_operand.vmem [shape: f32[2,4,128], index: 4, kind: output, shape index: {0}]   ;;  %s298_s5 = inlined_call_operand.vmem [shape: f32[2,4,128], index: 5, kind: output, shape index: {1}]  }
   0x1   :  { %v19_v2 = vld [vmem:[%s293_s0] sm:$0xf]  ;;  %v211_v5 = vld [vmem:[%s295_s2 + $0x4] sm:$0xf]  ;;  %v216_v10 = vld [vmem:[%s295_s2 + $0x8] sm:$0xf] }
   0x2   :  { %v32_v1 = vshrl.u32 %v31_v0, 7  ;;  %v21_v3 = vld [vmem:[%s294_s1] sm:$0xf]  ;;  %v226_v12 = vld [vmem:[%s296_s3 + $0x4] sm:$0xf] }
   0x3   :  { %v206_v4 = vld [vmem:[%s295_s2] sm:$0xf]  ;;  %v231_v13 = vld [vmem:[%s295_s2 + $0xc] sm:$0xf]  ;;  %v236_v14 = vld [vmem:[%s296_s3 + $0x8] sm:$0xf] }
   0x4   :  { %v33_v6 = vsub.s32 0, %v32_v1  ;;  %v61_v7 = vsub.s32 1, %v32_v1  ;;  %v93_v8 = vsub.s32 2, %v32_v1  ;;  %v125_v9 = vsub.s32 3, %v32_v1  ;;  %v221_v11 = vld [vmem:[%s296_s3] sm:$0xf] }
   0x5   :  { %v241_v15 = vld [vmem:[%s296_s3 + $0xc] sm:$0xf]  ;;  %v20_v24 = vld [vmem:[%s293_s0 + $0x4] sm:$0xf] }
   0x6   :  { %v34_v16 = vrot.slane %v19_v2, %v33_v6  ;;  %v44_v17 = vrot.slane %v21_v3, %v33_v6  ;;  %v62_v18 = vrot.slane %v19_v2, %v61_v7  ;;  %v72_v19 = vrot.slane %v21_v3, %v61_v7  ;;  %v22_v25 = vld [vmem:[%s294_s1 + $0x4] sm:$0xf] }
   0x7   :  { %v94_v20 = vrot.slane %v19_v2, %v93_v8  ;;  %v104_v21 = vrot.slane %v21_v3, %v93_v8  ;;  %v126_v22 = vrot.slane %v19_v2, %v125_v9  ;;  %v136_v23 = vrot.slane %v21_v3, %v125_v9 }
   0x8   :  { %v39_v26 = vmul.f32 %v34_v16, %v206_v4  ;;  %v49_v27 = vmul.f32 %v44_v17, %v221_v11  ;;  %v67_v28 = vmul.f32 %v62_v18, %v211_v5  ;;  %v77_v29 = vmul.f32 %v72_v19, %v226_v12 }
   0x9   :  { %v99_v30 = vmul.f32 %v94_v20, %v216_v10  ;;  %v109_v31 = vmul.f32 %v104_v21, %v236_v14  ;;  %v131_v32 = vmul.f32 %v126_v22, %v231_v13  ;;  %v141_v33 = vmul.f32 %v136_v23, %v241_v15 }
   0xa   :  { %v51_v34 = vsub.f32 %v39_v26, %v49_v27  ;;  %v79_v35 = vsub.f32 %v67_v28, %v77_v29  ;;  %v38_v36 = vrot.slane %v20_v24, %v33_v6  ;;  %v48_v37 = vrot.slane %v22_v25, %v33_v6 }
   0xb   :  { %v111_v38 = vsub.f32 %v99_v30, %v109_v31  ;;  %v143_v39 = vsub.f32 %v131_v32, %v141_v33  ;;  %v66_v40 = vrot.slane %v20_v24, %v61_v7  ;;  %v76_v41 = vrot.slane %v22_v25, %v61_v7 }
   0xc   :  { %v87_v42 = vadd.f32 %v79_v35, %v51_v34  ;;  %v40_v43 = vmul.f32 %v38_v36, %v206_v4  ;;  %v50_v44 = vmul.f32 %v48_v37, %v221_v11  ;;  %v98_v45 = vrot.slane %v20_v24, %v93_v8 }
   0xd   :  { %v68_v46 = vmul.f32 %v66_v40, %v211_v5  ;;  %v78_v47 = vmul.f32 %v76_v41, %v226_v12  ;;  %v108_v48 = vrot.slane %v22_v25, %v93_v8  ;;  %v130_v49 = vrot.slane %v20_v24, %v125_v9 }
   0xe   :  { %v119_v50 = vadd.f32 %v111_v38, %v87_v42  ;;  %v52_v51 = vsub.f32 %v40_v43, %v50_v44  ;;  %v100_v52 = vmul.f32 %v98_v45, %v216_v10  ;;  %v140_v53 = vrot.slane %v22_v25, %v125_v9 }
   0xf   :  { %v80_v54 = vsub.f32 %v68_v46, %v78_v47  ;;  %v110_v55 = vmul.f32 %v108_v48, %v236_v14  ;;  %v132_v56 = vmul.f32 %v130_v49, %v231_v13  ;;  %v53_v57 = vmul.f32 %v34_v16, %v221_v11 }
  0x10   :  { %v151_v58 = vadd.f32 %v143_v39, %v119_v50  ;;  %v142_v59 = vmul.f32 %v140_v53, %v241_v15  ;;  %v55_v60 = vmul.f32 %v44_v17, %v206_v4  ;;  %v81_v61 = vmul.f32 %v62_v18, %v226_v12 }
  0x11   :  { %v88_v62 = vadd.f32 %v80_v54, %v52_v51  ;;  %v112_v63 = vsub.f32 %v100_v52, %v110_v55  ;;  %v83_v0 = vmul.f32 %v72_v19, %v211_v5  ;;  %v113_v1 = vmul.f32 %v94_v20, %v236_v14 }
  0x12   :  { %155 = vst [vmem:[%s297_s4] sm:$0xf] %v151_v58  ;;  %v144_v2 = vsub.f32 %v132_v56, %v142_v59  ;;  %v57_v3 = vadd.f32 %v55_v60, %v53_v57  ;;  %v115_v6 = vmul.f32 %v104_v21, %v216_v10  ;;  %v145_v7 = vmul.f32 %v126_v22, %v241_v15 }
  0x13   :  { %v120_v8 = vadd.f32 %v112_v63, %v88_v62  ;;  %v85_v9 = vadd.f32 %v83_v0, %v81_v61  ;;  %v147_v16 = vmul.f32 %v136_v23, %v231_v13  ;;  %v54_v17 = vmul.f32 %v38_v36, %v221_v11 }
  0x14   :  { %v117_v18 = vadd.f32 %v115_v6, %v113_v1  ;;  %v56_v19 = vmul.f32 %v48_v37, %v206_v4  ;;  %v82_v20 = vmul.f32 %v66_v40, %v226_v12  ;;  %v84_v24 = vmul.f32 %v76_v41, %v211_v5 }
  0x15   :  { %v152_v25 = vadd.f32 %v144_v2, %v120_v8  ;;  %v89_v26 = vadd.f32 %v85_v9, %v57_v3  ;;  %v149_v27 = vadd.f32 %v147_v16, %v145_v7  ;;  %v114_v21 = vmul.f32 %v98_v45, %v236_v14 }
  0x16   :  { %v58_v28 = vadd.f32 %v56_v19, %v54_v17  ;;  %v86_v22 = vadd.f32 %v84_v24, %v82_v20  ;;  %v116_v29 = vmul.f32 %v108_v48, %v216_v10  ;;  %v146_v23 = vmul.f32 %v130_v49, %v241_v15 }
  0x17   :  { %156 = vst [vmem:[%s297_s4 + $0x4] sm:$0xf] %v152_v25  ;;  %v121_v4 = vadd.f32 %v117_v18, %v89_v26  ;;  %v148_v11 = vmul.f32 %v140_v53, %v231_v13 }
  0x18   :  { %v90_v12 = vadd.f32 %v86_v22, %v58_v28  ;;  %v118_v5 = vadd.f32 %v116_v29, %v114_v21 }
  0x19   :  { %v153_v30 = vadd.f32 %v149_v27, %v121_v4  ;;  %v150_v31 = vadd.f32 %v148_v11, %v146_v23 }
  0x1a   :  { %v122_v32 = vadd.f32 %v118_v5, %v90_v12 }
  0x1b   :  { %157 = vst [vmem:[%s298_s5] sm:$0xf] %v153_v30 }
  0x1c   :  { %v154_v14 = vadd.f32 %v150_v31, %v122_v32 }
  0x1e   :  { %158 = vst [vmem:[%s298_s5 + $0x4] sm:$0xf] %v154_v14 }

// kernel: fnounet_forward.62
= control target key start
LH: loop header
LB: loop body
LE: loop exit
PB: predicated region body
PF: predicated region fallthrough
CT: control target
= control target key end

     0   :  { %s621_s15 = smov 0   ;;  %s623_s16 = smov 0   ;;  %s668_s0 = inlined_call_operand.vmem [shape: f32[2,4,256], index: 0, kind: input, shape index: {}]   ;;  %s669_s1 = inlined_call_operand.vmem [shape: f32[4,4], index: 1, kind: input, shape index: {}]   ;;  %s670_s2 = inlined_call_operand.vmem [shape: f32[4,1], index: 2, kind: input, shape index: {}]   ;;  %s671_s3 = inlined_call_operand.vmem [shape: f32[2,4,256], index: 3, kind: input, shape index: {}]   ;;  %s672_s4 = inlined_call_operand.vmem [shape: f32[2,4,256], index: 4, kind: output, shape index: {}]  }
   0x1   :  { %s625_s17 = smov 0  }
   0x2 LB: > { %s26_s18 = sadd.s32 1, %s586_s16  ;;  %p517_p0 = scmp.ge.s32.totalorder %s590_s17, 1  ;;  %s590_s17 = sphi %s625_s17, %s14_s17   ;;  %s586_s16 = sphi %s623_s16, %s674_s16   ;;  %s582_s15 = sphi %s621_s15, %s673_s15  }
   0x3   : > { %p28_p1 = scmp.ge.s32.totalorder %s26_s18, 2  ;;  %p200_p2 = scmp.lt.s32.totalorder %s590_s17, 3 }
   0x5   : > { %s676_s18 = smov (%p28_p1, %s26_s18), 0  ;;  %p201_p3 = pnand %p517_p0, %p200_p2 }
   0x6   : > { %p244_p4 = scmp.lt.s32.totalorder (!%p201_p3), %s582_s15, 1 }
   0x7   : > { %204 = sbr.rel (%p201_p3) target bundleno = 179 (0xb3), region = 36 }
   0xc   : > { %v274_v0 = vld [vmem:[%s669_s1] sm:$0xf]  ;;  %v592_v1 = vmov 0   ;;  %v593_v2 = vmov 2   ;;  %v594_v3 = vmov 1   ;;  %v595_v4 = vmov 3  }
   0xd   : > { %557 = vset.pattern.permute.xlu0 %v592_v1  ;;  %559 = vset.pattern.permute.xlu1 %v593_v2  ;;  %v379_v5 = vld [vmem:[%s670_s2] sm:$0xf]  ;;  %s678_s15 = smov (!%p244_p4, %s582_s15), 1  ;;  %v281_v6 = vlaneseq }
   0xe   : > { %277 = vperm.xlu0 %557, %v274_v0   ;;  %328 = vperm.xlu1 %559, %v274_v0   ;;  %s645_s23 = sshll.u32 %s678_s15, 3 }
   0xf   : > { %v282_v7 = vshrl.u32 %v281_v6, 7  ;;  %s251_s26 = scalar_lea.vmem %s668_s0, %s645_s23  ;;  %s261_s29 = scalar_lea.vmem %s671_s3, %s645_s23 }
  0x10   : > { %v273_v12 = vld [vmem:[%s251_s26] sm:$0xff]  ;;  %s271_s6 = scalar_lea.vmem %s672_s4, %s645_s23 }
  0x11   : > { %v283_v8 = vsub.s32 0, %v282_v7  ;;  %v287_v9 = vsub.s32 4, %v282_v7  ;;  %v307_v10 = vsub.s32 1, %v282_v7  ;;  %v311_v11 = vsub.s32 5, %v282_v7  ;;  %v387_v47 = vld [vmem:[%s261_s29] sm:$0xff] }
  0x12   : > { %558 = vset.pattern.permute.xlu0 %v594_v3  ;;  %560 = vset.pattern.permute.xlu1 %v595_v4  ;;  %v333_v13 = vsub.s32 2, %v282_v7  ;;  %v337_v14 = vsub.s32 6, %v282_v7  ;;  %v359_v15 = vsub.s32 3, %v282_v7  ;;  %v363_v16 = vsub.s32 7, %v282_v7 }
  0x13   : > { %302 = vperm.xlu0 %558, %v274_v0   ;;  %354 = vperm.xlu1 %560, %v274_v0   ;;  %v284_v17 = vrot.slane %v273_v12, %v283_v8  ;;  %v288_v18 = vrot.slane %v273_v12, %v287_v9  ;;  %v308_v19 = vrot.slane %v273_v12, %v307_v10 }
  0x14   : > { %v312_v20 = vrot.slane %v273_v12, %v311_v11  ;;  %v334_v21 = vrot.slane %v273_v12, %v333_v13  ;;  %v338_v22 = vrot.slane %v273_v12, %v337_v14  ;;  %v360_v25 = vrot.slane %v273_v12, %v359_v15 }
  0x15   : > { %v364_v26 = vrot.slane %v273_v12, %v363_v16  ;;  %v294_v27 = vrot.slane %v284_v17, %v283_v8  ;;  %v298_v28 = vrot.slane %v288_v18, %v283_v8  ;;  %v318_v29 = vrot.slane %v308_v19, %v307_v10 }
  0x16   : > { %v322_v30 = vrot.slane %v312_v20, %v307_v10  ;;  %v344_v31 = vrot.slane %v334_v21, %v333_v13  ;;  %v348_v32 = vrot.slane %v338_v22, %v333_v13  ;;  %v370_v33 = vrot.slane %v360_v25, %v359_v15 }
  0x17   : > { %561 = vset.pattern.permute.xlu1 %v592_v1  ;;  %562 = vset.pattern.permute.xlu0 %v592_v1  ;;  %v374_v34 = vrot.slane %v364_v26, %v359_v15  ;;  %v389_v53 = vcombine.high %v387_v47, %v387_v47 }
  0x18   : > { %382 = vperm.xlu1 %561, %v379_v5  }
  0x89   : > { %v278_v23 = vpop.permute.xlu0 %277  ;;  %v329_v24 = vpop.permute.xlu1 %328 }
  0x8a   : > { %v299_v37 = vmul.f32 %v294_v27, %v278_v23  ;;  %v300_v38 = vmul.f32 %v298_v28, %v278_v23  ;;  %v349_v41 = vmul.f32 %v344_v31, %v329_v24  ;;  %v350_v42 = vmul.f32 %v348_v32, %v329_v24 }
  0x8e   : > { %v303_v35 = vpop.permute.xlu0 %302  ;;  %v355_v36 = vpop.permute.xlu1 %354 }
  0x8f   : > { %v323_v39 = vmul.f32 %v318_v29, %v303_v35  ;;  %v324_v40 = vmul.f32 %v322_v30, %v303_v35  ;;  %v375_v45 = vmul.f32 %v370_v33, %v355_v36  ;;  %v376_v46 = vmul.f32 %v374_v34, %v355_v36 }
  0x91   : > { %v325_v43 = vadd.f32 %v323_v39, %v299_v37  ;;  %v326_v44 = vadd.f32 %v324_v40, %v300_v38 }
  0x93   : > { %v351_v48 = vadd.f32 %v349_v41, %v325_v43  ;;  %v352_v49 = vadd.f32 %v350_v42, %v326_v44  ;;  %v383_v50 = vpop.permute.xlu1 %382 }
  0x95   : > { %v377_v51 = vadd.f32 %v375_v45, %v351_v48  ;;  %v378_v52 = vadd.f32 %v376_v46, %v352_v49 }
  0x97   : > { %v385_v54 = vadd.f32 %v383_v50, %v377_v51  ;;  %v386_v55 = vadd.f32 %v383_v50, %v378_v52 }
  0x99   : > { %v391_v56 = vadd.f32 %v387_v47, %v385_v54  ;;  %v392_v57 = vadd.f32 %v389_v53, %v386_v55 }
  0x9b   : > { %v395_v58 = vmul.f32 0.70710677, %v391_v56  ;;  %v396_v59 = vmul.f32 0.70710677, %v392_v57  ;;  %v393_v62 = vmul.f32 0.5, %v391_v56  ;;  %v394_v0 = vmul.f32 0.5, %v392_v57 }
  0x9d   : > { %564 = verf.f32 %v395_v58 }
  0x9e   : > { %566 = verf.f32 %v396_v59 }
  0xaa   : > { %v565_v60 = vpop.eup %564 }
  0xab   : > { %v567_v61 = vpop.eup %566  ;;  %v399_v63 = vadd.f32 1.0, %v565_v60 }
  0xac   : > { %v400_v1 = vadd.f32 1.0, %v567_v61 }
  0xad   : > { %v401_v2 = vmul.f32 %v399_v63, %v393_v62 }
  0xae   : > { %v402_v3 = vmul.f32 %v400_v1, %v394_v0 }
  0xb0   : > { %v405_v4 = vcombine.low %v401_v2, %v402_v3 }
  0xb2   : > { %407 = vst [vmem:[%s271_s6] sm:$0xff] %v405_v4 }
  0xb3 PF: > { %s14_s17 = sadd.s32 1, %s590_s17   ;;  %s673_s15 = smov %s586_s16 }
  0xb4   : > { %p11_p5 = scmp.ge.s32.totalorder %s14_s17, 4   ;;  %s674_s16 = smov %s676_s18 }
  0xb6   :  { %13 = sbr.rel (!%p11_p5) target bundleno = 2 (0x2), region = 69 }

// kernel: fnounet_forward.68
= control target key start
LH: loop header
LB: loop body
LE: loop exit
PB: predicated region body
PF: predicated region fallthrough
CT: control target
= control target key end

     0   :  { %s607_s15 = smov 0   ;;  %s609_s16 = smov 0   ;;  %s654_s0 = inlined_call_operand.vmem [shape: f32[2,4,256], index: 0, kind: input, shape index: {}]   ;;  %s655_s1 = inlined_call_operand.vmem [shape: f32[4,4], index: 1, kind: input, shape index: {}]   ;;  %s656_s2 = inlined_call_operand.vmem [shape: f32[4,1], index: 2, kind: input, shape index: {}]   ;;  %s657_s3 = inlined_call_operand.vmem [shape: f32[2,4,256], index: 3, kind: input, shape index: {}]   ;;  %s658_s4 = inlined_call_operand.vmem [shape: f32[2,4,256], index: 4, kind: output, shape index: {}]  }
   0x1   :  { %s611_s17 = smov 0  }
   0x2 LB: > { %s26_s18 = sadd.s32 1, %s572_s16  ;;  %p507_p0 = scmp.ge.s32.totalorder %s576_s17, 1  ;;  %s576_s17 = sphi %s611_s17, %s14_s17   ;;  %s572_s16 = sphi %s609_s16, %s660_s16   ;;  %s568_s15 = sphi %s607_s15, %s659_s15  }
   0x3   : > { %p28_p1 = scmp.ge.s32.totalorder %s26_s18, 2  ;;  %p200_p2 = scmp.lt.s32.totalorder %s576_s17, 3 }
   0x5   : > { %s662_s18 = smov (%p28_p1, %s26_s18), 0  ;;  %p201_p3 = pnand %p507_p0, %p200_p2 }
   0x6   : > { %p244_p4 = scmp.lt.s32.totalorder (!%p201_p3), %s568_s15, 1 }
   0x7   : > { %204 = sbr.rel (%p201_p3) target bundleno = 158 (0x9e), region = 36 }
   0xc   : > { %v274_v0 = vld [vmem:[%s655_s1] sm:$0xf]  ;;  %v578_v1 = vmov 0   ;;  %v579_v2 = vmov 2   ;;  %v580_v3 = vmov 1   ;;  %v581_v4 = vmov 3  }
   0xd   : > { %547 = vset.pattern.permute.xlu0 %v578_v1  ;;  %549 = vset.pattern.permute.xlu1 %v579_v2  ;;  %v379_v5 = vld [vmem:[%s656_s2] sm:$0xf]  ;;  %s664_s15 = smov (!%p244_p4, %s568_s15), 1  ;;  %v281_v6 = vlaneseq }
   0xe   : > { %277 = vperm.xlu0 %547, %v274_v0   ;;  %328 = vperm.xlu1 %549, %v274_v0   ;;  %s631_s23 = sshll.u32 %s664_s15, 3 }
   0xf   : > { %v282_v7 = vshrl.u32 %v281_v6, 7  ;;  %s251_s26 = scalar_lea.vmem %s654_s0, %s631_s23  ;;  %s261_s29 = scalar_lea.vmem %s657_s3, %s631_s23 }
  0x10   : > { %v273_v12 = vld [vmem:[%s251_s26] sm:$0xff]  ;;  %s271_s6 = scalar_lea.vmem %s658_s4, %s631_s23 }
  0x11   : > { %v283_v8 = vsub.s32 0, %v282_v7  ;;  %v287_v9 = vsub.s32 4, %v282_v7  ;;  %v307_v10 = vsub.s32 1, %v282_v7  ;;  %v311_v11 = vsub.s32 5, %v282_v7  ;;  %v387_v47 = vld [vmem:[%s261_s29] sm:$0xff] }
  0x12   : > { %548 = vset.pattern.permute.xlu0 %v580_v3  ;;  %550 = vset.pattern.permute.xlu1 %v581_v4  ;;  %v333_v13 = vsub.s32 2, %v282_v7  ;;  %v337_v14 = vsub.s32 6, %v282_v7  ;;  %v359_v15 = vsub.s32 3, %v282_v7  ;;  %v363_v16 = vsub.s32 7, %v282_v7 }
  0x13   : > { %302 = vperm.xlu0 %548, %v274_v0   ;;  %354 = vperm.xlu1 %550, %v274_v0   ;;  %v284_v17 = vrot.slane %v273_v12, %v283_v8  ;;  %v288_v18 = vrot.slane %v273_v12, %v287_v9  ;;  %v308_v19 = vrot.slane %v273_v12, %v307_v10 }
  0x14   : > { %v312_v20 = vrot.slane %v273_v12, %v311_v11  ;;  %v334_v21 = vrot.slane %v273_v12, %v333_v13  ;;  %v338_v22 = vrot.slane %v273_v12, %v337_v14  ;;  %v360_v25 = vrot.slane %v273_v12, %v359_v15 }
  0x15   : > { %v364_v26 = vrot.slane %v273_v12, %v363_v16  ;;  %v294_v27 = vrot.slane %v284_v17, %v283_v8  ;;  %v298_v28 = vrot.slane %v288_v18, %v283_v8  ;;  %v318_v29 = vrot.slane %v308_v19, %v307_v10 }
  0x16   : > { %v322_v30 = vrot.slane %v312_v20, %v307_v10  ;;  %v344_v31 = vrot.slane %v334_v21, %v333_v13  ;;  %v348_v32 = vrot.slane %v338_v22, %v333_v13  ;;  %v370_v33 = vrot.slane %v360_v25, %v359_v15 }
  0x17   : > { %551 = vset.pattern.permute.xlu1 %v578_v1  ;;  %552 = vset.pattern.permute.xlu0 %v578_v1  ;;  %v374_v34 = vrot.slane %v364_v26, %v359_v15  ;;  %v389_v53 = vcombine.high %v387_v47, %v387_v47 }
  0x18   : > { %382 = vperm.xlu1 %551, %v379_v5  }
  0x89   : > { %v278_v23 = vpop.permute.xlu0 %277  ;;  %v329_v24 = vpop.permute.xlu1 %328 }
  0x8a   : > { %v299_v37 = vmul.f32 %v294_v27, %v278_v23  ;;  %v300_v38 = vmul.f32 %v298_v28, %v278_v23  ;;  %v349_v41 = vmul.f32 %v344_v31, %v329_v24  ;;  %v350_v42 = vmul.f32 %v348_v32, %v329_v24 }
  0x8e   : > { %v303_v35 = vpop.permute.xlu0 %302  ;;  %v355_v36 = vpop.permute.xlu1 %354 }
  0x8f   : > { %v323_v39 = vmul.f32 %v318_v29, %v303_v35  ;;  %v324_v40 = vmul.f32 %v322_v30, %v303_v35  ;;  %v375_v45 = vmul.f32 %v370_v33, %v355_v36  ;;  %v376_v46 = vmul.f32 %v374_v34, %v355_v36 }
  0x91   : > { %v325_v43 = vadd.f32 %v323_v39, %v299_v37  ;;  %v326_v44 = vadd.f32 %v324_v40, %v300_v38 }
  0x93   : > { %v351_v48 = vadd.f32 %v349_v41, %v325_v43  ;;  %v352_v49 = vadd.f32 %v350_v42, %v326_v44  ;;  %v383_v50 = vpop.permute.xlu1 %382 }
  0x95   : > { %v377_v51 = vadd.f32 %v375_v45, %v351_v48  ;;  %v378_v52 = vadd.f32 %v376_v46, %v352_v49 }
  0x97   : > { %v385_v54 = vadd.f32 %v383_v50, %v377_v51  ;;  %v386_v55 = vadd.f32 %v383_v50, %v378_v52 }
  0x99   : > { %v391_v56 = vadd.f32 %v387_v47, %v385_v54  ;;  %v392_v57 = vadd.f32 %v389_v53, %v386_v55 }
  0x9b   : > { %v395_v58 = vcombine.low %v391_v56, %v392_v57 }
  0x9d   : > { %397 = vst [vmem:[%s271_s6] sm:$0xff] %v395_v58 }
  0x9e PF: > { %s14_s17 = sadd.s32 1, %s576_s17   ;;  %s659_s15 = smov %s572_s16 }
  0x9f   : > { %p11_p5 = scmp.ge.s32.totalorder %s14_s17, 4   ;;  %s660_s16 = smov %s662_s18 }
  0xa1   :  { %13 = sbr.rel (!%p11_p5) target bundleno = 2 (0x2), region = 69 }

// kernel: fnounet_forward.93
= control target key start
LH: loop header
LB: loop body
LE: loop exit
PB: predicated region body
PF: predicated region fallthrough
CT: control target
= control target key end

     0   :  { %v39_v0 = vlaneseq  ;;  %s695_s0 = inlined_call_operand.vmem [shape: f32[2,8,128], index: 0, kind: input, shape index: {}]   ;;  %s696_s1 = inlined_call_operand.vmem [shape: f32[2,8,128], index: 1, kind: input, shape index: {}]   ;;  %s697_s2 = inlined_call_operand.vmem [shape: f32[8,8,128], index: 2, kind: input, shape index: {}]   ;;  %s698_s3 = inlined_call_operand.vmem [shape: f32[8,8,128], index: 3, kind: input, shape index: {}]   ;;  %s699_s4 = inlined_call_operand.vmem [shape: f32[2,8,128], index: 4, kind: output, shape index: {0}]   ;;  %s700_s5 = inlined_call_operand.vmem [shape: f32[2,8,128], index: 5, kind: output, shape index: {1}]  }
   0x1   :  { %v336_v2 = vld [vmem:[%s695_s0] sm:$0xff]  ;;  %v351_v5 = vld [vmem:[%s697_s2 + $0x8] sm:$0xff]  ;;  %v362_v9 = vld [vmem:[%s697_s2 + $0x10] sm:$0xff] }
   0x2   :  { %v40_v1 = vshrl.u32 %v39_v0, 7  ;;  %v341_v3 = vld [vmem:[%s696_s1] sm:$0xff]  ;;  %v372_v11 = vld [vmem:[%s698_s3 + $0x8] sm:$0xff]  ;;  %v383_v15 = vld [vmem:[%s697_s2 + $0x18] sm:$0xff] }
   0x3   :  { %v346_v4 = vld [vmem:[%s697_s2] sm:$0xff]  ;;  %v388_v16 = vld [vmem:[%s698_s3 + $0x10] sm:$0xff]  ;;  %v393_v17 = vld [vmem:[%s698_s3 + $0x18] sm:$0xff] }
   0x4   :  { %v353_v6 = vsub.s32 0, %v40_v1  ;;  %v355_v7 = vsub.s32 1, %v40_v1  ;;  %v357_v8 = vsub.s32 2, %v40_v1  ;;  %v367_v10 = vld [vmem:[%s698_s3] sm:$0xff]  ;;  %v374_v12 = vsub.s32 3, %v40_v1  ;;  %v456_v36 = vld [vmem:[%s697_s2 + $0x28] sm:$0xff] }
   0x5   :  { %v376_v13 = vsub.s32 4, %v40_v1  ;;  %v378_v14 = vsub.s32 5, %v40_v1  ;;  %v438_v30 = vld [vmem:[%s697_s2 + $0x20] sm:$0xff]  ;;  %v461_v37 = vld [vmem:[%s698_s3 + $0x28] sm:$0xff]  ;;  %v229_v50 = vsub.s32 6, %v40_v1  ;;  %v491_v51 = vld [vmem:[%s697_s2 + $0x30] sm:$0xff] }
   0x6   :  { %v397_v18 = vrot.slane %v336_v2, %v353_v6  ;;  %v401_v19 = vrot.slane %v341_v3, %v353_v6  ;;  %v405_v20 = vrot.slane %v336_v2, %v355_v7  ;;  %v409_v21 = vrot.slane %v341_v3, %v355_v7  ;;  %v443_v31 = vld [vmem:[%s698_s3 + $0x20] sm:$0xff]  ;;  %v474_v42 = vld [vmem:[%s695_s0 + $0x8] sm:$0xff]  ;;  %v496_v52 = vld [vmem:[%s698_s3 + $0x30] sm:$0xff] }
   0x7   :  { %v413_v22 = vrot.slane %v336_v2, %v357_v8  ;;  %v417_v23 = vrot.slane %v341_v3, %v357_v8  ;;  %v421_v24 = vrot.slane %v336_v2, %v374_v12  ;;  %v425_v25 = vrot.slane %v341_v3, %v374_v12  ;;  %v22_v56 = vld [vmem:[%s696_s1 + $0x8] sm:$0xff]  ;;  %v512_v58 = vld [vmem:[%s697_s2 + $0x38] sm:$0xff] }
   0x8   :  { %v47_v26 = vmul.f32 %v397_v18, %v346_v4  ;;  %v57_v27 = vmul.f32 %v401_v19, %v367_v10  ;;  %v75_v28 = vmul.f32 %v405_v20, %v351_v5  ;;  %v85_v29 = vmul.f32 %v409_v21, %v372_v11  ;;  %v517_v59 = vld [vmem:[%s698_s3 + $0x38] sm:$0xff] }
   0x9   :  { %v107_v32 = vmul.f32 %v413_v22, %v362_v9  ;;  %v117_v33 = vmul.f32 %v417_v23, %v388_v16  ;;  %v139_v34 = vmul.f32 %v421_v24, %v383_v15  ;;  %v149_v35 = vmul.f32 %v425_v25, %v393_v17 }
   0xa   :  { %v59_v38 = vsub.f32 %v47_v26, %v57_v27  ;;  %v87_v39 = vsub.f32 %v75_v28, %v85_v29  ;;  %v465_v40 = vrot.slane %v336_v2, %v376_v13  ;;  %v469_v41 = vrot.slane %v341_v3, %v376_v13 }
   0xb   :  { %v119_v43 = vsub.f32 %v107_v32, %v117_v33  ;;  %v151_v44 = vsub.f32 %v139_v34, %v149_v35  ;;  %v478_v45 = vrot.slane %v336_v2, %v378_v14  ;;  %v482_v46 = vrot.slane %v341_v3, %v378_v14 }
   0xc   :  { %v95_v47 = vadd.f32 %v87_v39, %v59_v38  ;;  %v171_v48 = vmul.f32 %v465_v40, %v438_v30  ;;  %v181_v49 = vmul.f32 %v469_v41, %v443_v31  ;;  %v261_v55 = vsub.s32 7, %v40_v1 }
   0xd   :  { %v203_v53 = vmul.f32 %v478_v45, %v456_v36  ;;  %v213_v54 = vmul.f32 %v482_v46, %v461_v37  ;;  %v507_v57 = vrot.slane %v474_v42, %v353_v6  ;;  %v520_v62 = vrot.slane %v336_v2, %v229_v50 }
   0xe   :  { %v127_v60 = vadd.f32 %v119_v43, %v95_v47  ;;  %v183_v61 = vsub.f32 %v171_v48, %v181_v49  ;;  %v523_v63 = vrot.slane %v341_v3, %v229_v50  ;;  %v526_v1 = vrot.slane %v336_v2, %v261_v55 }
   0xf   :  { %v215_v0 = vsub.f32 %v203_v53, %v213_v54  ;;  %v529_v26 = vrot.slane %v341_v3, %v261_v55  ;;  %v48_v27 = vmul.f32 %v507_v57, %v346_v4  ;;  %v235_v29 = vmul.f32 %v520_v62, %v491_v51 }
  0x10   :  { %v159_v28 = vadd.f32 %v151_v44, %v127_v60  ;;  %v245_v32 = vmul.f32 %v523_v63, %v496_v52  ;;  %v538_v33 = vrot.slane %v22_v56, %v353_v6  ;;  %v267_v2 = vmul.f32 %v526_v1, %v512_v58 }
  0x11   :  { %v277_v3 = vmul.f32 %v529_v26, %v517_v59  ;;  %v546_v34 = vrot.slane %v474_v42, %v355_v7  ;;  %v549_v35 = vrot.slane %v22_v56, %v355_v7  ;;  %v555_v6 = vrot.slane %v474_v42, %v357_v8 }
  0x12   :  { %v191_v38 = vadd.f32 %v183_v61, %v159_v28  ;;  %v247_v39 = vsub.f32 %v235_v29, %v245_v32  ;;  %v58_v43 = vmul.f32 %v538_v33, %v367_v10  ;;  %v562_v49 = vrot.slane %v22_v56, %v357_v8 }
  0x13   :  { %v279_v44 = vsub.f32 %v267_v2, %v277_v3  ;;  %v76_v47 = vmul.f32 %v546_v34, %v351_v5  ;;  %v86_v48 = vmul.f32 %v549_v35, %v372_v11  ;;  %v108_v54 = vmul.f32 %v555_v6, %v362_v9 }
  0x14   :  { %v223_v7 = vadd.f32 %v215_v0, %v191_v38  ;;  %v60_v53 = vsub.f32 %v48_v27, %v58_v43  ;;  %v568_v60 = vrot.slane %v474_v42, %v374_v12  ;;  %v118_v28 = vmul.f32 %v562_v49, %v388_v16 }
  0x15   :  { %v88_v61 = vsub.f32 %v76_v47, %v86_v48  ;;  %v573_v29 = vrot.slane %v22_v56, %v374_v12  ;;  %v577_v8 = vrot.slane %v474_v42, %v376_v13  ;;  %v582_v32 = vrot.slane %v22_v56, %v376_v13 }
  0x16   :  { %703 = vst [vmem:[#allocation2_spill] sm:$0xff] %v568_v60  ;;  %v255_v0 = vadd.f32 %v247_v39, %v223_v7  ;;  %v140_v27 = vmul.f32 %v568_v60, %v383_v15  ;;  %v586_v2 = vrot.slane %v474_v42, %v378_v14  ;;  %v120_v38 = vsub.f32 %v108_v54, %v118_v28 }
  0x17   :  { %v96_v3 = vadd.f32 %v88_v61, %v60_v53  ;;  %v150_v12 = vmul.f32 %v573_v29, %v393_v17  ;;  %v172_v43 = vmul.f32 %v577_v8, %v438_v30  ;;  %v182_v39 = vmul.f32 %v582_v32, %v443_v31 }
  0x18   :  { %v287_v47 = vadd.f32 %v279_v44, %v255_v0  ;;  %v204_v13 = vmul.f32 %v586_v2, %v456_v36  ;;  %v597_v48 = vrot.slane %v22_v56, %v378_v14  ;;  %v600_v53 = vrot.slane %v474_v42, %v229_v50 }
  0x19   :  { %v128_v7 = vadd.f32 %v120_v38, %v96_v3  ;;  %v152_v60 = vsub.f32 %v140_v27, %v150_v12  ;;  %v602_v54 = vrot.slane %v22_v56, %v229_v50  ;;  %v184_v44 = vsub.f32 %v172_v43, %v182_v39 }
  0x1a   :  { %291 = vst [vmem:[%s699_s4] sm:$0xff] %v287_v47  ;;  %v214_v61 = vmul.f32 %v597_v48, %v461_v37  ;;  %v610_v28 = vrot.slane %v474_v42, %v261_v55  ;;  %v612_v14 = vrot.slane %v22_v56, %v261_v55  ;;  %v236_v27 = vmul.f32 %v600_v53, %v491_v51 }
  0x1b   :  { %v160_v0 = vadd.f32 %v152_v60, %v128_v7  ;;  %v246_v50 = vmul.f32 %v602_v54, %v496_v52  ;;  %v61_v3 = vmul.f32 %v397_v18, %v367_v10  ;;  %v63_v55 = vmul.f32 %v401_v19, %v346_v4 }
  0x1c   :  { %704 = vst [vmem:[#allocation3_spill] sm:$0xff] %v612_v14  ;;  %v216_v38 = vsub.f32 %v204_v13, %v214_v61  ;;  %v268_v12 = vmul.f32 %v610_v28, %v512_v58  ;;  %v278_v42 = vmul.f32 %v612_v14, %v517_v59  ;;  %v89_v43 = vmul.f32 %v405_v20, %v372_v11 }
  0x1d   :  { %v192_v56 = vadd.f32 %v184_v44, %v160_v0  ;;  %v248_v60 = vsub.f32 %v236_v27, %v246_v50  ;;  %v91_v47 = vmul.f32 %v409_v21, %v351_v5  ;;  %v65_v18 = vadd.f32 %v63_v55, %v61_v3 }
  0x1e   :  { %v280_v39 = vsub.f32 %v268_v12, %v278_v42  ;;  %v121_v13 = vmul.f32 %v413_v22, %v388_v16  ;;  %v123_v7 = vmul.f32 %v417_v23, %v362_v9  ;;  %v153_v19 = vmul.f32 %v421_v24, %v393_v17 }
  0x1f   :  { %v224_v61 = vadd.f32 %v216_v38, %v192_v56  ;;  %v93_v14 = vadd.f32 %v91_v47, %v89_v43  ;;  %v155_v44 = vmul.f32 %v425_v25, %v383_v15  ;;  %v185_v21 = vmul.f32 %v465_v40, %v443_v31 }
  0x20   :  { %v125_v20 = vadd.f32 %v123_v7, %v121_v13  ;;  %v187_v0 = vmul.f32 %v469_v41, %v438_v30  ;;  %v217_v22 = vmul.f32 %v478_v45, %v461_v37  ;;  %v219_v3 = vmul.f32 %v482_v46, %v456_v36 }
  0x21   :  { %v256_v27 = vadd.f32 %v248_v60, %v224_v61  ;;  %v97_v23 = vadd.f32 %v93_v14, %v65_v18  ;;  %v157_v50 = vadd.f32 %v155_v44, %v153_v19  ;;  %v249_v25 = vmul.f32 %v520_v62, %v496_v52 }
  0x22   :  { %v189_v24 = vadd.f32 %v187_v0, %v185_v21  ;;  %v251_v38 = vmul.f32 %v523_v63, %v491_v51  ;;  %v221_v42 = vadd.f32 %v219_v3, %v217_v22  ;;  %v281_v41 = vmul.f32 %v526_v1, %v517_v59 }
  0x23   :  { %v288_v40 = vadd.f32 %v280_v39, %v256_v27  ;;  %v129_v12 = vadd.f32 %v125_v20, %v97_v23  ;;  %v283_v45 = vmul.f32 %v529_v26, %v512_v58  ;;  %v62_v14 = vmul.f32 %v507_v57, %v367_v10 }
  0x24   :  { %v64_v46 = vmul.f32 %v538_v33, %v346_v4  ;;  %v90_v62 = vmul.f32 %v546_v34, %v372_v11  ;;  %v253_v55 = vadd.f32 %v251_v38, %v249_v25  ;;  %v92_v1 = vmul.f32 %v549_v35, %v351_v5  ;;  %v705_v4 = vld [vmem:[#allocation2_spill] sm:$0xff] }
  0x25   :  { %292 = vst [vmem:[%s699_s4 + $0x8] sm:$0xff] %v288_v40  ;;  %v161_v63 = vadd.f32 %v157_v50, %v129_v12  ;;  %v122_v26 = vmul.f32 %v555_v6, %v388_v16  ;;  %v124_v10 = vmul.f32 %v562_v49, %v362_v9  ;;  %v154_v57 = vmul.f32 %v705_v4, %v393_v17 }
  0x26   :  { %v66_v56 = vadd.f32 %v64_v46, %v62_v14  ;;  %v156_v11 = vmul.f32 %v573_v29, %v383_v15  ;;  %v94_v34 = vadd.f32 %v92_v1, %v90_v62  ;;  %v186_v60 = vmul.f32 %v577_v8, %v443_v31 }
  0x27   :  { %v193_v33 = vadd.f32 %v189_v24, %v161_v63  ;;  %v188_v5 = vmul.f32 %v582_v32, %v438_v30  ;;  %v126_v35 = vadd.f32 %v124_v10, %v122_v26  ;;  %v218_v16 = vmul.f32 %v586_v2, %v461_v37 }
  0x28   :  { %v220_v9 = vmul.f32 %v597_v48, %v456_v36  ;;  %v285_v17 = vadd.f32 %v283_v45, %v281_v41  ;;  %v98_v49 = vadd.f32 %v94_v34, %v66_v56  ;;  %v158_v43 = vadd.f32 %v156_v11, %v154_v57  ;;  %v706_v36 = vld [vmem:[#allocation3_spill] sm:$0xff] }
  0x29   :  { %v225_v6 = vadd.f32 %v221_v42, %v193_v33  ;;  %v190_v15 = vadd.f32 %v188_v5, %v186_v60  ;;  %v250_v31 = vmul.f32 %v600_v53, %v496_v52  ;;  %v252_v30 = vmul.f32 %v602_v54, %v491_v51 }
  0x2a   :  { %v130_v47 = vadd.f32 %v126_v35, %v98_v49  ;;  %v222_v8 = vadd.f32 %v220_v9, %v218_v16  ;;  %v282_v37 = vmul.f32 %v610_v28, %v517_v59  ;;  %v284_v2 = vmul.f32 %v706_v36, %v512_v58 }
  0x2b   :  { %v257_v29 = vadd.f32 %v253_v55, %v225_v6  ;;  %v254_v18 = vadd.f32 %v252_v30, %v250_v31 }
  0x2c   :  { %v162_v39 = vadd.f32 %v158_v43, %v130_v47  ;;  %v286_v52 = vadd.f32 %v284_v2, %v282_v37 }
  0x2d   :  { %v289_v32 = vadd.f32 %v285_v17, %v257_v29 }
  0x2e   :  { %v194_v48 = vadd.f32 %v190_v15, %v162_v39 }
  0x2f   :  { %293 = vst [vmem:[%s700_s5] sm:$0xff] %v289_v32 }
  0x30   :  { %v226_v13 = vadd.f32 %v222_v8, %v194_v48 }
  0x32   :  { %v258_v53 = vadd.f32 %v254_v18, %v226_v13 }
  0x34   :  { %v290_v7 = vadd.f32 %v286_v52, %v258_v53 }
  0x36   :  { %294 = vst [vmem:[%s700_s5 + $0x8] sm:$0xff] %v290_v7 }

// kernel: reverse.89
= control target key start
LH: loop header
LB: loop body
LE: loop exit
PB: predicated region body
PF: predicated region fallthrough
CT: control target
= control target key end

     0   :  { %v104_v3 = vlaneseq  ;;  %v97_v18 = vld [vmem:[#allocation0 + $0x7] ss:$-1 sm:$0xff]  ;;  %v111_v19 = vld [vmem:[#allocation0 + $0x17] ss:$-1 sm:$0xff]  ;;  %s606_s0 = inlined_call_operand.vmem [shape: f32[2,8,16,7], index: 0, kind: input, shape index: {}]   ;;  %s607_s1 = inlined_call_operand.vmem [shape: f32[2,8,16,7], index: 1, kind: output, shape index: {}]  }
   0x1   :  { %v61_v0 = vld [vmem:[%s606_s0] sm:$0xff]  ;;  %v63_v1 = vld [vmem:[%s606_s0 + $0x8] sm:$0xff]  ;;  %v65_v2 = vld [vmem:[%s606_s0 + $0x10] sm:$0xff]  ;;  %v98_v20 = vrot.slane %v97_v18, 1  ;;  %v112_v21 = vrot.slane %v111_v19, 1 }
   0x2   :  { %62 = vst [vmem:[#allocation0 + $0x8] sm:$0xff] %v61_v0  ;;  %64 = vst [vmem:[#allocation0 + $0x18] sm:$0xff] %v63_v1  ;;  %v67_v4 = vld [vmem:[%s606_s0 + $0x18] sm:$0xff]  ;;  %v69_v5 = vld [vmem:[%s606_s0 + $0x20] sm:$0xff]  ;;  %v502_v10 = vshrl.u32 %v104_v3, 7 }
   0x3   :  { %66 = vst [vmem:[#allocation0 + $0x28] sm:$0xff] %v65_v2  ;;  %v71_v6 = vld [vmem:[%s606_s0 + $0x28] sm:$0xff]  ;;  %68 = vst [vmem:[#allocation0 + $0x38] sm:$0xff] %v67_v4  ;;  %v73_v7 = vld [vmem:[%s606_s0 + $0x30] sm:$0xff] }
   0x4   :  { %70 = vst [vmem:[#allocation0 + $0x48] sm:$0xff] %v69_v5  ;;  %72 = vst [vmem:[#allocation0 + $0x58] sm:$0xff] %v71_v6  ;;  %v75_v8 = vld [vmem:[%s606_s0 + $0x38] sm:$0xff]  ;;  %v77_v9 = vld [vmem:[%s606_s0 + $0x40] sm:$0xff]  ;;  %vm106_vm0 = vcmp.lt.s32.totalorder %v502_v10, 7 }
   0x5   :  { %74 = vst [vmem:[#allocation0 + $0x68] sm:$0xff] %v73_v7  ;;  %76 = vst [vmem:[#allocation0 + $0x78] sm:$0xff] %v75_v8  ;;  %v79_v11 = vld [vmem:[%s606_s0 + $0x48] sm:$0xff]  ;;  %v81_v12 = vld [vmem:[%s606_s0 + $0x50] sm:$0xff] }
   0x6   :  { %78 = vst [vmem:[#allocation0 + $0x88] sm:$0xff] %v77_v9  ;;  %v83_v13 = vld [vmem:[%s606_s0 + $0x58] sm:$0xff]  ;;  %80 = vst [vmem:[#allocation0 + $0x98] sm:$0xff] %v79_v11  ;;  %v85_v14 = vld [vmem:[%s606_s0 + $0x60] sm:$0xff] }
   0x7   :  { %82 = vst [vmem:[#allocation0 + $0xa8] sm:$0xff] %v81_v12  ;;  %84 = vst [vmem:[#allocation0 + $0xb8] sm:$0xff] %v83_v13  ;;  %v87_v15 = vld [vmem:[%s606_s0 + $0x68] sm:$0xff]  ;;  %v89_v16 = vld [vmem:[%s606_s0 + $0x70] sm:$0xff] }
   0x8   :  { %86 = vst [vmem:[#allocation0 + $0xc8] sm:$0xff] %v85_v14  ;;  %88 = vst [vmem:[#allocation0 + $0xd8] sm:$0xff] %v87_v15  ;;  %v91_v17 = vld [vmem:[%s606_s0 + $0x78] sm:$0xff]  ;;  %v125_v22 = vld [vmem:[#allocation0 + $0x27] ss:$-1 sm:$0xff] }
   0x9   :  { %90 = vst [vmem:[#allocation0 + $0xe8] sm:$0xff] %v89_v16  ;;  %92 = vst [vmem:[#allocation0 + $0xf8] sm:$0xff] %v91_v17  ;;  %v139_v23 = vld [vmem:[#allocation0 + $0x37] ss:$-1 sm:$0xff]  ;;  %v126_v24 = vrot.slane %v125_v22, 1 }
   0xa   :  { %v140_v25 = vrot.slane %v139_v23, 1  ;;  %v153_v26 = vld [vmem:[#allocation0 + $0x47] ss:$-1 sm:$0xff]  ;;  %v167_v27 = vld [vmem:[#allocation0 + $0x57] ss:$-1 sm:$0xff]  ;;  %99 = vst [vmem:[#allocation1] sm:$0xff] %v98_v20 }
   0xb   :  { %v102_v28 = vld [vmem:[#allocation0 + $0xf] ss:$-1 sm:$0xff]  ;;  %113 = vst [vmem:[#allocation1 + $0x8] sm:$0xff] %v112_v21  ;;  %v116_v29 = vld [vmem:[#allocation0 + $0x1f] ss:$-1 sm:$0xff]  ;;  %127 = vst [vmem:[#allocation1 + $0x10] sm:$0xff] %v126_v24 }
   0xc   :  { %v130_v30 = vld [vmem:[#allocation0 + $0x2f] ss:$-1 sm:$0xff]  ;;  %v103_v31 = vrot.slane %v102_v28, 1  ;;  %v117_v32 = vrot.slane %v116_v29, 1  ;;  %141 = vst [vmem:[#allocation1 + $0x18] sm:$0xff] %v140_v25  ;;  %v154_v35 = vrot.slane %v153_v26, 1 }
   0xd   :  { %v131_v33 = vrot.slane %v130_v30, 1  ;;  %v144_v34 = vld [vmem:[#allocation0 + $0x3f] ss:$-1 sm:$0xff]  ;;  %v158_v37 = vld [vmem:[#allocation0 + $0x4f] ss:$-1 sm:$0xff]  ;;  %v168_v38 = vrot.slane %v167_v27, 1 }
   0xe   :  { %v145_v36 = vrot.slane %v144_v34, 1  ;;  %v172_v39 = vld [vmem:[#allocation0 + $0x5f] ss:$-1 sm:$0xff]  ;;  %107 = vst.msk [vmem:[#allocation1] sm:$0xff] %vm106_vm0, %v103_v31  ;;  %121 = vst.msk [vmem:[#allocation1 + $0x8] sm:$0xff] %vm106_vm0, %v117_v32  ;;  %v159_v40 = vrot.slane %v158_v37, 1 }
   0xf   :  { %135 = vst.msk [vmem:[#allocation1 + $0x10] sm:$0xff] %vm106_vm0, %v131_v33  ;;  %155 = vst [vmem:[#allocation1 + $0x20] sm:$0xff] %v154_v35  ;;  %v173_v41 = vrot.slane %v172_v39, 1  ;;  %v181_v42 = vld [vmem:[#allocation0 + $0x67] ss:$-1 sm:$0xff] }
  0x10   :  { %v186_v43 = vld [vmem:[#allocation0 + $0x6f] ss:$-1 sm:$0xff]  ;;  %149 = vst.msk [vmem:[#allocation1 + $0x18] sm:$0xff] %vm106_vm0, %v145_v36  ;;  %169 = vst [vmem:[#allocation1 + $0x28] sm:$0xff] %v168_v38  ;;  %v182_v44 = vrot.slane %v181_v42, 1 }
  0x11   :  { %v187_v45 = vrot.slane %v186_v43, 1  ;;  %v195_v46 = vld [vmem:[#allocation0 + $0x77] ss:$-1 sm:$0xff]  ;;  %v200_v47 = vld [vmem:[#allocation0 + $0x7f] ss:$-1 sm:$0xff]  ;;  %163 = vst.msk [vmem:[#allocation1 + $0x20] sm:$0xff] %vm106_vm0, %v159_v40 }
  0x12   :  { %177 = vst.msk [vmem:[#allocation1 + $0x28] sm:$0xff] %vm106_vm0, %v173_v41  ;;  %v196_v48 = vrot.slane %v195_v46, 1  ;;  %v201_v49 = vrot.slane %v200_v47, 1  ;;  %v209_v50 = vld [vmem:[#allocation0 + $0x87] ss:$-1 sm:$0xff]  ;;  %183 = vst [vmem:[#allocation1 + $0x30] sm:$0xff] %v182_v44 }
  0x13   :  { %v214_v51 = vld [vmem:[#allocation0 + $0x8f] ss:$-1 sm:$0xff]  ;;  %v210_v52 = vrot.slane %v209_v50, 1  ;;  %v223_v54 = vld [vmem:[#allocation0 + $0x97] ss:$-1 sm:$0xff]  ;;  %191 = vst.msk [vmem:[#allocation1 + $0x30] sm:$0xff] %vm106_vm0, %v187_v45 }
  0x14   :  { %v215_v53 = vrot.slane %v214_v51, 1  ;;  %v228_v55 = vld [vmem:[#allocation0 + $0x9f] ss:$-1 sm:$0xff]  ;;  %197 = vst [vmem:[#allocation1 + $0x38] sm:$0xff] %v196_v48  ;;  %v224_v56 = vrot.slane %v223_v54, 1 }
  0x15   :  { %v229_v57 = vrot.slane %v228_v55, 1  ;;  %v237_v58 = vld [vmem:[#allocation0 + $0xa7] ss:$-1 sm:$0xff]  ;;  %v242_v59 = vld [vmem:[#allocation0 + $0xaf] ss:$-1 sm:$0xff]  ;;  %205 = vst.msk [vmem:[#allocation1 + $0x38] sm:$0xff] %vm106_vm0, %v201_v49 }
  0x16   :  { %211 = vst [vmem:[#allocation1 + $0x40] sm:$0xff] %v210_v52  ;;  %v238_v60 = vrot.slane %v237_v58, 1  ;;  %v243_v61 = vrot.slane %v242_v59, 1  ;;  %v251_v62 = vld [vmem:[#allocation0 + $0xb7] ss:$-1 sm:$0xff]  ;;  %225 = vst [vmem:[#allocation1 + $0x48] sm:$0xff] %v224_v56 }
  0x17   :  { %v256_v63 = vld [vmem:[#allocation0 + $0xbf] ss:$-1 sm:$0xff]  ;;  %219 = vst.msk [vmem:[#allocation1 + $0x40] sm:$0xff] %vm106_vm0, %v215_v53  ;;  %v252_v0 = vrot.slane %v251_v62, 1  ;;  %v265_v2 = vld [vmem:[#allocation0 + $0xc7] ss:$-1 sm:$0xff] }
  0x18   :  { %v257_v1 = vrot.slane %v256_v63, 1  ;;  %v270_v3 = vld [vmem:[#allocation0 + $0xcf] ss:$-1 sm:$0xff]  ;;  %233 = vst.msk [vmem:[#allocation1 + $0x48] sm:$0xff] %vm106_vm0, %v229_v57  ;;  %239 = vst [vmem:[#allocation1 + $0x50] sm:$0xff] %v238_v60  ;;  %v266_v4 = vrot.slane %v265_v2, 1 }
  0x19   :  { %v271_v5 = vrot.slane %v270_v3, 1  ;;  %v279_v6 = vld [vmem:[#allocation0 + $0xd7] ss:$-1 sm:$0xff]  ;;  %v284_v7 = vld [vmem:[#allocation0 + $0xdf] ss:$-1 sm:$0xff]  ;;  %247 = vst.msk [vmem:[#allocation1 + $0x50] sm:$0xff] %vm106_vm0, %v243_v61 }
  0x1a   :  { %253 = vst [vmem:[#allocation1 + $0x58] sm:$0xff] %v252_v0  ;;  %v280_v8 = vrot.slane %v279_v6, 1  ;;  %v285_v9 = vrot.slane %v284_v7, 1  ;;  %v293_v11 = vld [vmem:[#allocation0 + $0xe7] ss:$-1 sm:$0xff]  ;;  %267 = vst [vmem:[#allocation1 + $0x60] sm:$0xff] %v266_v4 }
  0x1b   :  { %v298_v12 = vld [vmem:[#allocation0 + $0xef] ss:$-1 sm:$0xff]  ;;  %261 = vst.msk [vmem:[#allocation1 + $0x58] sm:$0xff] %vm106_vm0, %v257_v1  ;;  %v294_v13 = vrot.slane %v293_v11, 1  ;;  %v307_v15 = vld [vmem:[#allocation0 + $0xf7] ss:$-1 sm:$0xff] }
  0x1c   :  { %v299_v14 = vrot.slane %v298_v12, 1  ;;  %v312_v16 = vld [vmem:[#allocation0 + $0xff] ss:$-1 sm:$0xff]  ;;  %275 = vst.msk [vmem:[#allocation1 + $0x60] sm:$0xff] %vm106_vm0, %v271_v5  ;;  %281 = vst [vmem:[#allocation1 + $0x68] sm:$0xff] %v280_v8  ;;  %v308_v17 = vrot.slane %v307_v15, 1 }
  0x1d   :  { %v313_v18 = vrot.slane %v312_v16, 1  ;;  %v376_v19 = vld [vmem:[#allocation1] sm:$0xff]  ;;  %v378_v20 = vld [vmem:[#allocation1 + $0x8] sm:$0xff]  ;;  %v380_v21 = vld [vmem:[#allocation1 + $0x10] sm:$0xff]  ;;  %289 = vst.msk [vmem:[#allocation1 + $0x68] sm:$0xff] %vm106_vm0, %v285_v9 }
  0x1e   :  { %295 = vst [vmem:[#allocation1 + $0x70] sm:$0xff] %v294_v13  ;;  %377 = vst [vmem:[%s607_s1] sm:$0xff] %v376_v19  ;;  %v382_v22 = vld [vmem:[#allocation1 + $0x18] sm:$0xff]  ;;  %v384_v23 = vld [vmem:[#allocation1 + $0x20] sm:$0xff] }
  0x1f   :  { %379 = vst [vmem:[%s607_s1 + $0x8] sm:$0xff] %v378_v20  ;;  %381 = vst [vmem:[%s607_s1 + $0x10] sm:$0xff] %v380_v21  ;;  %v386_v24 = vld [vmem:[#allocation1 + $0x28] sm:$0xff]  ;;  %v388_v25 = vld [vmem:[#allocation1 + $0x30] sm:$0xff] }
  0x20   :  { %303 = vst.msk [vmem:[#allocation1 + $0x70] sm:$0xff] %vm106_vm0, %v299_v14  ;;  %309 = vst [vmem:[#allocation1 + $0x78] sm:$0xff] %v308_v17  ;;  %v390_v26 = vld [vmem:[#allocation1 + $0x38] sm:$0xff]  ;;  %v392_v10 = vld [vmem:[#allocation1 + $0x40] sm:$0xff] }
  0x21   :  { %383 = vst [vmem:[%s607_s1 + $0x18] sm:$0xff] %v382_v22  ;;  %385 = vst [vmem:[%s607_s1 + $0x20] sm:$0xff] %v384_v23  ;;  %v394_v27 = vld [vmem:[#allocation1 + $0x48] sm:$0xff]  ;;  %v396_v28 = vld [vmem:[#allocation1 + $0x50] sm:$0xff] }
  0x22   :  { %387 = vst [vmem:[%s607_s1 + $0x28] sm:$0xff] %v386_v24  ;;  %317 = vst.msk [vmem:[#allocation1 + $0x78] sm:$0xff] %vm106_vm0, %v313_v18  ;;  %v398_v29 = vld [vmem:[#allocation1 + $0x58] sm:$0xff] }
  0x23   :  { %389 = vst [vmem:[%s607_s1 + $0x30] sm:$0xff] %v388_v25  ;;  %391 = vst [vmem:[%s607_s1 + $0x38] sm:$0xff] %v390_v26  ;;  %v400_v30 = vld [vmem:[#allocation1 + $0x60] sm:$0xff] }
  0x24   :  { %393 = vst [vmem:[%s607_s1 + $0x40] sm:$0xff] %v392_v10  ;;  %395 = vst [vmem:[%s607_s1 + $0x48] sm:$0xff] %v394_v27  ;;  %v402_v31 = vld [vmem:[#allocation1 + $0x68] sm:$0xff] }
  0x25   :  { %397 = vst [vmem:[%s607_s1 + $0x50] sm:$0xff] %v396_v28  ;;  %399 = vst [vmem:[%s607_s1 + $0x58] sm:$0xff] %v398_v29 }
  0x26   :  { %401 = vst [vmem:[%s607_s1 + $0x60] sm:$0xff] %v400_v30  ;;  %403 = vst [vmem:[%s607_s1 + $0x68] sm:$0xff] %v402_v31 }
  0x27   :  { %v404_v32 = vld [vmem:[#allocation1 + $0x70] sm:$0xff] }
  0x28   :  { %405 = vst [vmem:[%s607_s1 + $0x70] sm:$0xff] %v404_v32 }
  0x29   :  { %v406_v33 = vld [vmem:[#allocation1 + $0x78] sm:$0xff] }
  0x2a   :  { %407 = vst [vmem:[%s607_s1 + $0x78] sm:$0xff] %v406_v33 }

// kernel: fnounet_forward.94
= control target key start
LH: loop header
LB: loop body
LE: loop exit
PB: predicated region body
PF: predicated region fallthrough
CT: control target
= control target key end

     0   :  { %s650_s15 = smov 0   ;;  %s652_s16 = smov 0   ;;  %s701_s0 = inlined_call_operand.vmem [shape: f32[2,8,256], index: 0, kind: input, shape index: {}]   ;;  %s702_s1 = inlined_call_operand.vmem [shape: f32[8,8], index: 1, kind: input, shape index: {}]   ;;  %s703_s2 = inlined_call_operand.vmem [shape: f32[8,1], index: 2, kind: input, shape index: {}]   ;;  %s704_s3 = inlined_call_operand.vmem [shape: f32[2,8,256], index: 3, kind: input, shape index: {}]   ;;  %s705_s4 = inlined_call_operand.vmem [shape: f32[2,8,256], index: 4, kind: output, shape index: {}]  }
   0x1   :  { %s654_s17 = smov 0  }
   0x2 LB: > { %s26_s18 = sadd.s32 1, %s611_s16  ;;  %p536_p0 = scmp.ge.s32.totalorder %s615_s17, 1  ;;  %s615_s17 = sphi %s654_s17, %s14_s17   ;;  %s611_s16 = sphi %s652_s16, %s707_s16   ;;  %s607_s15 = sphi %s650_s15, %s706_s15  }
   0x3   : > { %p28_p1 = scmp.ge.s32.totalorder %s26_s18, 2  ;;  %p200_p2 = scmp.lt.s32.totalorder %s615_s17, 3 }
   0x5   : > { %s709_s18 = smov (%p28_p1, %s26_s18), 0  ;;  %p201_p3 = pnand %p536_p0, %p200_p2 }
   0x6   : > { %p244_p4 = scmp.lt.s32.totalorder (!%p201_p3), %s607_s15, 1 }
   0x7   : > { %204 = sbr.rel (%p201_p3) target bundleno = 188 (0xbc), region = 36 }
   0xc   : > { %v275_v0 = vld [vmem:[%s702_s1] sm:$0xff]  ;;  %v617_v1 = vmov 2   ;;  %v618_v2 = vmov 0   ;;  %v619_v3 = vmov 3   ;;  %v620_v4 = vmov 1   ;;  %s711_s15 = smov (!%p244_p4, %s607_s15), 1 }
   0xd   : > { %582 = vset.pattern.permute.xlu1 %v617_v1  ;;  %580 = vset.pattern.permute.xlu0 %v618_v2  ;;  %v621_v5 = vmov 4   ;;  %v622_v6 = vmov 5   ;;  %v403_v7 = vld [vmem:[%s703_s2] sm:$0xff]  ;;  %v623_v8 = vmov 6   ;;  %v624_v9 = vmov 7   ;;  %s678_s23 = sshll.u32 %s711_s15, 4 }
   0xe   : > { %308 = vperm.xlu1 %582, %v275_v0   ;;  %278 = vperm.xlu0 %580, %v275_v0   ;;  %v281_v10 = vlaneseq  ;;  %s251_s26 = scalar_lea.vmem %s701_s0, %s678_s23  ;;  %s261_s29 = scalar_lea.vmem %s704_s3, %s678_s23 }
   0xf   : > { %v273_v17 = vld [vmem:[%s251_s26] sm:$0xff]  ;;  %v274_v18 = vld [vmem:[%s251_s26 + $0x8] sm:$0xff]  ;;  %s271_s6 = scalar_lea.vmem %s705_s4, %s678_s23 }
  0x10   : > { %v282_v11 = vshrl.u32 %v281_v10, 7 }
  0x12   : > { %583 = vset.pattern.permute.xlu1 %v619_v3  ;;  %581 = vset.pattern.permute.xlu0 %v620_v4  ;;  %v283_v12 = vsub.s32 0, %v282_v11  ;;  %v297_v13 = vsub.s32 1, %v282_v11  ;;  %v313_v14 = vsub.s32 2, %v282_v11  ;;  %v329_v19 = vsub.s32 3, %v282_v11 }
  0x13   : > { %324 = vperm.xlu1 %583, %v275_v0   ;;  %292 = vperm.xlu0 %581, %v275_v0   ;;  %v345_v24 = vsub.s32 4, %v282_v11  ;;  %v361_v31 = vsub.s32 5, %v282_v11  ;;  %v377_v44 = vsub.s32 6, %v282_v11  ;;  %v393_v55 = vsub.s32 7, %v282_v11 }
  0x14   : > { %v284_v20 = vrot.slane %v273_v17, %v283_v12  ;;  %v288_v21 = vrot.slane %v274_v18, %v283_v12  ;;  %v298_v22 = vrot.slane %v273_v17, %v297_v13  ;;  %v302_v23 = vrot.slane %v274_v18, %v297_v13  ;;  %v411_v13 = vld [vmem:[%s261_s29] sm:$0xff] }
  0x15   : > { %v314_v25 = vrot.slane %v273_v17, %v313_v14  ;;  %v318_v26 = vrot.slane %v274_v18, %v313_v14  ;;  %v330_v28 = vrot.slane %v273_v17, %v329_v19  ;;  %v334_v29 = vrot.slane %v274_v18, %v329_v19  ;;  %v412_v14 = vld [vmem:[%s261_s29 + $0x8] sm:$0xff] }
  0x16   : > { %v346_v36 = vrot.slane %v273_v17, %v345_v24  ;;  %v350_v37 = vrot.slane %v274_v18, %v345_v24  ;;  %v362_v42 = vrot.slane %v273_v17, %v361_v31  ;;  %v366_v43 = vrot.slane %v274_v18, %v361_v31 }
  0x17   : > { %584 = vset.pattern.permute.xlu1 %v621_v5  ;;  %585 = vset.pattern.permute.xlu0 %v622_v6  ;;  %v378_v58 = vrot.slane %v273_v17, %v377_v44  ;;  %v382_v59 = vrot.slane %v274_v18, %v377_v44  ;;  %v394_v63 = vrot.slane %v273_v17, %v393_v55 }
  0x18   : > { %340 = vperm.xlu1 %584, %v275_v0   ;;  %356 = vperm.xlu0 %585, %v275_v0  }
  0x1c   : > { %586 = vset.pattern.permute.xlu1 %v623_v8  ;;  %588 = vset.pattern.permute.xlu0 %v618_v2 }
  0x1d   : > { %372 = vperm.xlu1 %586, %v275_v0   ;;  %406 = vperm.xlu0 %588, %v403_v7  }
  0x21   : > { %587 = vset.pattern.permute.xlu1 %v624_v9 }
  0x22   : > { %388 = vperm.xlu1 %587, %v275_v0   ;;  %v398_v0 = vrot.slane %v274_v18, %v393_v55 }
  0x89   : > { %v309_v15 = vpop.permute.xlu1 %308  ;;  %v279_v16 = vpop.permute.xlu0 %278 }
  0x8a   : > { %v289_v32 = vmul.f32 %v284_v20, %v279_v16  ;;  %v290_v33 = vmul.f32 %v288_v21, %v279_v16  ;;  %v319_v38 = vmul.f32 %v314_v25, %v309_v15  ;;  %v320_v39 = vmul.f32 %v318_v26, %v309_v15 }
  0x8e   : > { %v325_v27 = vpop.permute.xlu1 %324  ;;  %v293_v30 = vpop.permute.xlu0 %292 }
  0x8f   : > { %v303_v34 = vmul.f32 %v298_v22, %v293_v30  ;;  %v304_v35 = vmul.f32 %v302_v23, %v293_v30  ;;  %v335_v45 = vmul.f32 %v330_v28, %v325_v27  ;;  %v336_v46 = vmul.f32 %v334_v29, %v325_v27 }
  0x91   : > { %v305_v40 = vadd.f32 %v303_v34, %v289_v32  ;;  %v306_v41 = vadd.f32 %v304_v35, %v290_v33 }
  0x93   : > { %v321_v47 = vadd.f32 %v319_v38, %v305_v40  ;;  %v322_v48 = vadd.f32 %v320_v39, %v306_v41  ;;  %v341_v49 = vpop.permute.xlu1 %340  ;;  %v357_v50 = vpop.permute.xlu0 %356 }
  0x94   : > { %v351_v51 = vmul.f32 %v346_v36, %v341_v49  ;;  %v352_v52 = vmul.f32 %v350_v37, %v341_v49  ;;  %v367_v56 = vmul.f32 %v362_v42, %v357_v50  ;;  %v368_v57 = vmul.f32 %v366_v43, %v357_v50 }
  0x95   : > { %v337_v53 = vadd.f32 %v335_v45, %v321_v47  ;;  %v338_v54 = vadd.f32 %v336_v46, %v322_v48 }
  0x97   : > { %v353_v60 = vadd.f32 %v351_v51, %v337_v53  ;;  %v354_v61 = vadd.f32 %v352_v52, %v338_v54 }
  0x98   : > { %v373_v62 = vpop.permute.xlu1 %372  ;;  %v407_v10 = vpop.permute.xlu0 %406 }
  0x99   : > { %v369_v1 = vadd.f32 %v367_v56, %v353_v60  ;;  %v370_v2 = vadd.f32 %v368_v57, %v354_v61  ;;  %v383_v3 = vmul.f32 %v378_v58, %v373_v62  ;;  %v384_v4 = vmul.f32 %v382_v59, %v373_v62 }
  0x9b   : > { %v385_v6 = vadd.f32 %v383_v3, %v369_v1  ;;  %v386_v7 = vadd.f32 %v384_v4, %v370_v2 }
  0x9d   : > { %v389_v5 = vpop.permute.xlu1 %388 }
  0x9e   : > { %v399_v8 = vmul.f32 %v394_v63, %v389_v5  ;;  %v400_v9 = vmul.f32 %v398_v0, %v389_v5 }
  0xa0   : > { %v401_v11 = vadd.f32 %v399_v8, %v385_v6  ;;  %v402_v12 = vadd.f32 %v400_v9, %v386_v7 }
  0xa2   : > { %v409_v15 = vadd.f32 %v407_v10, %v401_v11  ;;  %v410_v16 = vadd.f32 %v407_v10, %v402_v12 }
  0xa4   : > { %v413_v17 = vadd.f32 %v411_v13, %v409_v15  ;;  %v414_v18 = vadd.f32 %v412_v14, %v410_v16 }
  0xa6   : > { %v417_v19 = vmul.f32 0.70710677, %v413_v17  ;;  %v418_v20 = vmul.f32 0.70710677, %v414_v18  ;;  %v415_v23 = vmul.f32 0.5, %v413_v17  ;;  %v416_v25 = vmul.f32 0.5, %v414_v18 }
  0xa8   : > { %589 = verf.f32 %v417_v19 }
  0xa9   : > { %591 = verf.f32 %v418_v20 }
  0xb5   : > { %v590_v21 = vpop.eup %589 }
  0xb6   : > { %v592_v22 = vpop.eup %591  ;;  %v421_v24 = vadd.f32 1.0, %v590_v21 }
  0xb7   : > { %v422_v26 = vadd.f32 1.0, %v592_v22 }
  0xb8   : > { %v423_v27 = vmul.f32 %v421_v24, %v415_v23 }
  0xb9   : > { %v424_v28 = vmul.f32 %v422_v26, %v416_v25 }
  0xba   : > { %425 = vst [vmem:[%s271_s6] sm:$0xff] %v423_v27 }
  0xbb   : > { %426 = vst [vmem:[%s271_s6 + $0x8] sm:$0xff] %v424_v28 }
  0xbc PF: > { %s14_s17 = sadd.s32 1, %s615_s17   ;;  %s706_s15 = smov %s611_s16 }
  0xbd   : > { %p11_p5 = scmp.ge.s32.totalorder %s14_s17, 4   ;;  %s707_s16 = smov %s709_s18 }
  0xbf   :  { %13 = sbr.rel (!%p11_p5) target bundleno = 2 (0x2), region = 69 }

// kernel: fnounet_forward.100
= control target key start
LH: loop header
LB: loop body
LE: loop exit
PB: predicated region body
PF: predicated region fallthrough
CT: control target
= control target key end

     0   :  { %s636_s15 = smov 0   ;;  %s638_s16 = smov 0   ;;  %s687_s0 = inlined_call_operand.vmem [shape: f32[2,8,256], index: 0, kind: input, shape index: {}]   ;;  %s688_s1 = inlined_call_operand.vmem [shape: f32[8,8], index: 1, kind: input, shape index: {}]   ;;  %s689_s2 = inlined_call_operand.vmem [shape: f32[8,1], index: 2, kind: input, shape index: {}]   ;;  %s690_s3 = inlined_call_operand.vmem [shape: f32[2,8,256], index: 3, kind: input, shape index: {}]   ;;  %s691_s4 = inlined_call_operand.vmem [shape: f32[2,8,256], index: 4, kind: output, shape index: {}]  }
   0x1   :  { %s640_s17 = smov 0  }
   0x2 LB: > { %s26_s18 = sadd.s32 1, %s597_s16  ;;  %p526_p0 = scmp.ge.s32.totalorder %s601_s17, 1  ;;  %s601_s17 = sphi %s640_s17, %s14_s17   ;;  %s597_s16 = sphi %s638_s16, %s693_s16   ;;  %s593_s15 = sphi %s636_s15, %s692_s15  }
   0x3   : > { %p28_p1 = scmp.ge.s32.totalorder %s26_s18, 2  ;;  %p200_p2 = scmp.lt.s32.totalorder %s601_s17, 3 }
   0x5   : > { %s695_s18 = smov (%p28_p1, %s26_s18), 0  ;;  %p201_p3 = pnand %p526_p0, %p200_p2 }
   0x6   : > { %p244_p4 = scmp.lt.s32.totalorder (!%p201_p3), %s593_s15, 1 }
   0x7   : > { %204 = sbr.rel (%p201_p3) target bundleno = 167 (0xa7), region = 36 }
   0xc   : > { %v275_v0 = vld [vmem:[%s688_s1] sm:$0xff]  ;;  %v603_v1 = vmov 2   ;;  %v604_v2 = vmov 0   ;;  %v605_v3 = vmov 3   ;;  %v606_v4 = vmov 1   ;;  %s697_s15 = smov (!%p244_p4, %s593_s15), 1 }
   0xd   : > { %572 = vset.pattern.permute.xlu1 %v603_v1  ;;  %570 = vset.pattern.permute.xlu0 %v604_v2  ;;  %v607_v5 = vmov 4   ;;  %v608_v6 = vmov 5   ;;  %v403_v7 = vld [vmem:[%s689_s2] sm:$0xff]  ;;  %v609_v8 = vmov 6   ;;  %v610_v9 = vmov 7   ;;  %s664_s23 = sshll.u32 %s697_s15, 4 }
   0xe   : > { %308 = vperm.xlu1 %572, %v275_v0   ;;  %278 = vperm.xlu0 %570, %v275_v0   ;;  %v281_v10 = vlaneseq  ;;  %s251_s26 = scalar_lea.vmem %s687_s0, %s664_s23  ;;  %s261_s29 = scalar_lea.vmem %s690_s3, %s664_s23 }
   0xf   : > { %v273_v17 = vld [vmem:[%s251_s26] sm:$0xff]  ;;  %v274_v18 = vld [vmem:[%s251_s26 + $0x8] sm:$0xff]  ;;  %s271_s6 = scalar_lea.vmem %s691_s4, %s664_s23 }
  0x10   : > { %v282_v11 = vshrl.u32 %v281_v10, 7 }
  0x12   : > { %573 = vset.pattern.permute.xlu1 %v605_v3  ;;  %571 = vset.pattern.permute.xlu0 %v606_v4  ;;  %v283_v12 = vsub.s32 0, %v282_v11  ;;  %v297_v13 = vsub.s32 1, %v282_v11  ;;  %v313_v14 = vsub.s32 2, %v282_v11  ;;  %v329_v19 = vsub.s32 3, %v282_v11 }
  0x13   : > { %324 = vperm.xlu1 %573, %v275_v0   ;;  %292 = vperm.xlu0 %571, %v275_v0   ;;  %v345_v24 = vsub.s32 4, %v282_v11  ;;  %v361_v31 = vsub.s32 5, %v282_v11  ;;  %v377_v44 = vsub.s32 6, %v282_v11  ;;  %v393_v55 = vsub.s32 7, %v282_v11 }
  0x14   : > { %v284_v20 = vrot.slane %v273_v17, %v283_v12  ;;  %v288_v21 = vrot.slane %v274_v18, %v283_v12  ;;  %v298_v22 = vrot.slane %v273_v17, %v297_v13  ;;  %v302_v23 = vrot.slane %v274_v18, %v297_v13  ;;  %v411_v13 = vld [vmem:[%s261_s29] sm:$0xff] }
  0x15   : > { %v314_v25 = vrot.slane %v273_v17, %v313_v14  ;;  %v318_v26 = vrot.slane %v274_v18, %v313_v14  ;;  %v330_v28 = vrot.slane %v273_v17, %v329_v19  ;;  %v334_v29 = vrot.slane %v274_v18, %v329_v19  ;;  %v412_v14 = vld [vmem:[%s261_s29 + $0x8] sm:$0xff] }
  0x16   : > { %v346_v36 = vrot.slane %v273_v17, %v345_v24  ;;  %v350_v37 = vrot.slane %v274_v18, %v345_v24  ;;  %v362_v42 = vrot.slane %v273_v17, %v361_v31  ;;  %v366_v43 = vrot.slane %v274_v18, %v361_v31 }
  0x17   : > { %574 = vset.pattern.permute.xlu1 %v607_v5  ;;  %575 = vset.pattern.permute.xlu0 %v608_v6  ;;  %v378_v58 = vrot.slane %v273_v17, %v377_v44  ;;  %v382_v59 = vrot.slane %v274_v18, %v377_v44  ;;  %v394_v63 = vrot.slane %v273_v17, %v393_v55 }
  0x18   : > { %340 = vperm.xlu1 %574, %v275_v0   ;;  %356 = vperm.xlu0 %575, %v275_v0  }
  0x1c   : > { %576 = vset.pattern.permute.xlu1 %v609_v8  ;;  %578 = vset.pattern.permute.xlu0 %v604_v2 }
  0x1d   : > { %372 = vperm.xlu1 %576, %v275_v0   ;;  %406 = vperm.xlu0 %578, %v403_v7  }
  0x21   : > { %577 = vset.pattern.permute.xlu1 %v610_v9 }
  0x22   : > { %388 = vperm.xlu1 %577, %v275_v0   ;;  %v398_v0 = vrot.slane %v274_v18, %v393_v55 }
  0x89   : > { %v309_v15 = vpop.permute.xlu1 %308  ;;  %v279_v16 = vpop.permute.xlu0 %278 }
  0x8a   : > { %v289_v32 = vmul.f32 %v284_v20, %v279_v16  ;;  %v290_v33 = vmul.f32 %v288_v21, %v279_v16  ;;  %v319_v38 = vmul.f32 %v314_v25, %v309_v15  ;;  %v320_v39 = vmul.f32 %v318_v26, %v309_v15 }
  0x8e   : > { %v325_v27 = vpop.permute.xlu1 %324  ;;  %v293_v30 = vpop.permute.xlu0 %292 }
  0x8f   : > { %v303_v34 = vmul.f32 %v298_v22, %v293_v30  ;;  %v304_v35 = vmul.f32 %v302_v23, %v293_v30  ;;  %v335_v45 = vmul.f32 %v330_v28, %v325_v27  ;;  %v336_v46 = vmul.f32 %v334_v29, %v325_v27 }
  0x91   : > { %v305_v40 = vadd.f32 %v303_v34, %v289_v32  ;;  %v306_v41 = vadd.f32 %v304_v35, %v290_v33 }
  0x93   : > { %v321_v47 = vadd.f32 %v319_v38, %v305_v40  ;;  %v322_v48 = vadd.f32 %v320_v39, %v306_v41  ;;  %v341_v49 = vpop.permute.xlu1 %340  ;;  %v357_v50 = vpop.permute.xlu0 %356 }
  0x94   : > { %v351_v51 = vmul.f32 %v346_v36, %v341_v49  ;;  %v352_v52 = vmul.f32 %v350_v37, %v341_v49  ;;  %v367_v56 = vmul.f32 %v362_v42, %v357_v50  ;;  %v368_v57 = vmul.f32 %v366_v43, %v357_v50 }
  0x95   : > { %v337_v53 = vadd.f32 %v335_v45, %v321_v47  ;;  %v338_v54 = vadd.f32 %v336_v46, %v322_v48 }
  0x97   : > { %v353_v60 = vadd.f32 %v351_v51, %v337_v53  ;;  %v354_v61 = vadd.f32 %v352_v52, %v338_v54 }
  0x98   : > { %v373_v62 = vpop.permute.xlu1 %372  ;;  %v407_v10 = vpop.permute.xlu0 %406 }
  0x99   : > { %v369_v1 = vadd.f32 %v367_v56, %v353_v60  ;;  %v370_v2 = vadd.f32 %v368_v57, %v354_v61  ;;  %v383_v3 = vmul.f32 %v378_v58, %v373_v62  ;;  %v384_v4 = vmul.f32 %v382_v59, %v373_v62 }
  0x9b   : > { %v385_v6 = vadd.f32 %v383_v3, %v369_v1  ;;  %v386_v7 = vadd.f32 %v384_v4, %v370_v2 }
  0x9d   : > { %v389_v5 = vpop.permute.xlu1 %388 }
  0x9e   : > { %v399_v8 = vmul.f32 %v394_v63, %v389_v5  ;;  %v400_v9 = vmul.f32 %v398_v0, %v389_v5 }
  0xa0   : > { %v401_v11 = vadd.f32 %v399_v8, %v385_v6  ;;  %v402_v12 = vadd.f32 %v400_v9, %v386_v7 }
  0xa2   : > { %v409_v15 = vadd.f32 %v407_v10, %v401_v11  ;;  %v410_v16 = vadd.f32 %v407_v10, %v402_v12 }
  0xa4   : > { %v413_v17 = vadd.f32 %v411_v13, %v409_v15  ;;  %v414_v18 = vadd.f32 %v412_v14, %v410_v16 }
  0xa6   : > { %415 = vst [vmem:[%s271_s6] sm:$0xff] %v413_v17  ;;  %416 = vst [vmem:[%s271_s6 + $0x8] sm:$0xff] %v414_v18 }
  0xa7 PF: > { %s14_s17 = sadd.s32 1, %s601_s17   ;;  %s692_s15 = smov %s597_s16 }
  0xa8   : > { %p11_p5 = scmp.ge.s32.totalorder %s14_s17, 4   ;;  %s693_s16 = smov %s695_s18 }
  0xaa   :  { %13 = sbr.rel (!%p11_p5) target bundleno = 2 (0x2), region = 69 }

// kernel: fnounet_forward.101
= control target key start
LH: loop header
LB: loop body
LE: loop exit
PB: predicated region body
PF: predicated region fallthrough
CT: control target
= control target key end

     0   :  { %s546_s12 = smov 0   ;;  %s548_s13 = smov 0   ;;  %s593_s0 = inlined_call_operand.vmem [shape: f32[2,8,256], index: 0, kind: input, shape index: {}]   ;;  %s594_s1 = inlined_call_operand.vmem [shape: f32[4,8], index: 1, kind: input, shape index: {}]   ;;  %s595_s2 = inlined_call_operand.vmem [shape: f32[4,1], index: 2, kind: input, shape index: {}]   ;;  %s596_s3 = inlined_call_operand.vmem [shape: f32[2,4,256], index: 3, kind: output, shape index: {}]  }
   0x1   :  { %s550_s14 = smov 0  }
   0x2 LB: > { %s25_s15 = sadd.s32 1, %s512_s13  ;;  %p444_p0 = scmp.ge.s32.totalorder %s516_s14, 1  ;;  %s516_s14 = sphi %s550_s14, %s13_s14   ;;  %s512_s13 = sphi %s548_s13, %s598_s13   ;;  %s508_s12 = sphi %s546_s12, %s597_s12  }
   0x3   : > { %p27_p1 = scmp.ge.s32.totalorder %s25_s15, 2  ;;  %p158_p2 = scmp.lt.s32.totalorder %s516_s14, 3 }
   0x5   : > { %s600_s15 = smov (%p27_p1, %s25_s15), 0  ;;  %p159_p3 = pnand %p444_p0, %p158_p2 }
   0x6   : > { %p191_p4 = scmp.lt.s32.totalorder (!%p159_p3), %s508_s12, 1 }
   0x7   : > { %162 = sbr.rel (%p159_p3) target bundleno = 167 (0xa7), region = 32 }
   0xc   : > { %v212_v0 = vld [vmem:[%s594_s1] sm:$0xf]  ;;  %v518_v1 = vmov 2   ;;  %v519_v2 = vmov 0   ;;  %v520_v3 = vmov 3   ;;  %v521_v4 = vmov 1  }
   0xd   : > { %487 = vset.pattern.permute.xlu1 %v518_v1  ;;  %485 = vset.pattern.permute.xlu0 %v519_v2  ;;  %v522_v5 = vmov 4   ;;  %v523_v6 = vmov 5   ;;  %v340_v7 = vld [vmem:[%s595_s2] sm:$0xf]  ;;  %v524_v8 = vmov 6   ;;  %v525_v9 = vmov 7  }
   0xe   : > { %245 = vperm.xlu1 %487, %v212_v0   ;;  %215 = vperm.xlu0 %485, %v212_v0   ;;  %s602_s12 = smov (!%p191_p4, %s508_s12), 1  ;;  %v218_v10 = vlaneseq }
   0xf   : > { %s451_s20 = sshll.u32 %s602_s12, 4  ;;  %s452_s24 = sshll.u32 %s602_s12, 3 }
  0x10   : > { %v219_v11 = vshrl.u32 %v218_v10, 7  ;;  %s198_s23 = scalar_lea.vmem %s593_s0, %s451_s20  ;;  %s208_s27 = scalar_lea.vmem %s596_s3, %s452_s24 }
  0x11   : > { %v210_v17 = vld [vmem:[%s198_s23] sm:$0xff]  ;;  %v211_v18 = vld [vmem:[%s198_s23 + $0x8] sm:$0xff] }
  0x12   : > { %488 = vset.pattern.permute.xlu1 %v520_v3  ;;  %486 = vset.pattern.permute.xlu0 %v521_v4  ;;  %v220_v12 = vsub.s32 0, %v219_v11  ;;  %v234_v13 = vsub.s32 1, %v219_v11  ;;  %v250_v14 = vsub.s32 2, %v219_v11  ;;  %v266_v19 = vsub.s32 3, %v219_v11 }
  0x13   : > { %261 = vperm.xlu1 %488, %v212_v0   ;;  %229 = vperm.xlu0 %486, %v212_v0   ;;  %v282_v24 = vsub.s32 4, %v219_v11  ;;  %v298_v31 = vsub.s32 5, %v219_v11  ;;  %v314_v44 = vsub.s32 6, %v219_v11  ;;  %v330_v55 = vsub.s32 7, %v219_v11 }
  0x14   : > { %v221_v20 = vrot.slane %v210_v17, %v220_v12  ;;  %v225_v21 = vrot.slane %v211_v18, %v220_v12  ;;  %v235_v22 = vrot.slane %v210_v17, %v234_v13  ;;  %v239_v23 = vrot.slane %v211_v18, %v234_v13 }
  0x15   : > { %v251_v25 = vrot.slane %v210_v17, %v250_v14  ;;  %v255_v26 = vrot.slane %v211_v18, %v250_v14  ;;  %v267_v28 = vrot.slane %v210_v17, %v266_v19  ;;  %v271_v29 = vrot.slane %v211_v18, %v266_v19 }
  0x16   : > { %v283_v36 = vrot.slane %v210_v17, %v282_v24  ;;  %v287_v37 = vrot.slane %v211_v18, %v282_v24  ;;  %v299_v42 = vrot.slane %v210_v17, %v298_v31  ;;  %v303_v43 = vrot.slane %v211_v18, %v298_v31 }
  0x17   : > { %489 = vset.pattern.permute.xlu1 %v522_v5  ;;  %490 = vset.pattern.permute.xlu0 %v523_v6  ;;  %v315_v58 = vrot.slane %v210_v17, %v314_v44  ;;  %v319_v59 = vrot.slane %v211_v18, %v314_v44  ;;  %v331_v63 = vrot.slane %v210_v17, %v330_v55 }
  0x18   : > { %277 = vperm.xlu1 %489, %v212_v0   ;;  %293 = vperm.xlu0 %490, %v212_v0  }
  0x1c   : > { %491 = vset.pattern.permute.xlu1 %v524_v8  ;;  %493 = vset.pattern.permute.xlu0 %v519_v2 }
  0x1d   : > { %309 = vperm.xlu1 %491, %v212_v0   ;;  %343 = vperm.xlu0 %493, %v340_v7  }
  0x21   : > { %492 = vset.pattern.permute.xlu1 %v525_v9 }
  0x22   : > { %325 = vperm.xlu1 %492, %v212_v0   ;;  %v335_v0 = vrot.slane %v211_v18, %v330_v55 }
  0x89   : > { %v246_v15 = vpop.permute.xlu1 %245  ;;  %v216_v16 = vpop.permute.xlu0 %215 }
  0x8a   : > { %v226_v32 = vmul.f32 %v221_v20, %v216_v16  ;;  %v227_v33 = vmul.f32 %v225_v21, %v216_v16  ;;  %v256_v38 = vmul.f32 %v251_v25, %v246_v15  ;;  %v257_v39 = vmul.f32 %v255_v26, %v246_v15 }
  0x8e   : > { %v262_v27 = vpop.permute.xlu1 %261  ;;  %v230_v30 = vpop.permute.xlu0 %229 }
  0x8f   : > { %v240_v34 = vmul.f32 %v235_v22, %v230_v30  ;;  %v241_v35 = vmul.f32 %v239_v23, %v230_v30  ;;  %v272_v45 = vmul.f32 %v267_v28, %v262_v27  ;;  %v273_v46 = vmul.f32 %v271_v29, %v262_v27 }
  0x91   : > { %v242_v40 = vadd.f32 %v240_v34, %v226_v32  ;;  %v243_v41 = vadd.f32 %v241_v35, %v227_v33 }
  0x93   : > { %v258_v47 = vadd.f32 %v256_v38, %v242_v40  ;;  %v259_v48 = vadd.f32 %v257_v39, %v243_v41  ;;  %v278_v49 = vpop.permute.xlu1 %277  ;;  %v294_v50 = vpop.permute.xlu0 %293 }
  0x94   : > { %v288_v51 = vmul.f32 %v283_v36, %v278_v49  ;;  %v289_v52 = vmul.f32 %v287_v37, %v278_v49  ;;  %v304_v56 = vmul.f32 %v299_v42, %v294_v50  ;;  %v305_v57 = vmul.f32 %v303_v43, %v294_v50 }
  0x95   : > { %v274_v53 = vadd.f32 %v272_v45, %v258_v47  ;;  %v275_v54 = vadd.f32 %v273_v46, %v259_v48 }
  0x97   : > { %v290_v60 = vadd.f32 %v288_v51, %v274_v53  ;;  %v291_v61 = vadd.f32 %v289_v52, %v275_v54 }
  0x98   : > { %v310_v62 = vpop.permute.xlu1 %309  ;;  %v344_v10 = vpop.permute.xlu0 %343 }
  0x99   : > { %v306_v1 = vadd.f32 %v304_v56, %v290_v60  ;;  %v307_v2 = vadd.f32 %v305_v57, %v291_v61  ;;  %v320_v3 = vmul.f32 %v315_v58, %v310_v62  ;;  %v321_v4 = vmul.f32 %v319_v59, %v310_v62 }
  0x9b   : > { %v322_v6 = vadd.f32 %v320_v3, %v306_v1  ;;  %v323_v7 = vadd.f32 %v321_v4, %v307_v2 }
  0x9d   : > { %v326_v5 = vpop.permute.xlu1 %325 }
  0x9e   : > { %v336_v8 = vmul.f32 %v331_v63, %v326_v5  ;;  %v337_v9 = vmul.f32 %v335_v0, %v326_v5 }
  0xa0   : > { %v338_v11 = vadd.f32 %v336_v8, %v322_v6  ;;  %v339_v12 = vadd.f32 %v337_v9, %v323_v7 }
  0xa2   : > { %v346_v13 = vadd.f32 %v344_v10, %v338_v11  ;;  %v347_v14 = vadd.f32 %v344_v10, %v339_v12 }
  0xa4   : > { %v350_v15 = vcombine.low %v346_v13, %v347_v14 }
  0xa6   : > { %352 = vst [vmem:[%s208_s27] sm:$0xff] %v350_v15 }
  0xa7 PF: > { %s13_s14 = sadd.s32 1, %s516_s14   ;;  %s597_s12 = smov %s512_s13 }
  0xa8   : > { %p10_p5 = scmp.ge.s32.totalorder %s13_s14, 4   ;;  %s598_s13 = smov %s600_s15 }
  0xaa   :  { %12 = sbr.rel (!%p10_p5) target bundleno = 2 (0x2), region = 62 }

</bundles_post_ra>
